<compile_context>
chip_gen: v7x
topology: tpu7x:2x2x1
jax: 0.10.0
libtpu: 0.0.40
codegen_flags: <defaults>
</compile_context>

<pallas_src>
import functools

import jax
import jax.numpy as jnp
from jax import lax
from jax.experimental import pallas as pl
from jax.experimental.pallas import tpu as pltpu


_CO = 8  # column offset of conv1's result inside the zero-bordered scratch (8-aligned store)


def _block_kernel(xph_ref, w1_ref, s1_ref, b1_ref, w2_ref, s2_ref, b2_ref,
                  cmask_ref, o_ref, y1_ref, *, Nb, H1, W1, W1p, Cp, s):
    """One grid step = Nb batch images.

    xph_ref : (Nb, s*s, Hph, Wph, Cp) bf16  stride-phase-split, spatially/channel padded input
    w1_ref  : (3, 3, Cp, Cp)          bf16  conv1 weights (HWIO, zero-padded channels)
    s1/b1   : (1, Cp)                 f32   fused BN1 scale / bias
    w2_ref  : (3, 3, Cp, Cp)          bf16  conv2 weights
    s2/b2   : (1, Cp)                 f32   fused BN2 scale / bias
    cmask   : (1, 1, W1p, Cp)         bf16  1 for valid output columns (< W1) else 0
    o_ref   : (Nb, H1, W1p, Cp)       f32   output (extra cols/channels sliced off outside)
    y1_ref  : (Nb, H1+2, W1p+16, Cp)  bf16  zero-bordered scratch holding conv1's output
    """
    M = Nb * H1 * W1p

    # ---- conv1 (3x3, stride s) + fused BN1 + ReLU, interior-only, bf16 MXU ----
    # Phase decomposition: tap (dh, dw) reads phase (dh%s, dw%s) at unit-stride offset
    # (dh//s, dw//s), so every slice below is contiguous.
    acc1 = None
    for dh in range(3):
        for dw in range(3):
            p = (dh % s) * s + (dw % s)
            oh, ow = dh // s, dw // s
            patch = xph_ref[:, p, oh:oh + H1, ow:ow + W1p, :].reshape(M, Cp)
            contrib = jnp.dot(patch, w1_ref[dh, dw],
                              preferred_element_type=jnp.float32)
            acc1 = contrib if acc1 is None else acc1 + contrib
    # TODO(synk): ApproxRelu(alpha=13) polynomial coefficients are not in the provided
    # source; exact ReLU is used instead.
    y1 = jnp.maximum(acc1 * s1_ref[...] + b1_ref[...], 0.0)
    y1 = y1.astype(jnp.bfloat16).reshape(Nb, H1, W1p, Cp)
    if W1p > W1:                       # zero the padded (junk) output columns j >= W1
        y1 = y1 * cmask_ref[...]

    # ---- zero-bordered scratch: its border acts as conv2's zero padding ----
    y1_ref[...] = jnp.zeros(y1_ref.shape, y1_ref.dtype)
    y1_ref[:, 1:1 + H1, _CO:_CO + W1p, :] = y1

    # ---- conv2 (3x3, stride 1) + fused BN2 ----
    acc2 = None
    for dh in range(3):
        for dw in range(3):
            patch = y1_ref[:, dh:dh + H1,
                           _CO - 1 + dw:_CO - 1 + dw + W1p, :].reshape(M, Cp)
            contrib = jnp.dot(patch, w2_ref[dh, dw],
                              preferred_element_type=jnp.float32)
            acc2 = contrib if acc2 is None else acc2 + contrib
    y2 = acc2 * s2_ref[...] + b2_ref[...]

    # ---- Shortcut: stride subsample == one contiguous slice of one phase; channels were
    # already zero-extended to Cp in the wrapper (== extend(dim=-3, size=c)) ----
    p_sc = (1 % s) * s + (1 % s)
    off = (1 - (1 % s)) // s
    sc = xph_ref[:, p_sc, off:off + H1, off:off + W1p, :].reshape(M, Cp)

    o_ref[...] = jnp.maximum(sc.astype(jnp.float32) + y2, 0.0).reshape(Nb, H1, W1p, Cp)


def _vmem_plan():
    """(per-step working budget, vmem_limit_bytes) per TPU generation."""
    try:
        kind = jax.devices()[0].device_kind.lower()
    except Exception:
        kind = ""
    if "v7" in kind:                        # 64 MiB physical VMEM: leave headroom
        return 24 << 20, 48 << 20
    if "v5" in kind or "v6" in kind:        # 128 MiB physical VMEM: take big blocks
        return 56 << 20, 100 << 20
    return 16 << 20, 32 << 20               # unknown: stay at the default scoped limit


def _pick_nb(N, rows_per_img, per_img_bytes, fixed_bytes, budget, row_target=512):
    """Largest batch block (divisor of N) within the VMEM budget, but keep >= 2 grid
    steps when N >= 2 (so the batch axis can shard across both v7x TensorCores) and stop
    growing once the MXU row target is reached."""
    cap = N // 2 if N >= 2 else 1
    best = 1
    for cand in range(1, max(cap, 1) + 1):
        if N % cand:
            continue
        if fixed_bytes + cand * per_img_bytes > budget:
            break
        best = cand
        if cand * rows_per_img >= row_target:
            break
    return best


def relu_basic_block(x_nchw, w1, s1, b1, w2, s2, b2, stride):
    """x_nchw: (N, in_c, H, W) f32.  Returns (N, C, ceil(H/stride), ceil(W/stride)) f32."""
    N, in_c, H, W = x_nchw.shape
    C = w1.shape[-1]
    if in_c > C:
        raise ValueError("Shortcut channel-extend requires in_c <= C")
    s = int(stride)
    if s not in (1, 2):
        raise NotImplementedError("only stride 1 or 2 (as used by the ResNet) is supported")

    H1 = (H - 1) // s + 1
    W1 = (W - 1) // s + 1
    W1p = -(-W1 // 8) * 8                   # 8-aligned output width (extra cols dropped)
    Cp = -(-C // 128) * 128                 # lane-dense channel padding
    ext = 2 // s                            # extra rows/cols each phase needs for the taps
    Hph = H1 + ext
    Wph = -(-(W1p + ext) // 8) * 8          # 8-aligned phase width (clean DMA tiling)

    # NCHW -> NHWC, zero-extend channels to Cp (realizes Shortcut.extend), cast bf16.
    x = jnp.transpose(x_nchw, (0, 2, 3, 1)).astype(jnp.float32)
    x = jnp.pad(x, ((0, 0), (0, 0), (0, 0), (0, Cp - in_c))).astype(jnp.bfloat16)
    # Left pad 1 (conv padding); right pad so every stride phase has exactly Hph x Wph.
    xpad = jnp.pad(x, ((0, 0), (1, s * Hph - H - 1), (1, s * Wph - W - 1), (0, 0)))
    # Split into the s*s stride phases: (N, s*s, Hph, Wph, Cp), phase index = ph_h*s + ph_w.
    xph = xpad.reshape(N, Hph, s, Wph, s, Cp)
    xph = xph.transpose(0, 2, 4, 1, 3, 5).reshape(N, s * s, Hph, Wph, Cp)

    # Weights / fused BN params, zero-padded to Cp (padded rows/cols contribute zero).
    w1p = jnp.pad(w1.astype(jnp.float32),
                  ((0, 0), (0, 0), (0, Cp - in_c), (0, Cp - C))).astype(jnp.bfloat16)
    w2p = jnp.pad(w2.astype(jnp.float32),
                  ((0, 0), (0, 0), (0, Cp - C), (0, Cp - C))).astype(jnp.bfloat16)
    pad_c = lambda v: jnp.pad(v.reshape(1, C).astype(jnp.float32), ((0, 0), (0, Cp - C)))
    s1r, b1r, s2r, b2r = pad_c(s1), pad_c(b1), pad_c(s2), pad_c(b2)
    cmask = jnp.broadcast_to(
        (jnp.arange(W1p) < W1).astype(jnp.bfloat16)[None, None, :, None],
        (1, 1, W1p, Cp))

    # Batch-block choice with a real VMEM model (double-buffered in/out, scratch, temps).
    budget, vmem_limit = _vmem_plan()
    in_img = s * s * Hph * Wph * Cp * 2                    # bf16 input block
    out_img = H1 * W1p * Cp * 4                            # f32 output block
    scr_img = (H1 + 2) * (W1p + 16) * Cp * 2               # bf16 scratch
    tmp_img = 6 * H1 * W1p * Cp * 4                        # acc1/acc2/y1/patch temporaries
    per_img = 2 * in_img + 2 * out_img + scr_img + tmp_img
    fixed = 2 * (2 * 9 * Cp * Cp * 2) + 8 * Cp * 4 + W1p * Cp * 2
    Nb = _pick_nb(N, H1 * W1p, per_img, fixed, budget)

    kernel = functools.partial(_block_kernel, Nb=Nb, H1=H1, W1=W1, W1p=W1p, Cp=Cp, s=s)
    grid = (N // Nb,)

    def build(single_buffer_consts):
        def const_spec(shape):
            idx = lambda n, _s=shape: (0,) * len(_s)
            if single_buffer_consts:
                return pl.BlockSpec(shape, idx, pipeline_mode=pl.Buffered(1))
            return pl.BlockSpec(shape, idx)

        return pl.pallas_call(
            kernel,
            out_shape=jax.ShapeDtypeStruct((N, H1, W1p, Cp), jnp.float32),
            grid_spec=pltpu.PrefetchScalarGridSpec(
                num_scalar_prefetch=0,
                grid=grid,
                in_specs=[
                    pl.BlockSpec((Nb, s * s, Hph, Wph, Cp), lambda n: (n, 0, 0, 0, 0)),
                    const_spec((3, 3, Cp, Cp)),   # w1
                    const_spec((1, Cp)),          # s1
                    const_spec((1, Cp)),          # b1
                    const_spec((3, 3, Cp, Cp)),   # w2
                    const_spec((1, Cp)),          # s2
                    const_spec((1, Cp)),          # b2
                    const_spec((1, 1, W1p, Cp)),  # column mask
                ],
                out_specs=pl.BlockSpec((Nb, H1, W1p, Cp), lambda n: (n, 0, 0, 0)),
                scratch_shapes=[pltpu.VMEM((Nb, H1 + 2, W1p + 16, Cp), jnp.bfloat16)],
            ),
            compiler_params=pltpu.CompilerParams(
                dimension_semantics=("parallel",),
                vmem_limit_bytes=vmem_limit),
        )

    args = (xph, w1p, s1r, b1r, w2p, s2r, b2r, cmask)
    try:
        out_nhwc = jax.block_until_ready(build(True)(*args))
    except Exception:
        # Fallback if single-buffered constant operands (pl.Buffered(1)) are rejected.
        out_nhwc = build(False)(*args)

    out_nhwc = out_nhwc[:, :, :W1, :C]              # drop column / lane padding
    return jnp.transpose(out_nhwc, (0, 3, 1, 2))    # back to NCHW


def ref_forward(x_nchw, w1, s1, b1, w2, s2, b2, stride, C):
    """Pure-JAX f32 reference (lax.conv, HIGHEST precision)."""
    N, in_c, H, W = x_nchw.shape
    x = jnp.transpose(x_nchw, (0, 2, 3, 1)).astype(jnp.float32)
    dn = ('NHWC', 'HWIO', 'NHWC')
    y = lax.conv_general_dilated(x, w1.astype(jnp.float32), (stride, stride),
                                 ((1, 1), (1, 1)), dimension_numbers=dn,
                                 precision=lax.Precision.HIGHEST)
    y = jnp.maximum(y * s1 + b1, 0.0)
    y = lax.conv_general_dilated(y, w2.astype(jnp.float32), (1, 1),
                                 ((1, 1), (1, 1)), dimension_numbers=dn,
                                 precision=lax.Precision.HIGHEST)
    y = y * s2 + b2
    sc = x[:, ::stride, ::stride, :]
    sc = jnp.pad(sc, ((0, 0), (0, 0), (0, 0), (0, C - in_c)))
    out = jnp.maximum(sc + y, 0.0)
    return jnp.transpose(out, (0, 3, 1, 2))


def _run_case(key, N, in_c, C, H, W, stride, eps=1e-5):
    keys = jax.random.split(key, 11)
    # Inputs/weights are rounded to bf16-representable values (the kernel feeds bf16 MXU
    # operands); the f32 reference then shares exactly the same operand values.
    q = lambda a: a.astype(jnp.bfloat16).astype(jnp.float32)
    x = q(jax.random.normal(keys[0], (N, in_c, H, W), jnp.float32))
    w1 = q(jax.random.normal(keys[1], (3, 3, in_c, C), jnp.float32) * 0.2)
    w2 = q(jax.random.normal(keys[2], (3, 3, C, C), jnp.float32) * 0.2)
    g1 = jax.random.uniform(keys[3], (C,), jnp.float32, 0.5, 1.5)
    be1 = jax.random.normal(keys[4], (C,), jnp.float32) * 0.1
    m1 = jax.random.normal(keys[5], (C,), jnp.float32) * 0.1
    v1 = jax.random.uniform(keys[6], (C,), jnp.float32, 0.5, 1.5)
    g2 = jax.random.uniform(keys[7], (C,), jnp.float32, 0.5, 1.5)
    be2 = jax.random.normal(keys[8], (C,), jnp.float32) * 0.1
    m2 = jax.random.normal(keys[9], (C,), jnp.float32) * 0.1
    v2 = jax.random.uniform(keys[10], (C,), jnp.float32, 0.5, 1.5)

    # Fold BatchNorm (inference) into per-channel scale/bias.
    s1 = g1 * lax.rsqrt(v1 + eps)
    b1 = be1 - m1 * s1
    s2 = g2 * lax.rsqrt(v2 + eps)
    b2 = be2 - m2 * s2

    out = jax.block_until_ready(relu_basic_block(x, w1, s1, b1, w2, s2, b2, stride))
    H1 = (H - 1) // stride + 1
    W1 = (W - 1) // stride + 1
    assert out.shape == (N, C, H1, W1), out.shape

    ref = ref_forward(x, w1, s1, b1, w2, s2, b2, stride, C)
    if not jnp.allclose(out, ref, atol=3e-2, rtol=3e-2):
        err = float(jnp.max(jnp.abs(out - ref)))
        raise AssertionError(f"Pallas kernel does not match reference (max abs err {err})")


if __name__ == "__main__":
    key = jax.random.PRNGKey(0)
    k1, k2 = jax.random.split(key)
    # Case A: stride-2 block, even spatial dims (no column padding path).
    _run_case(k1, N=2, in_c=4, C=8, H=16, W=16, stride=2)
    # Case B: stride-1 block, odd spatial dims (exercises the padded-column mask),
    # in_c < C channel extension, non-power-of-two batch.
    _run_case(k2, N=3, in_c=3, C=8, H=9, W=9, stride=1)
    print("KERNEL_OK")
</pallas_src>

<mosaic_0001>
module attributes {stable_mosaic.version = 11 : i64} {
  func.func @_block_kernel(%arg0: i32, %arg1: memref<1x4x9x16x128xbf16, #tpu.memory_space<vmem>>, %arg2: memref<3x3x128x128xbf16, #tpu.memory_space<vmem>>, %arg3: memref<1x128xf32, #tpu.memory_space<vmem>>, %arg4: memref<1x128xf32, #tpu.memory_space<vmem>>, %arg5: memref<3x3x128x128xbf16, #tpu.memory_space<vmem>>, %arg6: memref<1x128xf32, #tpu.memory_space<vmem>>, %arg7: memref<1x128xf32, #tpu.memory_space<vmem>>, %arg8: memref<1x1x8x128xbf16, #tpu.memory_space<vmem>>, %arg9: memref<1x8x8x128xf32, #tpu.memory_space<vmem>>, %arg10: memref<1x10x24x128xbf16, #tpu.memory_space<vmem>>) attributes {dimension_semantics = [#tpu.dimension_semantics<parallel>], iteration_bounds = array<i64: 2>, scalar_prefetch = 0 : i64, scratch_operands = 1 : i64, tpu.core_type = #tpu.core_type<tc>, window_params = [{transform_indices = @transform_0, window_bounds = array<i64: 1, 4, 9, 16, 128>}, {pipeline_mode = #tpu.pipeline_mode<synchronous>, transform_indices = @transform_1, window_bounds = array<i64: 3, 3, 128, 128>}, {pipeline_mode = #tpu.pipeline_mode<synchronous>, transform_indices = @transform_2, window_bounds = array<i64: 1, 128>}, {pipeline_mode = #tpu.pipeline_mode<synchronous>, transform_indices = @transform_3, window_bounds = array<i64: 1, 128>}, {pipeline_mode = #tpu.pipeline_mode<synchronous>, transform_indices = @transform_4, window_bounds = array<i64: 3, 3, 128, 128>}, {pipeline_mode = #tpu.pipeline_mode<synchronous>, transform_indices = @transform_5, window_bounds = array<i64: 1, 128>}, {pipeline_mode = #tpu.pipeline_mode<synchronous>, transform_indices = @transform_6, window_bounds = array<i64: 1, 128>}, {pipeline_mode = #tpu.pipeline_mode<synchronous>, transform_indices = @transform_7, window_bounds = array<i64: 1, 1, 8, 128>}, {transform_indices = @transform_8, window_bounds = array<i64: 1, 8, 8, 128>}]} {
    %c0 = arith.constant 0 : index
    %c0_0 = arith.constant 0 : index
    %c0_1 = arith.constant 0 : index
    %c0_2 = arith.constant 0 : index
    %c0_3 = arith.constant 0 : index
    %0 = vector.load %arg1[%c0, %c0_0, %c0_1, %c0_2, %c0_3] : memref<1x4x9x16x128xbf16, #tpu.memory_space<vmem>>, vector<1x1x8x8x128xbf16>
    %1 = vector.shape_cast %0 : vector<1x1x8x8x128xbf16> to vector<1x8x8x128xbf16>
    %2 = vector.shape_cast %1 : vector<1x8x8x128xbf16> to vector<64x128xbf16>
    %c0_4 = arith.constant 0 : index
    %c0_5 = arith.constant 0 : index
    %c0_6 = arith.constant 0 : index
    %c0_7 = arith.constant 0 : index
    %3 = vector.load %arg2[%c0_4, %c0_5, %c0_6, %c0_7] : memref<3x3x128x128xbf16, #tpu.memory_space<vmem>>, vector<1x1x128x128xbf16>
    %4 = vector.shape_cast %3 : vector<1x1x128x128xbf16> to vector<128x128xbf16>
    %cst = arith.constant dense<0.000000e+00> : vector<64x128xf32>
    %5 = tpu.matmul %2, %4, %cst {dimension_numbers = #tpu.dot_dimension_numbers<[1], [0], [0], [1], [0, 0, 1, 1], [], []>} : vector<64x128xbf16>, vector<128x128xbf16>, vector<64x128xf32> -> vector<64x128xf32>
    %c0_8 = arith.constant 0 : index
    %c1 = arith.constant 1 : index
    %c0_9 = arith.constant 0 : index
    %c0_10 = arith.constant 0 : index
    %c0_11 = arith.constant 0 : index
    %6 = vector.load %arg1[%c0_8, %c1, %c0_9, %c0_10, %c0_11] : memref<1x4x9x16x128xbf16, #tpu.memory_space<vmem>>, vector<1x1x8x8x128xbf16>
    %7 = vector.shape_cast %6 : vector<1x1x8x8x128xbf16> to vector<1x8x8x128xbf16>
    %8 = vector.shape_cast %7 : vector<1x8x8x128xbf16> to vector<64x128xbf16>
    %c0_12 = arith.constant 0 : index
    %c1_13 = arith.constant 1 : index
    %c0_14 = arith.constant 0 : index
    %c0_15 = arith.constant 0 : index
    %9 = vector.load %arg2[%c0_12, %c1_13, %c0_14, %c0_15] : memref<3x3x128x128xbf16, #tpu.memory_space<vmem>>, vector<1x1x128x128xbf16>
    %10 = vector.shape_cast %9 : vector<1x1x128x128xbf16> to vector<128x128xbf16>
    %cst_16 = arith.constant dense<0.000000e+00> : vector<64x128xf32>
    %11 = tpu.matmul %8, %10, %cst_16 {dimension_numbers = #tpu.dot_dimension_numbers<[1], [0], [0], [1], [0, 0, 1, 1], [], []>} : vector<64x128xbf16>, vector<128x128xbf16>, vector<64x128xf32> -> vector<64x128xf32>
    %12 = arith.addf %5, %11 : vector<64x128xf32>
    %c0_17 = arith.constant 0 : index
    %c0_18 = arith.constant 0 : index
    %c0_19 = arith.constant 0 : index
    %c1_20 = arith.constant 1 : index
    %c0_21 = arith.constant 0 : index
    %13 = vector.load %arg1[%c0_17, %c0_18, %c0_19, %c1_20, %c0_21] : memref<1x4x9x16x128xbf16, #tpu.memory_space<vmem>>, vector<1x1x8x8x128xbf16>
    %14 = vector.shape_cast %13 : vector<1x1x8x8x128xbf16> to vector<1x8x8x128xbf16>
    %15 = vector.shape_cast %14 : vector<1x8x8x128xbf16> to vector<64x128xbf16>
    %c0_22 = arith.constant 0 : index
    %c2 = arith.constant 2 : index
    %c0_23 = arith.constant 0 : index
    %c0_24 = arith.constant 0 : index
    %16 = vector.load %arg2[%c0_22, %c2, %c0_23, %c0_24] : memref<3x3x128x128xbf16, #tpu.memory_space<vmem>>, vector<1x1x128x128xbf16>
    %17 = vector.shape_cast %16 : vector<1x1x128x128xbf16> to vector<128x128xbf16>
    %cst_25 = arith.constant dense<0.000000e+00> : vector<64x128xf32>
    %18 = tpu.matmul %15, %17, %cst_25 {dimension_numbers = #tpu.dot_dimension_numbers<[1], [0], [0], [1], [0, 0, 1, 1], [], []>} : vector<64x128xbf16>, vector<128x128xbf16>, vector<64x128xf32> -> vector<64x128xf32>
    %19 = arith.addf %12, %18 : vector<64x128xf32>
    %c0_26 = arith.constant 0 : index
    %c2_27 = arith.constant 2 : index
    %c0_28 = arith.constant 0 : index
    %c0_29 = arith.constant 0 : index
    %c0_30 = arith.constant 0 : index
    %20 = vector.load %arg1[%c0_26, %c2_27, %c0_28, %c0_29, %c0_30] : memref<1x4x9x16x128xbf16, #tpu.memory_space<vmem>>, vector<1x1x8x8x128xbf16>
    %21 = vector.shape_cast %20 : vector<1x1x8x8x128xbf16> to vector<1x8x8x128xbf16>
    %22 = vector.shape_cast %21 : vector<1x8x8x128xbf16> to vector<64x128xbf16>
    %c1_31 = arith.constant 1 : index
    %c0_32 = arith.constant 0 : index
    %c0_33 = arith.constant 0 : index
    %c0_34 = arith.constant 0 : index
    %23 = vector.load %arg2[%c1_31, %c0_32, %c0_33, %c0_34] : memref<3x3x128x128xbf16, #tpu.memory_space<vmem>>, vector<1x1x128x128xbf16>
    %24 = vector.shape_cast %23 : vector<1x1x128x128xbf16> to vector<128x128xbf16>
    %cst_35 = arith.constant dense<0.000000e+00> : vector<64x128xf32>
    %25 = tpu.matmul %22, %24, %cst_35 {dimension_numbers = #tpu.dot_dimension_numbers<[1], [0], [0], [1], [0, 0, 1, 1], [], []>} : vector<64x128xbf16>, vector<128x128xbf16>, vector<64x128xf32> -> vector<64x128xf32>
    %26 = arith.addf %19, %25 : vector<64x128xf32>
    %c0_36 = arith.constant 0 : index
    %c3 = arith.constant 3 : index
    %c0_37 = arith.constant 0 : index
    %c0_38 = arith.constant 0 : index
    %c0_39 = arith.constant 0 : index
    %27 = vector.load %arg1[%c0_36, %c3, %c0_37, %c0_38, %c0_39] : memref<1x4x9x16x128xbf16, #tpu.memory_space<vmem>>, vector<1x1x8x8x128xbf16>
    %28 = vector.shape_cast %27 : vector<1x1x8x8x128xbf16> to vector<1x8x8x128xbf16>
    %29 = vector.shape_cast %28 : vector<1x8x8x128xbf16> to vector<64x128xbf16>
    %c1_40 = arith.constant 1 : index
    %c1_41 = arith.constant 1 : index
    %c0_42 = arith.constant 0 : index
    %c0_43 = arith.constant 0 : index
    %30 = vector.load %arg2[%c1_40, %c1_41, %c0_42, %c0_43] : memref<3x3x128x128xbf16, #tpu.memory_space<vmem>>, vector<1x1x128x128xbf16>
    %31 = vector.shape_cast %30 : vector<1x1x128x128xbf16> to vector<128x128xbf16>
    %cst_44 = arith.constant dense<0.000000e+00> : vector<64x128xf32>
    %32 = tpu.matmul %29, %31, %cst_44 {dimension_numbers = #tpu.dot_dimension_numbers<[1], [0], [0], [1], [0, 0, 1, 1], [], []>} : vector<64x128xbf16>, vector<128x128xbf16>, vector<64x128xf32> -> vector<64x128xf32>
    %33 = arith.addf %26, %32 : vector<64x128xf32>
    %c0_45 = arith.constant 0 : index
    %c2_46 = arith.constant 2 : index
    %c0_47 = arith.constant 0 : index
    %c1_48 = arith.constant 1 : index
    %c0_49 = arith.constant 0 : index
    %34 = vector.load %arg1[%c0_45, %c2_46, %c0_47, %c1_48, %c0_49] : memref<1x4x9x16x128xbf16, #tpu.memory_space<vmem>>, vector<1x1x8x8x128xbf16>
    %35 = vector.shape_cast %34 : vector<1x1x8x8x128xbf16> to vector<1x8x8x128xbf16>
    %36 = vector.shape_cast %35 : vector<1x8x8x128xbf16> to vector<64x128xbf16>
    %c1_50 = arith.constant 1 : index
    %c2_51 = arith.constant 2 : index
    %c0_52 = arith.constant 0 : index
    %c0_53 = arith.constant 0 : index
    %37 = vector.load %arg2[%c1_50, %c2_51, %c0_52, %c0_53] : memref<3x3x128x128xbf16, #tpu.memory_space<vmem>>, vector<1x1x128x128xbf16>
    %38 = vector.shape_cast %37 : vector<1x1x128x128xbf16> to vector<128x128xbf16>
    %cst_54 = arith.constant dense<0.000000e+00> : vector<64x128xf32>
    %39 = tpu.matmul %36, %38, %cst_54 {dimension_numbers = #tpu.dot_dimension_numbers<[1], [0], [0], [1], [0, 0, 1, 1], [], []>} : vector<64x128xbf16>, vector<128x128xbf16>, vector<64x128xf32> -> vector<64x128xf32>
    %40 = arith.addf %33, %39 : vector<64x128xf32>
    %c0_55 = arith.constant 0 : index
    %c0_56 = arith.constant 0 : index
    %c1_57 = arith.constant 1 : index
    %c0_58 = arith.constant 0 : index
    %c0_59 = arith.constant 0 : index
    %41 = vector.load %arg1[%c0_55, %c0_56, %c1_57, %c0_58, %c0_59] : memref<1x4x9x16x128xbf16, #tpu.memory_space<vmem>>, vector<1x1x8x8x128xbf16>
    %42 = vector.shape_cast %41 : vector<1x1x8x8x128xbf16> to vector<1x8x8x128xbf16>
    %43 = vector.shape_cast %42 : vector<1x8x8x128xbf16> to vector<64x128xbf16>
    %c2_60 = arith.constant 2 : index
    %c0_61 = arith.constant 0 : index
    %c0_62 = arith.constant 0 : index
    %c0_63 = arith.constant 0 : index
    %44 = vector.load %arg2[%c2_60, %c0_61, %c0_62, %c0_63] : memref<3x3x128x128xbf16, #tpu.memory_space<vmem>>, vector<1x1x128x128xbf16>
    %45 = vector.shape_cast %44 : vector<1x1x128x128xbf16> to vector<128x128xbf16>
    %cst_64 = arith.constant dense<0.000000e+00> : vector<64x128xf32>
    %46 = tpu.matmul %43, %45, %cst_64 {dimension_numbers = #tpu.dot_dimension_numbers<[1], [0], [0], [1], [0, 0, 1, 1], [], []>} : vector<64x128xbf16>, vector<128x128xbf16>, vector<64x128xf32> -> vector<64x128xf32>
    %47 = arith.addf %40, %46 : vector<64x128xf32>
    %c0_65 = arith.constant 0 : index
    %c1_66 = arith.constant 1 : index
    %c1_67 = arith.constant 1 : index
    %c0_68 = arith.constant 0 : index
    %c0_69 = arith.constant 0 : index
    %48 = vector.load %arg1[%c0_65, %c1_66, %c1_67, %c0_68, %c0_69] : memref<1x4x9x16x128xbf16, #tpu.memory_space<vmem>>, vector<1x1x8x8x128xbf16>
    %49 = vector.shape_cast %48 : vector<1x1x8x8x128xbf16> to vector<1x8x8x128xbf16>
    %50 = vector.shape_cast %49 : vector<1x8x8x128xbf16> to vector<64x128xbf16>
    %c2_70 = arith.constant 2 : index
    %c1_71 = arith.constant 1 : index
    %c0_72 = arith.constant 0 : index
    %c0_73 = arith.constant 0 : index
    %51 = vector.load %arg2[%c2_70, %c1_71, %c0_72, %c0_73] : memref<3x3x128x128xbf16, #tpu.memory_space<vmem>>, vector<1x1x128x128xbf16>
    %52 = vector.shape_cast %51 : vector<1x1x128x128xbf16> to vector<128x128xbf16>
    %cst_74 = arith.constant dense<0.000000e+00> : vector<64x128xf32>
    %53 = tpu.matmul %50, %52, %cst_74 {dimension_numbers = #tpu.dot_dimension_numbers<[1], [0], [0], [1], [0, 0, 1, 1], [], []>} : vector<64x128xbf16>, vector<128x128xbf16>, vector<64x128xf32> -> vector<64x128xf32>
    %54 = arith.addf %47, %53 : vector<64x128xf32>
    %c0_75 = arith.constant 0 : index
    %c0_76 = arith.constant 0 : index
    %c1_77 = arith.constant 1 : index
    %c1_78 = arith.constant 1 : index
    %c0_79 = arith.constant 0 : index
    %55 = vector.load %arg1[%c0_75, %c0_76, %c1_77, %c1_78, %c0_79] : memref<1x4x9x16x128xbf16, #tpu.memory_space<vmem>>, vector<1x1x8x8x128xbf16>
    %56 = vector.shape_cast %55 : vector<1x1x8x8x128xbf16> to vector<1x8x8x128xbf16>
    %57 = vector.shape_cast %56 : vector<1x8x8x128xbf16> to vector<64x128xbf16>
    %c2_80 = arith.constant 2 : index
    %c2_81 = arith.constant 2 : index
    %c0_82 = arith.constant 0 : index
    %c0_83 = arith.constant 0 : index
    %58 = vector.load %arg2[%c2_80, %c2_81, %c0_82, %c0_83] : memref<3x3x128x128xbf16, #tpu.memory_space<vmem>>, vector<1x1x128x128xbf16>
    %59 = vector.shape_cast %58 : vector<1x1x128x128xbf16> to vector<128x128xbf16>
    %cst_84 = arith.constant dense<0.000000e+00> : vector<64x128xf32>
    %60 = tpu.matmul %57, %59, %cst_84 {dimension_numbers = #tpu.dot_dimension_numbers<[1], [0], [0], [1], [0, 0, 1, 1], [], []>} : vector<64x128xbf16>, vector<128x128xbf16>, vector<64x128xf32> -> vector<64x128xf32>
    %61 = arith.addf %54, %60 : vector<64x128xf32>
    %c0_85 = arith.constant 0 : index
    %c0_86 = arith.constant 0 : index
    %62 = vector.load %arg3[%c0_85, %c0_86] : memref<1x128xf32, #tpu.memory_space<vmem>>, vector<1x128xf32>
    %63 = vector.broadcast %62 : vector<1x128xf32> to vector<64x128xf32>
    %64 = arith.mulf %61, %63 : vector<64x128xf32>
    %c0_87 = arith.constant 0 : index
    %c0_88 = arith.constant 0 : index
    %65 = vector.load %arg4[%c0_87, %c0_88] : memref<1x128xf32, #tpu.memory_space<vmem>>, vector<1x128xf32>
    %66 = vector.broadcast %65 : vector<1x128xf32> to vector<64x128xf32>
    %67 = arith.addf %64, %66 : vector<64x128xf32>
    %cst_89 = arith.constant 0.000000e+00 : f32
    %68 = vector.broadcast %cst_89 : f32 to vector<64x128xf32>
    %69 = arith.maximumf %67, %68 : vector<64x128xf32>
    %70 = arith.truncf %69 : vector<64x128xf32> to vector<64x128xbf16>
    %71 = vector.shape_cast %70 : vector<64x128xbf16> to vector<1x8x8x128xbf16>
    %cst_90 = arith.constant 0.000000e+00 : bf16
    %72 = vector.broadcast %cst_90 : bf16 to vector<1x10x24x128xbf16>
    %c0_91 = arith.constant 0 : index
    %c0_92 = arith.constant 0 : index
    %c0_93 = arith.constant 0 : index
    %c0_94 = arith.constant 0 : index
    %73 = vector.load %arg10[%c0_91, %c0_92, %c0_93, %c0_94] : memref<1x10x24x128xbf16, #tpu.memory_space<vmem>>, vector<1x10x24x128xbf16>
    tpu.vector_store %arg10[%c0_91, %c0_92, %c0_93, %c0_94], %72 {strides = array<i32>} : memref<1x10x24x128xbf16, #tpu.memory_space<vmem>>, vector<1x10x24x128xbf16>,
    %c0_95 = arith.constant 0 : index
    %c1_96 = arith.constant 1 : index
    %c8 = arith.constant 8 : index
    %c0_97 = arith.constant 0 : index
    %74 = vector.load %arg10[%c0_95, %c1_96, %c8, %c0_97] : memref<1x10x24x128xbf16, #tpu.memory_space<vmem>>, vector<1x8x8x128xbf16>
    tpu.vector_store %arg10[%c0_95, %c1_96, %c8, %c0_97], %71 {strides = array<i32>} : memref<1x10x24x128xbf16, #tpu.memory_space<vmem>>, vector<1x8x8x128xbf16>,
    %c0_98 = arith.constant 0 : index
    %c0_99 = arith.constant 0 : index
    %c7 = arith.constant 7 : index
    %c0_100 = arith.constant 0 : index
    %75 = vector.load %arg10[%c0_98, %c0_99, %c7, %c0_100] : memref<1x10x24x128xbf16, #tpu.memory_space<vmem>>, vector<1x8x8x128xbf16>
    %76 = vector.shape_cast %75 : vector<1x8x8x128xbf16> to vector<64x128xbf16>
    %c0_101 = arith.constant 0 : index
    %c0_102 = arith.constant 0 : index
    %c0_103 = arith.constant 0 : index
    %c0_104 = arith.constant 0 : index
    %77 = vector.load %arg5[%c0_101, %c0_102, %c0_103, %c0_104] : memref<3x3x128x128xbf16, #tpu.memory_space<vmem>>, vector<1x1x128x128xbf16>
    %78 = vector.shape_cast %77 : vector<1x1x128x128xbf16> to vector<128x128xbf16>
    %cst_105 = arith.constant dense<0.000000e+00> : vector<64x128xf32>
    %79 = tpu.matmul %76, %78, %cst_105 {dimension_numbers = #tpu.dot_dimension_numbers<[1], [0], [0], [1], [0, 0, 1, 1], [], []>} : vector<64x128xbf16>, vector<128x128xbf16>, vector<64x128xf32> -> vector<64x128xf32>
    %c0_106 = arith.constant 0 : index
    %c0_107 = arith.constant 0 : index
    %c8_108 = arith.constant 8 : index
    %c0_109 = arith.constant 0 : index
    %80 = vector.load %arg10[%c0_106, %c0_107, %c8_108, %c0_109] : memref<1x10x24x128xbf16, #tpu.memory_space<vmem>>, vector<1x8x8x128xbf16>
    %81 = vector.shape_cast %80 : vector<1x8x8x128xbf16> to vector<64x128xbf16>
    %c0_110 = arith.constant 0 : index
    %c1_111 = arith.constant 1 : index
    %c0_112 = arith.constant 0 : index
    %c0_113 = arith.constant 0 : index
    %82 = vector.load %arg5[%c0_110, %c1_111, %c0_112, %c0_113] : memref<3x3x128x128xbf16, #tpu.memory_space<vmem>>, vector<1x1x128x128xbf16>
    %83 = vector.shape_cast %82 : vector<1x1x128x128xbf16> to vector<128x128xbf16>
    %cst_114 = arith.constant dense<0.000000e+00> : vector<64x128xf32>
    %84 = tpu.matmul %81, %83, %cst_114 {dimension_numbers = #tpu.dot_dimension_numbers<[1], [0], [0], [1], [0, 0, 1, 1], [], []>} : vector<64x128xbf16>, vector<128x128xbf16>, vector<64x128xf32> -> vector<64x128xf32>
    %85 = arith.addf %79, %84 : vector<64x128xf32>
    %c0_115 = arith.constant 0 : index
    %c0_116 = arith.constant 0 : index
    %c9 = arith.constant 9 : index
    %c0_117 = arith.constant 0 : index
    %86 = vector.load %arg10[%c0_115, %c0_116, %c9, %c0_117] : memref<1x10x24x128xbf16, #tpu.memory_space<vmem>>, vector<1x8x8x128xbf16>
    %87 = vector.shape_cast %86 : vector<1x8x8x128xbf16> to vector<64x128xbf16>
    %c0_118 = arith.constant 0 : index
    %c2_119 = arith.constant 2 : index
    %c0_120 = arith.constant 0 : index
    %c0_121 = arith.constant 0 : index
    %88 = vector.load %arg5[%c0_118, %c2_119, %c0_120, %c0_121] : memref<3x3x128x128xbf16, #tpu.memory_space<vmem>>, vector<1x1x128x128xbf16>
    %89 = vector.shape_cast %88 : vector<1x1x128x128xbf16> to vector<128x128xbf16>
    %cst_122 = arith.constant dense<0.000000e+00> : vector<64x128xf32>
    %90 = tpu.matmul %87, %89, %cst_122 {dimension_numbers = #tpu.dot_dimension_numbers<[1], [0], [0], [1], [0, 0, 1, 1], [], []>} : vector<64x128xbf16>, vector<128x128xbf16>, vector<64x128xf32> -> vector<64x128xf32>
    %91 = arith.addf %85, %90 : vector<64x128xf32>
    %c0_123 = arith.constant 0 : index
    %c1_124 = arith.constant 1 : index
    %c7_125 = arith.constant 7 : index
    %c0_126 = arith.constant 0 : index
    %92 = vector.load %arg10[%c0_123, %c1_124, %c7_125, %c0_126] : memref<1x10x24x128xbf16, #tpu.memory_space<vmem>>, vector<1x8x8x128xbf16>
    %93 = vector.shape_cast %92 : vector<1x8x8x128xbf16> to vector<64x128xbf16>
    %c1_127 = arith.constant 1 : index
    %c0_128 = arith.constant 0 : index
    %c0_129 = arith.constant 0 : index
    %c0_130 = arith.constant 0 : index
    %94 = vector.load %arg5[%c1_127, %c0_128, %c0_129, %c0_130] : memref<3x3x128x128xbf16, #tpu.memory_space<vmem>>, vector<1x1x128x128xbf16>
    %95 = vector.shape_cast %94 : vector<1x1x128x128xbf16> to vector<128x128xbf16>
    %cst_131 = arith.constant dense<0.000000e+00> : vector<64x128xf32>
    %96 = tpu.matmul %93, %95, %cst_131 {dimension_numbers = #tpu.dot_dimension_numbers<[1], [0], [0], [1], [0, 0, 1, 1], [], []>} : vector<64x128xbf16>, vector<128x128xbf16>, vector<64x128xf32> -> vector<64x128xf32>
    %97 = arith.addf %91, %96 : vector<64x128xf32>
    %c0_132 = arith.constant 0 : index
    %c1_133 = arith.constant 1 : index
    %c8_134 = arith.constant 8 : index
    %c0_135 = arith.constant 0 : index
    %98 = vector.load %arg10[%c0_132, %c1_133, %c8_134, %c0_135] : memref<1x10x24x128xbf16, #tpu.memory_space<vmem>>, vector<1x8x8x128xbf16>
    %99 = vector.shape_cast %98 : vector<1x8x8x128xbf16> to vector<64x128xbf16>
    %c1_136 = arith.constant 1 : index
    %c1_137 = arith.constant 1 : index
    %c0_138 = arith.constant 0 : index
    %c0_139 = arith.constant 0 : index
    %100 = vector.load %arg5[%c1_136, %c1_137, %c0_138, %c0_139] : memref<3x3x128x128xbf16, #tpu.memory_space<vmem>>, vector<1x1x128x128xbf16>
    %101 = vector.shape_cast %100 : vector<1x1x128x128xbf16> to vector<128x128xbf16>
    %cst_140 = arith.constant dense<0.000000e+00> : vector<64x128xf32>
    %102 = tpu.matmul %99, %101, %cst_140 {dimension_numbers = #tpu.dot_dimension_numbers<[1], [0], [0], [1], [0, 0, 1, 1], [], []>} : vector<64x128xbf16>, vector<128x128xbf16>, vector<64x128xf32> -> vector<64x128xf32>
    %103 = arith.addf %97, %102 : vector<64x128xf32>
    %c0_141 = arith.constant 0 : index
    %c1_142 = arith.constant 1 : index
    %c9_143 = arith.constant 9 : index
    %c0_144 = arith.constant 0 : index
    %104 = vector.load %arg10[%c0_141, %c1_142, %c9_143, %c0_144] : memref<1x10x24x128xbf16, #tpu.memory_space<vmem>>, vector<1x8x8x128xbf16>
    %105 = vector.shape_cast %104 : vector<1x8x8x128xbf16> to vector<64x128xbf16>
    %c1_145 = arith.constant 1 : index
    %c2_146 = arith.constant 2 : index
    %c0_147 = arith.constant 0 : index
    %c0_148 = arith.constant 0 : index
    %106 = vector.load %arg5[%c1_145, %c2_146, %c0_147, %c0_148] : memref<3x3x128x128xbf16, #tpu.memory_space<vmem>>, vector<1x1x128x128xbf16>
    %107 = vector.shape_cast %106 : vector<1x1x128x128xbf16> to vector<128x128xbf16>
    %cst_149 = arith.constant dense<0.000000e+00> : vector<64x128xf32>
    %108 = tpu.matmul %105, %107, %cst_149 {dimension_numbers = #tpu.dot_dimension_numbers<[1], [0], [0], [1], [0, 0, 1, 1], [], []>} : vector<64x128xbf16>, vector<128x128xbf16>, vector<64x128xf32> -> vector<64x128xf32>
    %109 = arith.addf %103, %108 : vector<64x128xf32>
    %c0_150 = arith.constant 0 : index
    %c2_151 = arith.constant 2 : index
    %c7_152 = arith.constant 7 : index
    %c0_153 = arith.constant 0 : index
    %110 = vector.load %arg10[%c0_150, %c2_151, %c7_152, %c0_153] : memref<1x10x24x128xbf16, #tpu.memory_space<vmem>>, vector<1x8x8x128xbf16>
    %111 = vector.shape_cast %110 : vector<1x8x8x128xbf16> to vector<64x128xbf16>
    %c2_154 = arith.constant 2 : index
    %c0_155 = arith.constant 0 : index
    %c0_156 = arith.constant 0 : index
    %c0_157 = arith.constant 0 : index
    %112 = vector.load %arg5[%c2_154, %c0_155, %c0_156, %c0_157] : memref<3x3x128x128xbf16, #tpu.memory_space<vmem>>, vector<1x1x128x128xbf16>
    %113 = vector.shape_cast %112 : vector<1x1x128x128xbf16> to vector<128x128xbf16>
    %cst_158 = arith.constant dense<0.000000e+00> : vector<64x128xf32>
    %114 = tpu.matmul %111, %113, %cst_158 {dimension_numbers = #tpu.dot_dimension_numbers<[1], [0], [0], [1], [0, 0, 1, 1], [], []>} : vector<64x128xbf16>, vector<128x128xbf16>, vector<64x128xf32> -> vector<64x128xf32>
    %115 = arith.addf %109, %114 : vector<64x128xf32>
    %c0_159 = arith.constant 0 : index
    %c2_160 = arith.constant 2 : index
    %c8_161 = arith.constant 8 : index
    %c0_162 = arith.constant 0 : index
    %116 = vector.load %arg10[%c0_159, %c2_160, %c8_161, %c0_162] : memref<1x10x24x128xbf16, #tpu.memory_space<vmem>>, vector<1x8x8x128xbf16>
    %117 = vector.shape_cast %116 : vector<1x8x8x128xbf16> to vector<64x128xbf16>
    %c2_163 = arith.constant 2 : index
    %c1_164 = arith.constant 1 : index
    %c0_165 = arith.constant 0 : index
    %c0_166 = arith.constant 0 : index
    %118 = vector.load %arg5[%c2_163, %c1_164, %c0_165, %c0_166] : memref<3x3x128x128xbf16, #tpu.memory_space<vmem>>, vector<1x1x128x128xbf16>
    %119 = vector.shape_cast %118 : vector<1x1x128x128xbf16> to vector<128x128xbf16>
    %cst_167 = arith.constant dense<0.000000e+00> : vector<64x128xf32>
    %120 = tpu.matmul %117, %119, %cst_167 {dimension_numbers = #tpu.dot_dimension_numbers<[1], [0], [0], [1], [0, 0, 1, 1], [], []>} : vector<64x128xbf16>, vector<128x128xbf16>, vector<64x128xf32> -> vector<64x128xf32>
    %121 = arith.addf %115, %120 : vector<64x128xf32>
    %c0_168 = arith.constant 0 : index
    %c2_169 = arith.constant 2 : index
    %c9_170 = arith.constant 9 : index
    %c0_171 = arith.constant 0 : index
    %122 = vector.load %arg10[%c0_168, %c2_169, %c9_170, %c0_171] : memref<1x10x24x128xbf16, #tpu.memory_space<vmem>>, vector<1x8x8x128xbf16>
    %123 = vector.shape_cast %122 : vector<1x8x8x128xbf16> to vector<64x128xbf16>
    %c2_172 = arith.constant 2 : index
    %c2_173 = arith.constant 2 : index
    %c0_174 = arith.constant 0 : index
    %c0_175 = arith.constant 0 : index
    %124 = vector.load %arg5[%c2_172, %c2_173, %c0_174, %c0_175] : memref<3x3x128x128xbf16, #tpu.memory_space<vmem>>, vector<1x1x128x128xbf16>
    %125 = vector.shape_cast %124 : vector<1x1x128x128xbf16> to vector<128x128xbf16>
    %cst_176 = arith.constant dense<0.000000e+00> : vector<64x128xf32>
    %126 = tpu.matmul %123, %125, %cst_176 {dimension_numbers = #tpu.dot_dimension_numbers<[1], [0], [0], [1], [0, 0, 1, 1], [], []>} : vector<64x128xbf16>, vector<128x128xbf16>, vector<64x128xf32> -> vector<64x128xf32>
    %127 = arith.addf %121, %126 : vector<64x128xf32>
    %c0_177 = arith.constant 0 : index
    %c0_178 = arith.constant 0 : index
    %128 = vector.load %arg6[%c0_177, %c0_178] : memref<1x128xf32, #tpu.memory_space<vmem>>, vector<1x128xf32>
    %129 = vector.broadcast %128 : vector<1x128xf32> to vector<64x128xf32>
    %130 = arith.mulf %127, %129 : vector<64x128xf32>
    %c0_179 = arith.constant 0 : index
    %c0_180 = arith.constant 0 : index
    %131 = vector.load %arg7[%c0_179, %c0_180] : memref<1x128xf32, #tpu.memory_space<vmem>>, vector<1x128xf32>
    %132 = vector.broadcast %131 : vector<1x128xf32> to vector<64x128xf32>
    %133 = arith.addf %130, %132 : vector<64x128xf32>
    %c0_181 = arith.constant 0 : index
    %c3_182 = arith.constant 3 : index
    %c0_183 = arith.constant 0 : index
    %c0_184 = arith.constant 0 : index
    %c0_185 = arith.constant 0 : index
    %134 = vector.load %arg1[%c0_181, %c3_182, %c0_183, %c0_184, %c0_185] : memref<1x4x9x16x128xbf16, #tpu.memory_space<vmem>>, vector<1x1x8x8x128xbf16>
    %135 = vector.shape_cast %134 : vector<1x1x8x8x128xbf16> to vector<1x8x8x128xbf16>
    %136 = vector.shape_cast %135 : vector<1x8x8x128xbf16> to vector<64x128xbf16>
    %137 = arith.extf %136 : vector<64x128xbf16> to vector<64x128xf32>
    %138 = arith.addf %137, %133 : vector<64x128xf32>
    %cst_186 = arith.constant 0.000000e+00 : f32
    %139 = vector.broadcast %cst_186 : f32 to vector<64x128xf32>
    %140 = arith.maximumf %138, %139 : vector<64x128xf32>
    %141 = vector.shape_cast %140 : vector<64x128xf32> to vector<1x8x8x128xf32>
    %c0_187 = arith.constant 0 : index
    %c0_188 = arith.constant 0 : index
    %c0_189 = arith.constant 0 : index
    %c0_190 = arith.constant 0 : index
    %142 = vector.load %arg9[%c0_187, %c0_188, %c0_189, %c0_190] : memref<1x8x8x128xf32, #tpu.memory_space<vmem>>, vector<1x8x8x128xf32>
    tpu.vector_store %arg9[%c0_187, %c0_188, %c0_189, %c0_190], %141 {strides = array<i32>} : memref<1x8x8x128xf32, #tpu.memory_space<vmem>>, vector<1x8x8x128xf32>,
    return
  }
  func.func @transform_0(%arg0: i32) -> (i32, i32, i32, i32, i32) {
    %c0_i32 = arith.constant 0 : i32
    %c0_i32_0 = arith.constant 0 : i32
    %c0_i32_1 = arith.constant 0 : i32
    %c0_i32_2 = arith.constant 0 : i32
    %c0_i32_3 = arith.constant 0 : i32
    return %arg0, %c0_i32, %c0_i32_0, %c0_i32_1, %c0_i32_2 : i32, i32, i32, i32, i32
  }
  func.func @transform_1(%arg0: i32) -> (i32, i32, i32, i32) {
    %c0_i32 = arith.constant 0 : i32
    %c0_i32_0 = arith.constant 0 : i32
    %c0_i32_1 = arith.constant 0 : i32
    %c0_i32_2 = arith.constant 0 : i32
    %c0_i32_3 = arith.constant 0 : i32
    return %c0_i32, %c0_i32_0, %c0_i32_1, %c0_i32_2 : i32, i32, i32, i32
  }
  func.func @transform_2(%arg0: i32) -> (i32, i32) {
    %c0_i32 = arith.constant 0 : i32
    %c0_i32_0 = arith.constant 0 : i32
    %c0_i32_1 = arith.constant 0 : i32
    return %c0_i32, %c0_i32_0 : i32, i32
  }
  func.func @transform_3(%arg0: i32) -> (i32, i32) {
    %c0_i32 = arith.constant 0 : i32
    %c0_i32_0 = arith.constant 0 : i32
    %c0_i32_1 = arith.constant 0 : i32
    return %c0_i32, %c0_i32_0 : i32, i32
  }
  func.func @transform_4(%arg0: i32) -> (i32, i32, i32, i32) {
    %c0_i32 = arith.constant 0 : i32
    %c0_i32_0 = arith.constant 0 : i32
    %c0_i32_1 = arith.constant 0 : i32
    %c0_i32_2 = arith.constant 0 : i32
    %c0_i32_3 = arith.constant 0 : i32
    return %c0_i32, %c0_i32_0, %c0_i32_1, %c0_i32_2 : i32, i32, i32, i32
  }
  func.func @transform_5(%arg0: i32) -> (i32, i32) {
    %c0_i32 = arith.constant 0 : i32
    %c0_i32_0 = arith.constant 0 : i32
    %c0_i32_1 = arith.constant 0 : i32
    return %c0_i32, %c0_i32_0 : i32, i32
  }
  func.func @transform_6(%arg0: i32) -> (i32, i32) {
    %c0_i32 = arith.constant 0 : i32
    %c0_i32_0 = arith.constant 0 : i32
    %c0_i32_1 = arith.constant 0 : i32
    return %c0_i32, %c0_i32_0 : i32, i32
  }
  func.func @transform_7(%arg0: i32) -> (i32, i32, i32, i32) {
    %c0_i32 = arith.constant 0 : i32
    %c0_i32_0 = arith.constant 0 : i32
    %c0_i32_1 = arith.constant 0 : i32
    %c0_i32_2 = arith.constant 0 : i32
    %c0_i32_3 = arith.constant 0 : i32
    return %c0_i32, %c0_i32_0, %c0_i32_1, %c0_i32_2 : i32, i32, i32, i32
  }
  func.func @transform_8(%arg0: i32) -> (i32, i32, i32, i32) {
    %c0_i32 = arith.constant 0 : i32
    %c0_i32_0 = arith.constant 0 : i32
    %c0_i32_1 = arith.constant 0 : i32
    %c0_i32_2 = arith.constant 0 : i32
    return %arg0, %c0_i32, %c0_i32_0, %c0_i32_1 : i32, i32, i32, i32
  }
}

module attributes {stable_mosaic.version = 11 : i64} {
  func.func @_block_kernel(%arg0: i32, %arg1: memref<1x4x9x16x128xbf16, #tpu.memory_space<vmem>>, %arg2: memref<3x3x128x128xbf16, #tpu.memory_space<vmem>>, %arg3: memref<1x128xf32, #tpu.memory_space<vmem>>, %arg4: memref<1x128xf32, #tpu.memory_space<vmem>>, %arg5: memref<3x3x128x128xbf16, #tpu.memory_space<vmem>>, %arg6: memref<1x128xf32, #tpu.memory_space<vmem>>, %arg7: memref<1x128xf32, #tpu.memory_space<vmem>>, %arg8: memref<1x1x8x128xbf16, #tpu.memory_space<vmem>>, %arg9: memref<1x8x8x128xf32, #tpu.memory_space<vmem>>, %arg10: memref<1x10x24x128xbf16, #tpu.memory_space<vmem>>) attributes {dimension_semantics = [#tpu.dimension_semantics<parallel>], iteration_bounds = array<i64: 2>, scalar_prefetch = 0 : i64, scratch_operands = 1 : i64, tpu.core_type = #tpu.core_type<tc>, window_params = [{transform_indices = @transform_0, window_bounds = array<i64: 1, 4, 9, 16, 128>}, {pipeline_mode = #tpu.pipeline_mode<synchronous>, transform_indices = @transform_1, window_bounds = array<i64: 3, 3, 128, 128>}, {pipeline_mode = #tpu.pipeline_mode<synchronous>, transform_indices = @transform_2, window_bounds = array<i64: 1, 128>}, {pipeline_mode = #tpu.pipeline_mode<synchronous>, transform_indices = @transform_3, window_bounds = array<i64: 1, 128>}, {pipeline_mode = #tpu.pipeline_mode<synchronous>, transform_indices = @transform_4, window_bounds = array<i64: 3, 3, 128, 128>}, {pipeline_mode = #tpu.pipeline_mode<synchronous>, transform_indices = @transform_5, window_bounds = array<i64: 1, 128>}, {pipeline_mode = #tpu.pipeline_mode<synchronous>, transform_indices = @transform_6, window_bounds = array<i64: 1, 128>}, {pipeline_mode = #tpu.pipeline_mode<synchronous>, transform_indices = @transform_7, window_bounds = array<i64: 1, 1, 8, 128>}, {transform_indices = @transform_8, window_bounds = array<i64: 1, 8, 8, 128>}]} {
    %c0 = arith.constant 0 : index
    %c0_0 = arith.constant 0 : index
    %c0_1 = arith.constant 0 : index
    %c0_2 = arith.constant 0 : index
    %c0_3 = arith.constant 0 : index
    %0 = vector.load %arg1[%c0, %c0_0, %c0_1, %c0_2, %c0_3] : memref<1x4x9x16x128xbf16, #tpu.memory_space<vmem>>, vector<1x1x8x8x128xbf16>
    %1 = vector.shape_cast %0 : vector<1x1x8x8x128xbf16> to vector<1x8x8x128xbf16>
    %2 = vector.shape_cast %1 : vector<1x8x8x128xbf16> to vector<64x128xbf16>
    %c0_4 = arith.constant 0 : index
    %c0_5 = arith.constant 0 : index
    %c0_6 = arith.constant 0 : index
    %c0_7 = arith.constant 0 : index
    %3 = vector.load %arg2[%c0_4, %c0_5, %c0_6, %c0_7] : memref<3x3x128x128xbf16, #tpu.memory_space<vmem>>, vector<1x1x128x128xbf16>
    %4 = vector.shape_cast %3 : vector<1x1x128x128xbf16> to vector<128x128xbf16>
    %cst = arith.constant dense<0.000000e+00> : vector<64x128xf32>
    %5 = tpu.matmul %2, %4, %cst {dimension_numbers = #tpu.dot_dimension_numbers<[1], [0], [0], [1], [0, 0, 1, 1], [], []>} : vector<64x128xbf16>, vector<128x128xbf16>, vector<64x128xf32> -> vector<64x128xf32>
    %c0_8 = arith.constant 0 : index
    %c1 = arith.constant 1 : index
    %c0_9 = arith.constant 0 : index
    %c0_10 = arith.constant 0 : index
    %c0_11 = arith.constant 0 : index
    %6 = vector.load %arg1[%c0_8, %c1, %c0_9, %c0_10, %c0_11] : memref<1x4x9x16x128xbf16, #tpu.memory_space<vmem>>, vector<1x1x8x8x128xbf16>
    %7 = vector.shape_cast %6 : vector<1x1x8x8x128xbf16> to vector<1x8x8x128xbf16>
    %8 = vector.shape_cast %7 : vector<1x8x8x128xbf16> to vector<64x128xbf16>
    %c0_12 = arith.constant 0 : index
    %c1_13 = arith.constant 1 : index
    %c0_14 = arith.constant 0 : index
    %c0_15 = arith.constant 0 : index
    %9 = vector.load %arg2[%c0_12, %c1_13, %c0_14, %c0_15] : memref<3x3x128x128xbf16, #tpu.memory_space<vmem>>, vector<1x1x128x128xbf16>
    %10 = vector.shape_cast %9 : vector<1x1x128x128xbf16> to vector<128x128xbf16>
    %cst_16 = arith.constant dense<0.000000e+00> : vector<64x128xf32>
    %11 = tpu.matmul %8, %10, %cst_16 {dimension_numbers = #tpu.dot_dimension_numbers<[1], [0], [0], [1], [0, 0, 1, 1], [], []>} : vector<64x128xbf16>, vector<128x128xbf16>, vector<64x128xf32> -> vector<64x128xf32>
    %12 = arith.addf %5, %11 : vector<64x128xf32>
    %c0_17 = arith.constant 0 : index
    %c0_18 = arith.constant 0 : index
    %c0_19 = arith.constant 0 : index
    %c1_20 = arith.constant 1 : index
    %c0_21 = arith.constant 0 : index
    %13 = vector.load %arg1[%c0_17, %c0_18, %c0_19, %c1_20, %c0_21] : memref<1x4x9x16x128xbf16, #tpu.memory_space<vmem>>, vector<1x1x8x8x128xbf16>
    %14 = vector.shape_cast %13 : vector<1x1x8x8x128xbf16> to vector<1x8x8x128xbf16>
    %15 = vector.shape_cast %14 : vector<1x8x8x128xbf16> to vector<64x128xbf16>
    %c0_22 = arith.constant 0 : index
    %c2 = arith.constant 2 : index
    %c0_23 = arith.constant 0 : index
    %c0_24 = arith.constant 0 : index
    %16 = vector.load %arg2[%c0_22, %c2, %c0_23, %c0_24] : memref<3x3x128x128xbf16, #tpu.memory_space<vmem>>, vector<1x1x128x128xbf16>
    %17 = vector.shape_cast %16 : vector<1x1x128x128xbf16> to vector<128x128xbf16>
    %cst_25 = arith.constant dense<0.000000e+00> : vector<64x128xf32>
    %18 = tpu.matmul %15, %17, %cst_25 {dimension_numbers = #tpu.dot_dimension_numbers<[1], [0], [0], [1], [0, 0, 1, 1], [], []>} : vector<64x128xbf16>, vector<128x128xbf16>, vector<64x128xf32> -> vector<64x128xf32>
    %19 = arith.addf %12, %18 : vector<64x128xf32>
    %c0_26 = arith.constant 0 : index
    %c2_27 = arith.constant 2 : index
    %c0_28 = arith.constant 0 : index
    %c0_29 = arith.constant 0 : index
    %c0_30 = arith.constant 0 : index
    %20 = vector.load %arg1[%c0_26, %c2_27, %c0_28, %c0_29, %c0_30] : memref<1x4x9x16x128xbf16, #tpu.memory_space<vmem>>, vector<1x1x8x8x128xbf16>
    %21 = vector.shape_cast %20 : vector<1x1x8x8x128xbf16> to vector<1x8x8x128xbf16>
    %22 = vector.shape_cast %21 : vector<1x8x8x128xbf16> to vector<64x128xbf16>
    %c1_31 = arith.constant 1 : index
    %c0_32 = arith.constant 0 : index
    %c0_33 = arith.constant 0 : index
    %c0_34 = arith.constant 0 : index
    %23 = vector.load %arg2[%c1_31, %c0_32, %c0_33, %c0_34] : memref<3x3x128x128xbf16, #tpu.memory_space<vmem>>, vector<1x1x128x128xbf16>
    %24 = vector.shape_cast %23 : vector<1x1x128x128xbf16> to vector<128x128xbf16>
    %cst_35 = arith.constant dense<0.000000e+00> : vector<64x128xf32>
    %25 = tpu.matmul %22, %24, %cst_35 {dimension_numbers = #tpu.dot_dimension_numbers<[1], [0], [0], [1], [0, 0, 1, 1], [], []>} : vector<64x128xbf16>, vector<128x128xbf16>, vector<64x128xf32> -> vector<64x128xf32>
    %26 = arith.addf %19, %25 : vector<64x128xf32>
    %c0_36 = arith.constant 0 : index
    %c3 = arith.constant 3 : index
    %c0_37 = arith.constant 0 : index
    %c0_38 = arith.constant 0 : index
    %c0_39 = arith.constant 0 : index
    %27 = vector.load %arg1[%c0_36, %c3, %c0_37, %c0_38, %c0_39] : memref<1x4x9x16x128xbf16, #tpu.memory_space<vmem>>, vector<1x1x8x8x128xbf16>
    %28 = vector.shape_cast %27 : vector<1x1x8x8x128xbf16> to vector<1x8x8x128xbf16>
    %29 = vector.shape_cast %28 : vector<1x8x8x128xbf16> to vector<64x128xbf16>
    %c1_40 = arith.constant 1 : index
    %c1_41 = arith.constant 1 : index
    %c0_42 = arith.constant 0 : index
    %c0_43 = arith.constant 0 : index
    %30 = vector.load %arg2[%c1_40, %c1_41, %c0_42, %c0_43] : memref<3x3x128x128xbf16, #tpu.memory_space<vmem>>, vector<1x1x128x128xbf16>
    %31 = vector.shape_cast %30 : vector<1x1x128x128xbf16> to vector<128x128xbf16>
    %cst_44 = arith.constant dense<0.000000e+00> : vector<64x128xf32>
    %32 = tpu.matmul %29, %31, %cst_44 {dimension_numbers = #tpu.dot_dimension_numbers<[1], [0], [0], [1], [0, 0, 1, 1], [], []>} : vector<64x128xbf16>, vector<128x128xbf16>, vector<64x128xf32> -> vector<64x128xf32>
    %33 = arith.addf %26, %32 : vector<64x128xf32>
    %c0_45 = arith.constant 0 : index
    %c2_46 = arith.constant 2 : index
    %c0_47 = arith.constant 0 : index
    %c1_48 = arith.constant 1 : index
    %c0_49 = arith.constant 0 : index
    %34 = vector.load %arg1[%c0_45, %c2_46, %c0_47, %c1_48, %c0_49] : memref<1x4x9x16x128xbf16, #tpu.memory_space<vmem>>, vector<1x1x8x8x128xbf16>
    %35 = vector.shape_cast %34 : vector<1x1x8x8x128xbf16> to vector<1x8x8x128xbf16>
    %36 = vector.shape_cast %35 : vector<1x8x8x128xbf16> to vector<64x128xbf16>
    %c1_50 = arith.constant 1 : index
    %c2_51 = arith.constant 2 : index
    %c0_52 = arith.constant 0 : index
    %c0_53 = arith.constant 0 : index
    %37 = vector.load %arg2[%c1_50, %c2_51, %c0_52, %c0_53] : memref<3x3x128x128xbf16, #tpu.memory_space<vmem>>, vector<1x1x128x128xbf16>
    %38 = vector.shape_cast %37 : vector<1x1x128x128xbf16> to vector<128x128xbf16>
    %cst_54 = arith.constant dense<0.000000e+00> : vector<64x128xf32>
    %39 = tpu.matmul %36, %38, %cst_54 {dimension_numbers = #tpu.dot_dimension_numbers<[1], [0], [0], [1], [0, 0, 1, 1], [], []>} : vector<64x128xbf16>, vector<128x128xbf16>, vector<64x128xf32> -> vector<64x128xf32>
    %40 = arith.addf %33, %39 : vector<64x128xf32>
    %c0_55 = arith.constant 0 : index
    %c0_56 = arith.constant 0 : index
    %c1_57 = arith.constant 1 : index
    %c0_58 = arith.constant 0 : index
    %c0_59 = arith.constant 0 : index
    %41 = vector.load %arg1[%c0_55, %c0_56, %c1_57, %c0_58, %c0_59] : memref<1x4x9x16x128xbf16, #tpu.memory_space<vmem>>, vector<1x1x8x8x128xbf16>
    %42 = vector.shape_cast %41 : vector<1x1x8x8x128xbf16> to vector<1x8x8x128xbf16>
    %43 = vector.shape_cast %42 : vector<1x8x8x128xbf16> to vector<64x128xbf16>
    %c2_60 = arith.constant 2 : index
    %c0_61 = arith.constant 0 : index
    %c0_62 = arith.constant 0 : index
    %c0_63 = arith.constant 0 : index
    %44 = vector.load %arg2[%c2_60, %c0_61, %c0_62, %c0_63] : memref<3x3x128x128xbf16, #tpu.memory_space<vmem>>, vector<1x1x128x128xbf16>
    %45 = vector.shape_cast %44 : vector<1x1x128x128xbf16> to vector<128x128xbf16>
    %cst_64 = arith.constant dense<0.000000e+00> : vector<64x128xf32>
    %46 = tpu.matmul %43, %45, %cst_64 {dimension_numbers = #tpu.dot_dimension_numbers<[1], [0], [0], [1], [0, 0, 1, 1], [], []>} : vector<64x128xbf16>, vector<128x128xbf16>, vector<64x128xf32> -> vector<64x128xf32>
    %47 = arith.addf %40, %46 : vector<64x128xf32>
    %c0_65 = arith.constant 0 : index
    %c1_66 = arith.constant 1 : index
    %c1_67 = arith.constant 1 : index
    %c0_68 = arith.constant 0 : index
    %c0_69 = arith.constant 0 : index
    %48 = vector.load %arg1[%c0_65, %c1_66, %c1_67, %c0_68, %c0_69] : memref<1x4x9x16x128xbf16, #tpu.memory_space<vmem>>, vector<1x1x8x8x128xbf16>
    %49 = vector.shape_cast %48 : vector<1x1x8x8x128xbf16> to vector<1x8x8x128xbf16>
    %50 = vector.shape_cast %49 : vector<1x8x8x128xbf16> to vector<64x128xbf16>
    %c2_70 = arith.constant 2 : index
    %c1_71 = arith.constant 1 : index
    %c0_72 = arith.constant 0 : index
    %c0_73 = arith.constant 0 : index
    %51 = vector.load %arg2[%c2_70, %c1_71, %c0_72, %c0_73] : memref<3x3x128x128xbf16, #tpu.memory_space<vmem>>, vector<1x1x128x128xbf16>
    %52 = vector.shape_cast %51 : vector<1x1x128x128xbf16> to vector<128x128xbf16>
    %cst_74 = arith.constant dense<0.000000e+00> : vector<64x128xf32>
    %53 = tpu.matmul %50, %52, %cst_74 {dimension_numbers = #tpu.dot_dimension_numbers<[1], [0], [0], [1], [0, 0, 1, 1], [], []>} : vector<64x128xbf16>, vector<128x128xbf16>, vector<64x128xf32> -> vector<64x128xf32>
    %54 = arith.addf %47, %53 : vector<64x128xf32>
    %c0_75 = arith.constant 0 : index
    %c0_76 = arith.constant 0 : index
    %c1_77 = arith.constant 1 : index
    %c1_78 = arith.constant 1 : index
    %c0_79 = arith.constant 0 : index
    %55 = vector.load %arg1[%c0_75, %c0_76, %c1_77, %c1_78, %c0_79] : memref<1x4x9x16x128xbf16, #tpu.memory_space<vmem>>, vector<1x1x8x8x128xbf16>
    %56 = vector.shape_cast %55 : vector<1x1x8x8x128xbf16> to vector<1x8x8x128xbf16>
    %57 = vector.shape_cast %56 : vector<1x8x8x128xbf16> to vector<64x128xbf16>
    %c2_80 = arith.constant 2 : index
    %c2_81 = arith.constant 2 : index
    %c0_82 = arith.constant 0 : index
    %c0_83 = arith.constant 0 : index
    %58 = vector.load %arg2[%c2_80, %c2_81, %c0_82, %c0_83] : memref<3x3x128x128xbf16, #tpu.memory_space<vmem>>, vector<1x1x128x128xbf16>
    %59 = vector.shape_cast %58 : vector<1x1x128x128xbf16> to vector<128x128xbf16>
    %cst_84 = arith.constant dense<0.000000e+00> : vector<64x128xf32>
    %60 = tpu.matmul %57, %59, %cst_84 {dimension_numbers = #tpu.dot_dimension_numbers<[1], [0], [0], [1], [0, 0, 1, 1], [], []>} : vector<64x128xbf16>, vector<128x128xbf16>, vector<64x128xf32> -> vector<64x128xf32>
    %61 = arith.addf %54, %60 : vector<64x128xf32>
    %c0_85 = arith.constant 0 : index
    %c0_86 = arith.constant 0 : index
    %62 = vector.load %arg3[%c0_85, %c0_86] : memref<1x128xf32, #tpu.memory_space<vmem>>, vector<1x128xf32>
    %63 = vector.broadcast %62 : vector<1x128xf32> to vector<64x128xf32>
    %64 = arith.mulf %61, %63 : vector<64x128xf32>
    %c0_87 = arith.constant 0 : index
    %c0_88 = arith.constant 0 : index
    %65 = vector.load %arg4[%c0_87, %c0_88] : memref<1x128xf32, #tpu.memory_space<vmem>>, vector<1x128xf32>
    %66 = vector.broadcast %65 : vector<1x128xf32> to vector<64x128xf32>
    %67 = arith.addf %64, %66 : vector<64x128xf32>
    %cst_89 = arith.constant 0.000000e+00 : f32
    %68 = vector.broadcast %cst_89 : f32 to vector<64x128xf32>
    %69 = arith.maximumf %67, %68 : vector<64x128xf32>
    %70 = arith.truncf %69 : vector<64x128xf32> to vector<64x128xbf16>
    %71 = vector.shape_cast %70 : vector<64x128xbf16> to vector<1x8x8x128xbf16>
    %cst_90 = arith.constant 0.000000e+00 : bf16
    %72 = vector.broadcast %cst_90 : bf16 to vector<1x10x24x128xbf16>
    %c0_91 = arith.constant 0 : index
    %c0_92 = arith.constant 0 : index
    %c0_93 = arith.constant 0 : index
    %c0_94 = arith.constant 0 : index
    %73 = vector.load %arg10[%c0_91, %c0_92, %c0_93, %c0_94] : memref<1x10x24x128xbf16, #tpu.memory_space<vmem>>, vector<1x10x24x128xbf16>
    tpu.vector_store %arg10[%c0_91, %c0_92, %c0_93, %c0_94], %72 {strides = array<i32>} : memref<1x10x24x128xbf16, #tpu.memory_space<vmem>>, vector<1x10x24x128xbf16>,
    %c0_95 = arith.constant 0 : index
    %c1_96 = arith.constant 1 : index
    %c8 = arith.constant 8 : index
    %c0_97 = arith.constant 0 : index
    %74 = vector.load %arg10[%c0_95, %c1_96, %c8, %c0_97] : memref<1x10x24x128xbf16, #tpu.memory_space<vmem>>, vector<1x8x8x128xbf16>
    tpu.vector_store %arg10[%c0_95, %c1_96, %c8, %c0_97], %71 {strides = array<i32>} : memref<1x10x24x128xbf16, #tpu.memory_space<vmem>>, vector<1x8x8x128xbf16>,
    %c0_98 = arith.constant 0 : index
    %c0_99 = arith.constant 0 : index
    %c7 = arith.constant 7 : index
    %c0_100 = arith.constant 0 : index
    %75 = vector.load %arg10[%c0_98, %c0_99, %c7, %c0_100] : memref<1x10x24x128xbf16, #tpu.memory_space<vmem>>, vector<1x8x8x128xbf16>
    %76 = vector.shape_cast %75 : vector<1x8x8x128xbf16> to vector<64x128xbf16>
    %c0_101 = arith.constant 0 : index
    %c0_102 = arith.constant 0 : index
    %c0_103 = arith.constant 0 : index
    %c0_104 = arith.constant 0 : index
    %77 = vector.load %arg5[%c0_101, %c0_102, %c0_103, %c0_104] : memref<3x3x128x128xbf16, #tpu.memory_space<vmem>>, vector<1x1x128x128xbf16>
    %78 = vector.shape_cast %77 : vector<1x1x128x128xbf16> to vector<128x128xbf16>
    %cst_105 = arith.constant dense<0.000000e+00> : vector<64x128xf32>
    %79 = tpu.matmul %76, %78, %cst_105 {dimension_numbers = #tpu.dot_dimension_numbers<[1], [0], [0], [1], [0, 0, 1, 1], [], []>} : vector<64x128xbf16>, vector<128x128xbf16>, vector<64x128xf32> -> vector<64x128xf32>
    %c0_106 = arith.constant 0 : index
    %c0_107 = arith.constant 0 : index
    %c8_108 = arith.constant 8 : index
    %c0_109 = arith.constant 0 : index
    %80 = vector.load %arg10[%c0_106, %c0_107, %c8_108, %c0_109] : memref<1x10x24x128xbf16, #tpu.memory_space<vmem>>, vector<1x8x8x128xbf16>
    %81 = vector.shape_cast %80 : vector<1x8x8x128xbf16> to vector<64x128xbf16>
    %c0_110 = arith.constant 0 : index
    %c1_111 = arith.constant 1 : index
    %c0_112 = arith.constant 0 : index
    %c0_113 = arith.constant 0 : index
    %82 = vector.load %arg5[%c0_110, %c1_111, %c0_112, %c0_113] : memref<3x3x128x128xbf16, #tpu.memory_space<vmem>>, vector<1x1x128x128xbf16>
    %83 = vector.shape_cast %82 : vector<1x1x128x128xbf16> to vector<128x128xbf16>
    %cst_114 = arith.constant dense<0.000000e+00> : vector<64x128xf32>
    %84 = tpu.matmul %81, %83, %cst_114 {dimension_numbers = #tpu.dot_dimension_numbers<[1], [0], [0], [1], [0, 0, 1, 1], [], []>} : vector<64x128xbf16>, vector<128x128xbf16>, vector<64x128xf32> -> vector<64x128xf32>
    %85 = arith.addf %79, %84 : vector<64x128xf32>
    %c0_115 = arith.constant 0 : index
    %c0_116 = arith.constant 0 : index
    %c9 = arith.constant 9 : index
    %c0_117 = arith.constant 0 : index
    %86 = vector.load %arg10[%c0_115, %c0_116, %c9, %c0_117] : memref<1x10x24x128xbf16, #tpu.memory_space<vmem>>, vector<1x8x8x128xbf16>
    %87 = vector.shape_cast %86 : vector<1x8x8x128xbf16> to vector<64x128xbf16>
    %c0_118 = arith.constant 0 : index
    %c2_119 = arith.constant 2 : index
    %c0_120 = arith.constant 0 : index
    %c0_121 = arith.constant 0 : index
    %88 = vector.load %arg5[%c0_118, %c2_119, %c0_120, %c0_121] : memref<3x3x128x128xbf16, #tpu.memory_space<vmem>>, vector<1x1x128x128xbf16>
    %89 = vector.shape_cast %88 : vector<1x1x128x128xbf16> to vector<128x128xbf16>
    %cst_122 = arith.constant dense<0.000000e+00> : vector<64x128xf32>
    %90 = tpu.matmul %87, %89, %cst_122 {dimension_numbers = #tpu.dot_dimension_numbers<[1], [0], [0], [1], [0, 0, 1, 1], [], []>} : vector<64x128xbf16>, vector<128x128xbf16>, vector<64x128xf32> -> vector<64x128xf32>
    %91 = arith.addf %85, %90 : vector<64x128xf32>
    %c0_123 = arith.constant 0 : index
    %c1_124 = arith.constant 1 : index
    %c7_125 = arith.constant 7 : index
    %c0_126 = arith.constant 0 : index
    %92 = vector.load %arg10[%c0_123, %c1_124, %c7_125, %c0_126] : memref<1x10x24x128xbf16, #tpu.memory_space<vmem>>, vector<1x8x8x128xbf16>
    %93 = vector.shape_cast %92 : vector<1x8x8x128xbf16> to vector<64x128xbf16>
    %c1_127 = arith.constant 1 : index
    %c0_128 = arith.constant 0 : index
    %c0_129 = arith.constant 0 : index
    %c0_130 = arith.constant 0 : index
    %94 = vector.load %arg5[%c1_127, %c0_128, %c0_129, %c0_130] : memref<3x3x128x128xbf16, #tpu.memory_space<vmem>>, vector<1x1x128x128xbf16>
    %95 = vector.shape_cast %94 : vector<1x1x128x128xbf16> to vector<128x128xbf16>
    %cst_131 = arith.constant dense<0.000000e+00> : vector<64x128xf32>
    %96 = tpu.matmul %93, %95, %cst_131 {dimension_numbers = #tpu.dot_dimension_numbers<[1], [0], [0], [1], [0, 0, 1, 1], [], []>} : vector<64x128xbf16>, vector<128x128xbf16>, vector<64x128xf32> -> vector<64x128xf32>
    %97 = arith.addf %91, %96 : vector<64x128xf32>
    %c0_132 = arith.constant 0 : index
    %c1_133 = arith.constant 1 : index
    %c8_134 = arith.constant 8 : index
    %c0_135 = arith.constant 0 : index
    %98 = vector.load %arg10[%c0_132, %c1_133, %c8_134, %c0_135] : memref<1x10x24x128xbf16, #tpu.memory_space<vmem>>, vector<1x8x8x128xbf16>
    %99 = vector.shape_cast %98 : vector<1x8x8x128xbf16> to vector<64x128xbf16>
    %c1_136 = arith.constant 1 : index
    %c1_137 = arith.constant 1 : index
    %c0_138 = arith.constant 0 : index
    %c0_139 = arith.constant 0 : index
    %100 = vector.load %arg5[%c1_136, %c1_137, %c0_138, %c0_139] : memref<3x3x128x128xbf16, #tpu.memory_space<vmem>>, vector<1x1x128x128xbf16>
    %101 = vector.shape_cast %100 : vector<1x1x128x128xbf16> to vector<128x128xbf16>
    %cst_140 = arith.constant dense<0.000000e+00> : vector<64x128xf32>
    %102 = tpu.matmul %99, %101, %cst_140 {dimension_numbers = #tpu.dot_dimension_numbers<[1], [0], [0], [1], [0, 0, 1, 1], [], []>} : vector<64x128xbf16>, vector<128x128xbf16>, vector<64x128xf32> -> vector<64x128xf32>
    %103 = arith.addf %97, %102 : vector<64x128xf32>
    %c0_141 = arith.constant 0 : index
    %c1_142 = arith.constant 1 : index
    %c9_143 = arith.constant 9 : index
    %c0_144 = arith.constant 0 : index
    %104 = vector.load %arg10[%c0_141, %c1_142, %c9_143, %c0_144] : memref<1x10x24x128xbf16, #tpu.memory_space<vmem>>, vector<1x8x8x128xbf16>
    %105 = vector.shape_cast %104 : vector<1x8x8x128xbf16> to vector<64x128xbf16>
    %c1_145 = arith.constant 1 : index
    %c2_146 = arith.constant 2 : index
    %c0_147 = arith.constant 0 : index
    %c0_148 = arith.constant 0 : index
    %106 = vector.load %arg5[%c1_145, %c2_146, %c0_147, %c0_148] : memref<3x3x128x128xbf16, #tpu.memory_space<vmem>>, vector<1x1x128x128xbf16>
    %107 = vector.shape_cast %106 : vector<1x1x128x128xbf16> to vector<128x128xbf16>
    %cst_149 = arith.constant dense<0.000000e+00> : vector<64x128xf32>
    %108 = tpu.matmul %105, %107, %cst_149 {dimension_numbers = #tpu.dot_dimension_numbers<[1], [0], [0], [1], [0, 0, 1, 1], [], []>} : vector<64x128xbf16>, vector<128x128xbf16>, vector<64x128xf32> -> vector<64x128xf32>
    %109 = arith.addf %103, %108 : vector<64x128xf32>
    %c0_150 = arith.constant 0 : index
    %c2_151 = arith.constant 2 : index
    %c7_152 = arith.constant 7 : index
    %c0_153 = arith.constant 0 : index
    %110 = vector.load %arg10[%c0_150, %c2_151, %c7_152, %c0_153] : memref<1x10x24x128xbf16, #tpu.memory_space<vmem>>, vector<1x8x8x128xbf16>
    %111 = vector.shape_cast %110 : vector<1x8x8x128xbf16> to vector<64x128xbf16>
    %c2_154 = arith.constant 2 : index
    %c0_155 = arith.constant 0 : index
    %c0_156 = arith.constant 0 : index
    %c0_157 = arith.constant 0 : index
    %112 = vector.load %arg5[%c2_154, %c0_155, %c0_156, %c0_157] : memref<3x3x128x128xbf16, #tpu.memory_space<vmem>>, vector<1x1x128x128xbf16>
    %113 = vector.shape_cast %112 : vector<1x1x128x128xbf16> to vector<128x128xbf16>
    %cst_158 = arith.constant dense<0.000000e+00> : vector<64x128xf32>
    %114 = tpu.matmul %111, %113, %cst_158 {dimension_numbers = #tpu.dot_dimension_numbers<[1], [0], [0], [1], [0, 0, 1, 1], [], []>} : vector<64x128xbf16>, vector<128x128xbf16>, vector<64x128xf32> -> vector<64x128xf32>
    %115 = arith.addf %109, %114 : vector<64x128xf32>
    %c0_159 = arith.constant 0 : index
    %c2_160 = arith.constant 2 : index
    %c8_161 = arith.constant 8 : index
    %c0_162 = arith.constant 0 : index
    %116 = vector.load %arg10[%c0_159, %c2_160, %c8_161, %c0_162] : memref<1x10x24x128xbf16, #tpu.memory_space<vmem>>, vector<1x8x8x128xbf16>
    %117 = vector.shape_cast %116 : vector<1x8x8x128xbf16> to vector<64x128xbf16>
    %c2_163 = arith.constant 2 : index
    %c1_164 = arith.constant 1 : index
    %c0_165 = arith.constant 0 : index
    %c0_166 = arith.constant 0 : index
    %118 = vector.load %arg5[%c2_163, %c1_164, %c0_165, %c0_166] : memref<3x3x128x128xbf16, #tpu.memory_space<vmem>>, vector<1x1x128x128xbf16>
    %119 = vector.shape_cast %118 : vector<1x1x128x128xbf16> to vector<128x128xbf16>
    %cst_167 = arith.constant dense<0.000000e+00> : vector<64x128xf32>
    %120 = tpu.matmul %117, %119, %cst_167 {dimension_numbers = #tpu.dot_dimension_numbers<[1], [0], [0], [1], [0, 0, 1, 1], [], []>} : vector<64x128xbf16>, vector<128x128xbf16>, vector<64x128xf32> -> vector<64x128xf32>
    %121 = arith.addf %115, %120 : vector<64x128xf32>
    %c0_168 = arith.constant 0 : index
    %c2_169 = arith.constant 2 : index
    %c9_170 = arith.constant 9 : index
    %c0_171 = arith.constant 0 : index
    %122 = vector.load %arg10[%c0_168, %c2_169, %c9_170, %c0_171] : memref<1x10x24x128xbf16, #tpu.memory_space<vmem>>, vector<1x8x8x128xbf16>
    %123 = vector.shape_cast %122 : vector<1x8x8x128xbf16> to vector<64x128xbf16>
    %c2_172 = arith.constant 2 : index
    %c2_173 = arith.constant 2 : index
    %c0_174 = arith.constant 0 : index
    %c0_175 = arith.constant 0 : index
    %124 = vector.load %arg5[%c2_172, %c2_173, %c0_174, %c0_175] : memref<3x3x128x128xbf16, #tpu.memory_space<vmem>>, vector<1x1x128x128xbf16>
    %125 = vector.shape_cast %124 : vector<1x1x128x128xbf16> to vector<128x128xbf16>
    %cst_176 = arith.constant dense<0.000000e+00> : vector<64x128xf32>
    %126 = tpu.matmul %123, %125, %cst_176 {dimension_numbers = #tpu.dot_dimension_numbers<[1], [0], [0], [1], [0, 0, 1, 1], [], []>} : vector<64x128xbf16>, vector<128x128xbf16>, vector<64x128xf32> -> vector<64x128xf32>
    %127 = arith.addf %121, %126 : vector<64x128xf32>
    %c0_177 = arith.constant 0 : index
    %c0_178 = arith.constant 0 : index
    %128 = vector.load %arg6[%c0_177, %c0_178] : memref<1x128xf32, #tpu.memory_space<vmem>>, vector<1x128xf32>
    %129 = vector.broadcast %128 : vector<1x128xf32> to vector<64x128xf32>
    %130 = arith.mulf %127, %129 : vector<64x128xf32>
    %c0_179 = arith.constant 0 : index
    %c0_180 = arith.constant 0 : index
    %131 = vector.load %arg7[%c0_179, %c0_180] : memref<1x128xf32, #tpu.memory_space<vmem>>, vector<1x128xf32>
    %132 = vector.broadcast %131 : vector<1x128xf32> to vector<64x128xf32>
    %133 = arith.addf %130, %132 : vector<64x128xf32>
    %c0_181 = arith.constant 0 : index
    %c3_182 = arith.constant 3 : index
    %c0_183 = arith.constant 0 : index
    %c0_184 = arith.constant 0 : index
    %c0_185 = arith.constant 0 : index
    %134 = vector.load %arg1[%c0_181, %c3_182, %c0_183, %c0_184, %c0_185] : memref<1x4x9x16x128xbf16, #tpu.memory_space<vmem>>, vector<1x1x8x8x128xbf16>
    %135 = vector.shape_cast %134 : vector<1x1x8x8x128xbf16> to vector<1x8x8x128xbf16>
    %136 = vector.shape_cast %135 : vector<1x8x8x128xbf16> to vector<64x128xbf16>
    %137 = arith.extf %136 : vector<64x128xbf16> to vector<64x128xf32>
    %138 = arith.addf %137, %133 : vector<64x128xf32>
    %cst_186 = arith.constant 0.000000e+00 : f32
    %139 = vector.broadcast %cst_186 : f32 to vector<64x128xf32>
    %140 = arith.maximumf %138, %139 : vector<64x128xf32>
    %141 = vector.shape_cast %140 : vector<64x128xf32> to vector<1x8x8x128xf32>
    %c0_187 = arith.constant 0 : index
    %c0_188 = arith.constant 0 : index
    %c0_189 = arith.constant 0 : index
    %c0_190 = arith.constant 0 : index
    %142 = vector.load %arg9[%c0_187, %c0_188, %c0_189, %c0_190] : memref<1x8x8x128xf32, #tpu.memory_space<vmem>>, vector<1x8x8x128xf32>
    tpu.vector_store %arg9[%c0_187, %c0_188, %c0_189, %c0_190], %141 {strides = array<i32>} : memref<1x8x8x128xf32, #tpu.memory_space<vmem>>, vector<1x8x8x128xf32>,
    return
  }
  func.func @transform_0(%arg0: i32) -> (i32, i32, i32, i32, i32) {
    %c0_i32 = arith.constant 0 : i32
    %c0_i32_0 = arith.constant 0 : i32
    %c0_i32_1 = arith.constant 0 : i32
    %c0_i32_2 = arith.constant 0 : i32
    %c0_i32_3 = arith.constant 0 : i32
    return %arg0, %c0_i32, %c0_i32_0, %c0_i32_1, %c0_i32_2 : i32, i32, i32, i32, i32
  }
  func.func @transform_1(%arg0: i32) -> (i32, i32, i32, i32) {
    %c0_i32 = arith.constant 0 : i32
    %c0_i32_0 = arith.constant 0 : i32
    %c0_i32_1 = arith.constant 0 : i32
    %c0_i32_2 = arith.constant 0 : i32
    %c0_i32_3 = arith.constant 0 : i32
    return %c0_i32, %c0_i32_0, %c0_i32_1, %c0_i32_2 : i32, i32, i32, i32
  }
  func.func @transform_2(%arg0: i32) -> (i32, i32) {
    %c0_i32 = arith.constant 0 : i32
    %c0_i32_0 = arith.constant 0 : i32
    %c0_i32_1 = arith.constant 0 : i32
    return %c0_i32, %c0_i32_0 : i32, i32
  }
  func.func @transform_3(%arg0: i32) -> (i32, i32) {
    %c0_i32 = arith.constant 0 : i32
    %c0_i32_0 = arith.constant 0 : i32
    %c0_i32_1 = arith.constant 0 : i32
    return %c0_i32, %c0_i32_0 : i32, i32
  }
  func.func @transform_4(%arg0: i32) -> (i32, i32, i32, i32) {
    %c0_i32 = arith.constant 0 : i32
    %c0_i32_0 = arith.constant 0 : i32
    %c0_i32_1 = arith.constant 0 : i32
    %c0_i32_2 = arith.constant 0 : i32
    %c0_i32_3 = arith.constant 0 : i32
    return %c0_i32, %c0_i32_0, %c0_i32_1, %c0_i32_2 : i32, i32, i32, i32
  }
  func.func @transform_5(%arg0: i32) -> (i32, i32) {
    %c0_i32 = arith.constant 0 : i32
    %c0_i32_0 = arith.constant 0 : i32
    %c0_i32_1 = arith.constant 0 : i32
    return %c0_i32, %c0_i32_0 : i32, i32
  }
  func.func @transform_6(%arg0: i32) -> (i32, i32) {
    %c0_i32 = arith.constant 0 : i32
    %c0_i32_0 = arith.constant 0 : i32
    %c0_i32_1 = arith.constant 0 : i32
    return %c0_i32, %c0_i32_0 : i32, i32
  }
  func.func @transform_7(%arg0: i32) -> (i32, i32, i32, i32) {
    %c0_i32 = arith.constant 0 : i32
    %c0_i32_0 = arith.constant 0 : i32
    %c0_i32_1 = arith.constant 0 : i32
    %c0_i32_2 = arith.constant 0 : i32
    %c0_i32_3 = arith.constant 0 : i32
    return %c0_i32, %c0_i32_0, %c0_i32_1, %c0_i32_2 : i32, i32, i32, i32
  }
  func.func @transform_8(%arg0: i32) -> (i32, i32, i32, i32) {
    %c0_i32 = arith.constant 0 : i32
    %c0_i32_0 = arith.constant 0 : i32
    %c0_i32_1 = arith.constant 0 : i32
    %c0_i32_2 = arith.constant 0 : i32
    return %arg0, %c0_i32, %c0_i32_0, %c0_i32_1 : i32, i32, i32, i32
  }
}

</mosaic_0001>

<bundles_post_ra>
// kernel: tpu_custom_call.1
= control target key start
LH: loop header
LB: loop body
LE: loop exit
PB: predicated region body
PF: predicated region fallthrough
CT: control target
= control target key end

     0   :  { %s6844_s0 = inlined_call_operand.hbm [shape: bf16[2,4,9,16,128], index: 0, kind: input, shape index: {}]   ;;  %s6845_s1 = inlined_call_operand.hbm [shape: bf16[3,3,128,128], index: 1, kind: input, shape index: {}]   ;;  %s6846_s2 = inlined_call_operand.vmem [shape: f32[1,128], index: 2, kind: input, shape index: {}]   ;;  %s6847_s3 = inlined_call_operand.vmem [shape: f32[1,128], index: 3, kind: input, shape index: {}]   ;;  %s6848_s4 = inlined_call_operand.hbm [shape: bf16[3,3,128,128], index: 4, kind: input, shape index: {}]   ;;  %s6849_s5 = inlined_call_operand.vmem [shape: f32[1,128], index: 5, kind: input, shape index: {}]   ;;  %s6850_s6 = inlined_call_operand.vmem [shape: f32[1,128], index: 6, kind: input, shape index: {}]   ;;  %s6851_s7 = inlined_call_operand.vmem [shape: bf16[1,1,8,128], index: 7, kind: input, shape index: {}]   ;;  %s6852_s8 = inlined_call_operand.hbm [shape: f32[2,8,8,128], index: 8, kind: output, shape index: {}]  }
   0x1   :  { %6858 = sst [smem:[#allocation13_spill]] %s6845_s1 }
   0x2   :  { %13 = vsyncpa [#allocation4], 0 }
   0x3   :  { %15 = vsyncpa [#allocation4 + $0x1], 0 }
   0x4   :  { %16 = vsyncpa [#allocation7], 0 }
   0x5   :  { %17 = vsyncpa [#allocation5], 0 }
   0x6   :  { %19 = vsyncpa [#allocation5 + $0x1], 0  ;;  %s6236_s27 = smov 0   ;;  %s6238_s28 = smov 0  }
   0x7   :  { %s6240_s29 = smov 0   ;;  %s6242_s30 = smov 0  }
   0x8 LB: > { %s6257_s7 = sadd.s32 4294967295, %s6180_s30   ;;  %s4637_s9 = sadd.s32 4294967294, %s6180_s30   ;;  %s6180_s30 = sphi %s6242_s30, %s6882_s30   ;;  %s6176_s29 = sphi %s6240_s29, %s6881_s29   ;;  %s6172_s28 = sphi %s6238_s28, %s6880_s28   ;;  %s6168_s27 = sphi %s6236_s27, %s6879_s27  }
   0x9   : > { %p45_p0 = scmp.ne.s32.totalorder %s6172_s28, %s6168_s27  ;;  %p6853_p1 = scmp.eq.s32.totalorder %s6257_s7, 0 }
   0xa   : > { %p222_p3 = scmp.eq.s32.totalorder %s4637_s9, 1  ;;  %p4638_p5 = scmp.ge.s32.totalorder %s6180_s30, 1 }
   0xb   : > { %p6266_p4 = por %p6853_p1, %p45_p0  ;;  %p229_p7 = scmp.lt.s32.totalorder %s6180_s30, 3 }
   0xc   : > { %p6271_p6 = por %p222_p3, %p45_p0  ;;  %s6182_s13 = smov [#allocation6]  }
   0xd   : > { %s6859_s10 = scalar_select %p6266_p4, 1, 0 }
   0xe   : > { %s6860_s11 = scalar_select %p6271_p6, 1, 0 }
   0xf   : > { %p6276_p8 = pnand %p4638_p5, %p229_p7  ;;  %s241_s14 = sshll.u32 %s6182_s13, 4  ;;  %s6280_s14 = int_to_ptr.vmem [resolvable:$true] %s241_s14 }
  0x10   : > { %s6183_s16 = smov [#allocation8]   ;;  %s6863_s1 = sld [smem:[#allocation13_spill]] }
  0x11   : > { %p5784_p9 = pneg %p6276_p8  ;;  %s260_s17 = sshll.u32 %s6183_s16, 4  ;;  %s6291_s17 = int_to_ptr.vmem [resolvable:$true] %s260_s17 }
  0x13   : > { %p6287_p11 = pnand %p5784_p9, %p6853_p1 }
  0x15   : > { %p6026_p13 = pneg %p6287_p11 }
  0x16   : > { %s6024_s20 = scalar_lea.hbm %s6863_s1, 9216 }
  0x17   : > { %p6025_p12 = scmp.ne.s32.totalorder %s6863_s1, %s6024_s20  ;;  %p6031_p5 = scmp.lt.u32.totalorder %s6024_s20, %s6863_s1 }
  0x19   : > { %p6027_p0 = pnand %p6026_p13, %p6025_p12 }
  0x1b   : > { %p6028_p3 = pneg %p6027_p0 }
  0x1d   : > { %p6033_p7 = pnand %p6031_p5, %p6028_p3 }
  0x1f   : > { %6036 = shalt.err (!%p6033_p7)
}
  0x20   : > { %s6037_s25 = scalar_lea.vmem %s6280_s14, 9216  ;;  %p6045_p2 = scmp.lt.s32.totalorder %s6280_s14, %s6280_s14 }
  0x21   : > { %p6038_p9 = scmp.ne.s32.totalorder %s6280_s14, %s6037_s25  ;;  %p6046_p12 = scmp.lt.s32.totalorder %s6037_s25, %s6037_s25 }
  0x23   : > { %p6040_p10 = pnand %p6038_p9, %p6026_p13  ;;  %p6047_p0 = por %p6046_p12, %p6045_p2 }
  0x25   : > { %p6041_p1 = pneg %p6040_p10 }
  0x27   : > { %p6048_p6 = pnand %p6047_p0, %p6041_p1 }
  0x29   : > { %6051 = shalt.err (!%p6048_p6)
}
  0x2a   : > { %s6854_s26 = smov 64   ;;  %s6855_s9 = smov 4  }
  0x2b   : > { %5787 = dma.hbm_to_vmem [thread:$0]  (!%p6287_p11), %s6863_s1, 9216, %s6280_s14, [#allocation7], %s6854_s26, %s6854_s26, %s6855_s9  }
  0x2c   : > { %s6052_s20 = scalar_lea.hbm %s6848_s4, 9216 }
  0x2d   : > { %p6053_p1 = scmp.ne.s32.totalorder %s6848_s4, %s6052_s20  ;;  %p6059_p10 = scmp.lt.u32.totalorder %s6052_s20, %s6848_s4 }
  0x2f   : > { %p6055_p2 = pnand %p6053_p1, %p6026_p13 }
  0x31   : > { %p6056_p6 = pneg %p6055_p2 }
  0x33   : > { %p6061_p3 = pnand %p6059_p10, %p6056_p6 }
  0x35   : > { %6064 = shalt.err (!%p6061_p3)
}
  0x36   : > { %s6065_s14 = scalar_lea.vmem %s6291_s17, 9216  ;;  %p6073_p12 = scmp.lt.s32.totalorder %s6291_s17, %s6291_s17 }
  0x37   : > { %p6066_p5 = scmp.ne.s32.totalorder %s6291_s17, %s6065_s14  ;;  %p6074_p0 = scmp.lt.s32.totalorder %s6065_s14, %s6065_s14 }
  0x39   : > { %p6068_p7 = pnand %p6066_p5, %p6026_p13  ;;  %p6075_p1 = por %p6074_p0, %p6073_p12 }
  0x3b   : > { %p6069_p9 = pneg %p6068_p7 }
  0x3d   : > { %p6076_p2 = pnand %p6075_p1, %p6069_p9 }
  0x3f   : > { %6079 = shalt.err (!%p6076_p2)
}
  0x40   : > { %5790 = dma.hbm_to_vmem [thread:$0]  (!%p6287_p11), %s6848_s4, 9216, %s6291_s17, [#allocation7], %s6854_s26, %s6854_s26, %s6855_s9  }
  0x41   : > { %s6352_s15 = sadd.s32 1, %s6180_s30   ;;  %s32_s16 = sadd.s32 1, %s6176_s29 }
  0x42   : > { %s29_s18 = ssub.s32 %s6180_s30, %s6352_s15  ;;  %p39_p13 = scmp.ne.s32.totalorder %s6176_s29, %s6172_s28 }
  0x43   : > { %p30_p6 = scmp.eq.s32.totalorder %s29_s18, 0  ;;  %p40_p10 = scmp.eq.s32.totalorder %s6180_s30, 0 }
  0x44   : > { %p6864_p3 = scmp.eq.s32.totalorder %s6257_s7, 1  ;;  %p5801_p7 = scmp.lt.s32.totalorder %s6180_s30, 2 }
  0x45   : > { %s6368_s20 = scalar_select %p30_p6, %s6176_s29, %s32_s16  }
  0x46   : > { %p6362_p5 = por %p6864_p3, %p39_p13  ;;  %p41_p9 = por %p40_p10, %p39_p13 }
  0x47   : > { %s283_s21 = sand.u32 1, %s6176_s29   ;;  %s5770_s17 = smul.u32 4608, %s6180_s30 }
  0x48   : > { %s6865_s19 = scalar_select %p6362_p5, 1, 0 }
  0x49   : > { %s5769_s22 = smul.u32 288, %s283_s21  ;;  %p6372_p11 = pnand %p5801_p7, %p41_p9 }
  0x4a   : > { %s6379_s25 = scalar_lea.hbm %s6844_s0, %s5770_s17  ;;  %s6383_s18 = scalar_lea.sflag [#allocation4], %s283_s21 }
  0x4b   : > { %s287_s13 = scalar_lea.vmem [#allocation3], %s5769_s22  ;;  %s6080_s26 = scalar_lea.hbm %s6379_s25, 4608 }
  0x4c   : > { %s294_s16 = sshll.u32 %s287_s13, 4  ;;  %p6081_p12 = scmp.ne.s32.totalorder %s6379_s25, %s6080_s26  ;;  %s6381_s16 = int_to_ptr.vmem [resolvable:$true] %s294_s16 }
  0x4d   : > { %p6082_p0 = pneg %p6372_p11  ;;  %s6085_s14 = scalar_lea.hbm %s6844_s0, 9216 }
  0x4e   : > { %p6086_p13 = scmp.lt.u32.totalorder %s6379_s25, %s6844_s0  ;;  %p6087_p6 = scmp.lt.u32.totalorder %s6085_s14, %s6080_s26 }
  0x4f   : > { %p6083_p1 = pnand %p6082_p0, %p6081_p12  ;;  %p6089_p3 = scmp.lt.u32.totalorder %s6080_s26, %s6379_s25 }
  0x50   : > { %p6088_p10 = por %p6087_p6, %p6086_p13 }
  0x51   : > { %p6084_p2 = pneg %p6083_p1 }
  0x52   : > { %p6090_p7 = por %p6089_p3, %p6088_p10 }
  0x54   : > { %p6091_p9 = pnand %p6090_p7, %p6084_p2 }
  0x56   : > { %6094 = shalt.err (!%p6091_p9)
}
  0x57   : > { %s6095_s21 = scalar_lea.vmem %s6381_s16, 4608  ;;  %s6186_s22 = smov [#allocation3]  }
  0x58   : > { %p6096_p12 = scmp.ne.s32.totalorder %s6381_s16, %s6095_s21  ;;  %s6100_s13 = sshll.u32 %s6186_s22, 4  ;;  %s6101_s13 = int_to_ptr.vmem [resolvable:$false] %s6100_s13 }
  0x59   : > { %s6102_s1 = scalar_lea.vmem %s6101_s13, 9216  ;;  %p6103_p4 = scmp.lt.s32.totalorder %s6381_s16, %s6101_s13 }
  0x5a   : > { %p6098_p1 = pnand %p6096_p12, %p6082_p0  ;;  %p6104_p13 = scmp.lt.s32.totalorder %s6102_s1, %s6095_s21 }
  0x5c   : > { %p6099_p5 = pneg %p6098_p1  ;;  %p6105_p6 = por %p6104_p13, %p6103_p4 }
  0x5e   : > { %p6106_p10 = pnand %p6105_p6, %p6099_p5 }
  0x60   : > { %6109 = shalt.err (!%p6106_p10)
}
  0x61   : > { %s6867_s26 = smov 4   ;;  %s6868_s9 = smov 64  }
  0x62   : > { %5794 = dma.hbm_to_vmem [thread:$0]  (!%p6372_p11), %s6379_s25, 4608, %s6381_s16, %s6383_s18, %s6868_s9, %s6868_s9, %s6867_s26  }
  0x63   : > { %306 = sbr.rel (%p6276_p8) target bundleno = 1134 (0x46e), region = 52  ;;  %s6417_s17 = sand.u32 (!%p6276_p8), 1, %s6172_s28  }
  0x64   : > { %s5771_s24 = smul.u32 (!%p6276_p8), 288, %s6417_s17  ;;  %s309_s14 = scalar_lea.sflag (!%p6276_p8), [#allocation4], %s6417_s17 }
  0x65   : > { %p6869_p4 = scmp.ne.s32.totalorder (!%p6276_p8), %s6859_s10, 0 }
  0x66   : > { %s6421_s21 = scalar_lea.vmem (!%p6276_p8), [#allocation3], %s5771_s24 }
  0x6a   : > { %6155 = dma.done.wait (%p6869_p4), %s309_s14, 4608  }
  0x6b   : > { %6157 = vsyncadd (%p6869_p4), %s309_s14, 4294962688  ;;  %p6870_p5 = scmp.eq.s32.totalorder %s6257_s7, 0 }
  0x6d   : > { %6159 = dma.done.wait (%p6870_p5), [#allocation7], 18432   ;;  %p6871_p8 = pmov %p6870_p5 }
  0x6e   : > { %v5844_v0 = vld [vmem:[#allocation6 + $0x40] sm:$0xff]   ;;  %v5845_v1 = vld [vmem:[#allocation6 + $0x48] sm:$0xff]   ;;  %v5846_v2 = vld [vmem:[#allocation6 + $0x50] sm:$0xff]   ;;  %vm694_vm0 = vsmask.f32 3328  ;;  %s4646_s1 = sshll.u32 %s6417_s17, 6 }
  0x6f   : > { %6161 = vsyncadd (%p6871_p8), [#allocation7], 4294948864  ;;  %5209 = vmatprep.subr.bf16.mxu0 %v5844_v0  ;;  %v5847_v3 = vld [vmem:[#allocation6 + $0x58] sm:$0xff]   ;;  %v5852_v4 = vld [vmem:[%s6421_s21 + $0x48] ss:$8 sps:$4 sm:$0xff]   ;;  %s6783_s26 = scalar_lea.vmem [#allocation9], %s4646_s1 }
  0x70   : > { %5210 = vmatpush3.bf16.msra.mxu0 %v5844_v0  ;;  %5225 = vmatprep.mubr.bf16.mxu0 %v5852_v4  ;;  %v5848_v5 = vld [vmem:[#allocation6 + $0x60] sm:$0xff]   ;;  %v5849_v6 = vld [vmem:[#allocation6 + $0x68] sm:$0xff]   ;;  %v5850_v7 = vld [vmem:[#allocation6 + $0x70] sm:$0xff]   ;;  %vm695_vm1 = vsmask.f32 7440  ;;  %s4992_s9 = sshll.u32 %s6257_s7, 10 }
  0x71   : > { %5211 = vmatprep.subr.bf16.mxu0 %v5845_v1  ;;  %v5851_v8 = vld [vmem:[#allocation6 + $0x78] sm:$0xff]   ;;  %v5853_v9 = vld [vmem:[#allocation6] sm:$0xff]   ;;  %v5860_v11 = vld [vmem:[%s6421_s21 + $0x68] ss:$8 sps:$4 sm:$0xff]   ;;  %vm2336_vm3 = vsmask.f32 256  ;;  %s6795_s10 = scalar_lea.hbm %s6852_s8, %s4992_s9 }
  0x72   : > { %v5854_v10 = vld [vmem:[%s6421_s21 + $0x58] ss:$8 sps:$4 sm:$0xff]   ;;  %v5855_v12 = vld [vmem:[#allocation6 + $0x8] sm:$0xff]   ;;  %v5856_v13 = vld [vmem:[#allocation6 + $0x10] sm:$0xff]   ;;  %vm2337_vm4 = vsmask.f32 4368 }
  0x73   : > { %v5862_v14 = vld [vmem:[%s6421_s21 + $0x78] ss:$8 sps:$4 sm:$0xff]   ;;  %v5859_v18 = vld [vmem:[#allocation6 + $0x28] sm:$0xff]   ;;  %v5861_v23 = vld [vmem:[#allocation6 + $0x30] sm:$0xff]   ;;  %s4545_s24 = sshll.u32 %s6783_s26, 4  ;;  %s4532_s7 = scalar_lea.sflag [#allocation5], %s6417_s17  ;;  %s6797_s24 = int_to_ptr.vmem [resolvable:$true] %s4545_s24 }
  0x74   : > { %5212 = vmatpush3.bf16.msra.mxu0 %v5845_v1  ;;  %v5864_v15 = vld [vmem:[%s6421_s21] ss:$8 sps:$4 sm:$0xff]   ;;  %v5857_v16 = vld [vmem:[#allocation6 + $0x18] sm:$0xff]   ;;  %v679_v26 = vld [vmem:[%s6421_s21 + $0x4] sm:$0x1]  ;;  %s6110_s12 = scalar_lea.vmem %s6797_s24, 1024 }
  0x75   : > { %5213 = vmatprep.subr.bf16.mxu0 %v5846_v2  ;;  %v5858_v17 = vld [vmem:[#allocation6 + $0x20] sm:$0xff]   ;;  %v680_v20 = vld [vmem:[%s6421_s21 + $0x8] sm:$0xf]  ;;  %v5863_v27 = vld [vmem:[#allocation6 + $0x38] sm:$0xff]   ;;  %v707_v33 = vshll.u32 %v679_v26, 16  ;;  %p6111_p11 = scmp.ne.s32.totalorder %s6797_s24, %s6110_s12  ;;  %p6876_p0 = scmp.ne.s32.totalorder %s6865_s19, 0 }
  0x76   : > { %v678_v19 = vld [vmem:[%s6421_s21] sm:$0xf]  ;;  %v712_v24 = vshrl.u32 %v680_v20, 16  ;;  %v715_v25 = vshll.u32 %v680_v20, 16  ;;  %v681_v28 = vld [vmem:[%s6421_s21 + $0xc] sm:$0x1]  ;;  %vm6446_vm2 = vmor %vm694_vm0, %vm695_vm1 }
  0x77   : > { %v698_v21 = vshrl.u32 %v678_v19, 16  ;;  %v701_v22 = vshll.u32 %v678_v19, 16  ;;  %v721_v34 = vshll.u32 %v681_v28, 16  ;;  %v5865_v35 = vld [vmem:[#allocation6 + $0x80] sm:$0xff]   ;;  %v5866_v36 = vld [vmem:[%s6421_s21 + $0x10] ss:$8 sps:$4 sm:$0xff]   ;;  %vm6573_vm5 = vmor %vm2336_vm3, %vm2337_vm4  ;;  %p6112_p2 = pnand %p6111_p11, %p6876_p0 }
  0x78   : > { %5214 = vmatpush3.bf16.msra.mxu0 %v5846_v2  ;;  %v714_v31 = vrot.slane %v712_v24, 4  ;;  %v717_v32 = vrot.slane %v715_v25, 5  ;;  %v5872_v39 = vld [vmem:[%s6421_s21 + $0x20] ss:$8 sps:$4 sm:$0xff]   ;;  %v709_v40 = vrot.slane %v707_v33, 5  ;;  %v5868_v51 = vld [vmem:[#allocation6 + $0x90] sm:$0xff]  }
  0x79   : > { %5215 = vmatprep.subr.bf16.mxu0 %v5847_v3  ;;  %v700_v29 = vrot.slane %v698_v21, 4  ;;  %v703_v30 = vrot.slane %v701_v22, 5  ;;  %v723_v41 = vrot.slane %v721_v34, 5  ;;  %v5867_v42 = vld [vmem:[#allocation6 + $0x88] sm:$0xff]   ;;  %v682_v43 = vld [vmem:[%s6421_s21 + $0x10] sm:$0xf]  ;;  %p6113_p3 = pneg %p6112_p2 }
  0x7a   : > { %v718_v38 = vor.u32 %v717_v32, %v714_v31  ;;  %v684_v44 = vld [vmem:[%s6421_s21 + $0x18] sm:$0xf]  ;;  %v726_v48 = vshrl.u32 %v682_v43, 16  ;;  %v729_v49 = vshll.u32 %v682_v43, 16  ;;  %v686_v61 = vld [vmem:[%s6421_s21 + $0x20] sm:$0xf] }
  0x7b   : > { %v704_v37 = vor.u32 %v703_v30, %v700_v29  ;;  %v740_v50 = vshrl.u32 %v684_v44, 16  ;;  %v5874_v54 = vld [vmem:[%s6421_s21 + $0x30] ss:$8 sps:$4 sm:$0xff]   ;;  %v743_v57 = vshll.u32 %v684_v44, 16  ;;  %v683_v62 = vld [vmem:[%s6421_s21 + $0x14] sm:$0x1] }
  0x7c   : > { %5216 = vmatpush3.bf16.msra.mxu0 %v5847_v3  ;;  %v719_v46 = vrot.slane %v718_v38, 4  ;;  %v5869_v55 = vld [vmem:[#allocation6 + $0x98] sm:$0xff]   ;;  %v728_v56 = vrot.slane %v726_v48, 4  ;;  %v731_v59 = vrot.slane %v729_v49, 5  ;;  %v688_v0 = vld [vmem:[%s6421_s21 + $0x28] sm:$0xf] }
  0x7d   : > { %5217 = vmatprep.subr.bf16.mxu0 %v5848_v5  ;;  %v705_v45 = vrot.slane %v704_v37, 4  ;;  %v742_v60 = vrot.slane %v740_v50, 4  ;;  %v685_v63 = vld [vmem:[%s6421_s21 + $0x1c] sm:$0x1]  ;;  %v687_v1 = vld [vmem:[%s6421_s21 + $0x24] sm:$0x1] }
  0x7e   : > { %v724_v53 = vsel %vm6446_vm2, %v719_v46, %v723_v41  ;;  %v745_v2 = vrot.slane %v743_v57, 5  ;;  %v754_v3 = vshrl.u32 %v686_v61, 16  ;;  %v5870_v4 = vld [vmem:[#allocation6 + $0xa0] sm:$0xff]   ;;  %v692_v21 = vld [vmem:[%s6421_s21 + $0x38] sm:$0xf]  ;;  %v5873_v30 = vld [vmem:[#allocation6 + $0xb0] sm:$0xff]  }
  0x7f   : > { %v710_v52 = vsel %vm6446_vm2, %v705_v45, %v709_v40  ;;  %v796_v28 = vshrl.u32 %v692_v21, 16  ;;  %v799_v29 = vshll.u32 %v692_v21, 16  ;;  %v5875_v38 = vld [vmem:[#allocation6 + $0xb8] sm:$0xff]   ;;  %v5893_v21 = vld [vmem:[#allocation6 + $0x130] sm:$0xff]   ;;  %s6188_s23 = smov [#allocation9]  }
  0x80   : > { %5218 = vmatpush3.bf16.msra.mxu0 %v5848_v5  ;;  %v4679_v58 = vcombine.low %v710_v52, %v724_v53  ;;  %v757_v5 = vshll.u32 %v686_v61, 16  ;;  %s6114_s25 = sshll.u32 %s6188_s23, 4  ;;  %s6115_s25 = int_to_ptr.vmem [resolvable:$false] %s6114_s25 }
  0x81   : > { %5219 = vmatprep.subr.bf16.mxu0 %v5849_v6  ;;  %v798_v40 = vrot.slane %v796_v28, 4  ;;  %v801_v41 = vrot.slane %v799_v29, 5  ;;  %v5895_v28 = vld [vmem:[#allocation6 + $0x138] sm:$0xff]   ;;  %s6116_s16 = scalar_lea.vmem %s6115_s25, 2048  ;;  %p6117_p7 = scmp.lt.s32.totalorder %s6797_s24, %s6115_s25 }
  0x82   : > { %p6118_p9 = scmp.lt.s32.totalorder %s6116_s16, %s6110_s12 }
  0x83   : > { %v802_v49 = vor.u32 %v801_v41, %v798_v40 }
  0x84   : > { %5220 = vmatpush3.bf16.msra.mxu0 %v5849_v6  ;;  %v768_v6 = vshrl.u32 %v688_v0, 16  ;;  %p6119_p12 = por %p6118_p9, %p6117_p7 }
  0x85   : > { %5221 = vmatprep.subr.bf16.mxu0 %v5850_v7 }
  0x86   : > { %p6120_p1 = pnand %p6119_p12, %p6113_p3 }
  0x88   : > { %5222 = vmatpush3.bf16.msra.mxu0 %v5850_v7  ;;  %v771_v7 = vshll.u32 %v688_v0, 16  ;;  %v5879_v0 = vld [vmem:[#allocation6 + $0xd8] sm:$0xff]  }
  0x89   : > { %5223 = vmatprep.subr.bf16.mxu0 %v5851_v8 }
  0x8a   : > { %v773_v19 = vrot.slane %v771_v7, 5  ;;  %v5885_v7 = vld [vmem:[#allocation6 + $0x100] sm:$0xff]  }
  0x8c   : > { %5224 = vmatpush3.bf16.msra.mxu0 %v5851_v8  ;;  %v689_v8 = vld [vmem:[%s6421_s21 + $0x2c] sm:$0x1] }
  0x8d   : > { %5233 = vmatprep.subr.bf16.mxu0 %v5853_v9  ;;  %v777_v20 = vshll.u32 %v689_v8, 16  ;;  %v5886_v8 = vld [vmem:[%s6421_s21 + $0xa0] ss:$8 sps:$4 sm:$0xff]  }
  0x8f   : > { %5226 = vmatmul.mubr.bf16.vlgmr.msra.gmra.mrb[0].mxu0 %v5854_v10  ;;  %v749_v10 = vshll.u32 %v685_v63, 16  ;;  %v779_v34 = vrot.slane %v777_v20, 5  ;;  %v5878_v63 = vld [vmem:[#allocation6 + $0xd0] sm:$0xff]  }
  0x90   : > { %5234 = vmatpush3.bf16.msra.mxu0 %v5853_v9  ;;  %5229 = vmatprep.mubr.bf16.mxu0 %v5860_v11  ;;  %v735_v9 = vshll.u32 %v683_v62, 16  ;;  %v690_v11 = vld [vmem:[%s6421_s21 + $0x30] sm:$0xf] }
  0x91   : > { %5235 = vmatprep.subr.bf16.mxu0 %v5855_v12  ;;  %v782_v22 = vshrl.u32 %v690_v11, 16  ;;  %v751_v25 = vrot.slane %v749_v10, 5  ;;  %v5887_v10 = vld [vmem:[#allocation6 + $0x108] sm:$0xff]  }
  0x92   : > { %v737_v24 = vrot.slane %v735_v9, 5  ;;  %v5892_v9 = vld [vmem:[%s6421_s21 + $0xb0] ss:$8 sps:$4 sm:$0xff]  }
  0x94   : > { %5236 = vmatpush3.bf16.msra.mxu0 %v5855_v12  ;;  %v5871_v12 = vld [vmem:[#allocation6 + $0xa8] sm:$0xff]  }
  0x95   : > { %5237 = vmatprep.subr.bf16.mxu0 %v5856_v13 }
  0x97   : > { %5230 = vmatmul.mubr.bf16.gmra.mrb[4].mxu0 %v5862_v14  ;;  %v746_v14 = vor.u32 %v745_v2, %v742_v60  ;;  %v5877_v60 = vld [vmem:[#allocation6 + $0xc8] sm:$0xff]   ;;  %v5884_v2 = vld [vmem:[%s6421_s21 + $0x90] ss:$8 sps:$4 sm:$0xff]  }
  0x98   : > { %5238 = vmatpush3.bf16.msra.mxu0 %v5856_v13  ;;  %5249 = vmatprep.mubr.bf16.mxu0 %v5864_v15  ;;  %v732_v13 = vor.u32 %v731_v59, %v728_v56  ;;  %v756_v15 = vrot.slane %v754_v3, 4  ;;  %v5880_v3 = vld [vmem:[#allocation6 + $0xe0] sm:$0xff]  }
  0x99   : > { %5239 = vmatprep.subr.bf16.mxu0 %v5857_v16 }
  0x9a   : > { %v733_v26 = vrot.slane %v732_v13, 4  ;;  %v5889_v13 = vld [vmem:[#allocation6 + $0x118] sm:$0xff]  }
  0x9c   : > { %5240 = vmatpush3.bf16.msra.mxu0 %v5857_v16  ;;  %v763_v16 = vshll.u32 %v687_v1, 16  ;;  %v738_v44 = vsel %vm6446_vm2, %v733_v26, %v737_v24  ;;  %v4732_v24 = vld [vmem:[%s6421_s21 + $0x94] sm:$0x1] }
  0x9d   : > { %5241 = vmatprep.subr.bf16.mxu0 %v5858_v17 }
  0x9e   : > { %v765_v32 = vrot.slane %v763_v16, 5  ;;  %v4731_v16 = vld [vmem:[%s6421_s21 + $0x90] sm:$0xf] }
  0x9f   : > { %v1325_v20 = vshll.u32 %v4731_v16, 16 }
  0xa0   : > { %5242 = vmatpush3.bf16.msra.mxu0 %v5858_v17  ;;  %v759_v17 = vrot.slane %v757_v5, 5  ;;  %v5882_v5 = vld [vmem:[#allocation6 + $0xf0] sm:$0xff]  }
  0xa1   : > { %5243 = vmatprep.subr.bf16.mxu0 %v5859_v18 }
  0xa2   : > { %v760_v31 = vor.u32 %v759_v17, %v756_v15  ;;  %v5890_v15 = vld [vmem:[#allocation6 + $0x120] sm:$0xff]   ;;  %v5891_v17 = vld [vmem:[#allocation6 + $0x128] sm:$0xff]  }
  0xa4   : > { %5244 = vmatpush3.bf16.msra.mxu0 %v5859_v18  ;;  %v770_v18 = vrot.slane %v768_v6, 4  ;;  %v5883_v6 = vld [vmem:[#allocation6 + $0xf8] sm:$0xff]  }
  0xa5   : > { %5245 = vmatprep.subr.bf16.mxu0 %v5861_v23 }
  0xa6   : > { %v774_v33 = vor.u32 %v773_v19, %v770_v18  ;;  %v4733_v18 = vld [vmem:[%s6421_s21 + $0x98] sm:$0xf]  ;;  %v1322_v19 = vshrl.u32 %v4731_v16, 16 }
  0xa8   : > { %5246 = vmatpush3.bf16.msra.mxu0 %v5861_v23  ;;  %v785_v23 = vshll.u32 %v690_v11, 16  ;;  %v775_v43 = vrot.slane %v774_v33, 4  ;;  %v5888_v11 = vld [vmem:[#allocation6 + $0x110] sm:$0xff]   ;;  %v1324_v26 = vrot.slane %v1322_v19, 4  ;;  %v1331_v33 = vshll.u32 %v4732_v24, 16 }
  0xa9   : > { %5247 = vmatprep.subr.bf16.mxu0 %v5863_v27 }
  0xaa   : > { %v787_v37 = vrot.slane %v785_v23, 5  ;;  %v780_v53 = vsel %vm6446_vm2, %v775_v43, %v779_v34  ;;  %v1339_v23 = vshll.u32 %v4733_v18, 16 }
  0xac   : > { %5248 = vmatpush3.bf16.msra.mxu0 %v5863_v27  ;;  %v747_v27 = vrot.slane %v746_v14, 4  ;;  %v5896_v14 = vld [vmem:[%s6421_s21 + $0xd8] ss:$8 sps:$4 sm:$0xff]  }
  0xad   : > { %5257 = vmatprep.subr.bf16.mxu0 %v5865_v35 }
  0xae   : > { %v752_v46 = vsel %vm6446_vm2, %v747_v27, %v751_v25  ;;  %v4734_v25 = vld [vmem:[%s6421_s21 + $0x9c] sm:$0x1]  ;;  %v1327_v27 = vrot.slane %v1325_v20, 5 }
  0xaf   : > { %5250 = vmatmul.mubr.bf16.vlgmr.msra.gmra.mrb[0].mxu0 %v5866_v36  ;;  %v784_v36 = vrot.slane %v782_v22, 4  ;;  %v1336_v22 = vshrl.u32 %v4733_v18, 16  ;;  %v1345_v34 = vshll.u32 %v4734_v25, 16 }
  0xb0   : > { %5258 = vmatpush3.bf16.msra.mxu0 %v5865_v35  ;;  %5253 = vmatprep.mubr.bf16.mxu0 %v5872_v39  ;;  %v691_v35 = vld [vmem:[%s6421_s21 + $0x34] sm:$0x1]  ;;  %v693_v39 = vld [vmem:[%s6421_s21 + $0x3c] sm:$0x1] }
  0xb1   : > { %5259 = vmatprep.subr.bf16.mxu0 %v5867_v42  ;;  %v791_v45 = vshll.u32 %v691_v35, 16  ;;  %v788_v48 = vor.u32 %v787_v37, %v784_v36  ;;  %v805_v50 = vshll.u32 %v693_v39, 16  ;;  %v1338_v29 = vrot.slane %v1336_v22, 4  ;;  %v4739_v35 = vld [vmem:[%s6421_s21 + $0xb0] sm:$0xf]  ;;  %v5897_v39 = vld [vmem:[#allocation6 + $0x140] sm:$0xff]  }
  0xb2   : > { %v1328_v36 = vor.u32 %v1327_v27, %v1324_v26 }
  0xb3   : > { %v789_v57 = vrot.slane %v788_v48, 4  ;;  %v807_v59 = vrot.slane %v805_v50, 5  ;;  %v1381_v48 = vshll.u32 %v4739_v35, 16  ;;  %v1333_v50 = vrot.slane %v1331_v33, 5 }
  0xb4   : > { %5260 = vmatpush3.bf16.msra.mxu0 %v5867_v42  ;;  %v761_v42 = vrot.slane %v760_v31, 4  ;;  %v4735_v31 = vld [vmem:[%s6421_s21 + $0xa0] sm:$0xf] }
  0xb5   : > { %5261 = vmatprep.subr.bf16.mxu0 %v5868_v51  ;;  %v1350_v37 = vshrl.u32 %v4735_v31, 16  ;;  %v1353_v41 = vshll.u32 %v4735_v31, 16  ;;  %v5902_v31 = vld [vmem:[#allocation6 + $0x160] sm:$0xff]  }
  0xb6   : > { %v766_v52 = vsel %vm6446_vm2, %v761_v42, %v765_v32  ;;  %v4737_v32 = vld [vmem:[%s6421_s21 + $0xa8] sm:$0xf] }
  0xb7   : > { %5254 = vmatmul.mubr.bf16.gmra.mrb[4].mxu0 %v5874_v54  ;;  %v4680_v54 = vcombine.low %v738_v44, %v752_v46  ;;  %v4681_v56 = vcombine.low %v766_v52, %v780_v53  ;;  %v1364_v42 = vshrl.u32 %v4737_v32, 16  ;;  %v1367_v43 = vshll.u32 %v4737_v32, 16  ;;  %v5898_v44 = vld [vmem:[%s6421_s21 + $0xe8] ss:$8 sps:$4 sm:$0xff]   ;;  %v4736_v52 = vld [vmem:[%s6421_s21 + $0xa4] sm:$0x1] }
  0xb8   : > { %5262 = vmatpush3.bf16.msra.mxu0 %v5868_v51  ;;  %5273 = vmatprep.mubr.bf16.mxu0 %v4679_v58  ;;  %v5876_v51 = vld [vmem:[#allocation6 + $0xc0] sm:$0xff]   ;;  %v803_v58 = vrot.slane %v802_v49, 4  ;;  %v1378_v46 = vshrl.u32 %v4739_v35, 16  ;;  %v5899_v49 = vld [vmem:[#allocation6 + $0x148] sm:$0xff]  }
  0xb9   : > { %5263 = vmatprep.subr.bf16.mxu0 %v5869_v55 }
  0xba   : > { %v808_v62 = vsel %vm6446_vm2, %v803_v58, %v807_v59  ;;  %v1355_v59 = vrot.slane %v1353_v41, 5  ;;  %v5905_v41 = vld [vmem:[#allocation6 + $0x170] sm:$0xff]  }
  0xbc   : > { %5264 = vmatpush3.bf16.msra.mxu0 %v5869_v55  ;;  %v793_v55 = vrot.slane %v791_v45, 5  ;;  %v5904_v45 = vld [vmem:[%s6421_s21 + $0xf8] ss:$8 sps:$4 sm:$0xff]  }
  0xbd   : > { %5265 = vmatprep.subr.bf16.mxu0 %v5870_v4 }
  0xbe   : > { %v794_v61 = vsel %vm6446_vm2, %v789_v57, %v793_v55  ;;  %v1329_v55 = vrot.slane %v1328_v36, 4  ;;  %v1352_v57 = vrot.slane %v1350_v37, 4  ;;  %v5940_v36 = vld [vmem:[#allocation8 + $0x40] sm:$0xff]   ;;  %v5941_v37 = vld [vmem:[#allocation8 + $0x48] sm:$0xff]  }
  0xbf   : > { %v4682_v1 = vcombine.low %v794_v61, %v808_v62  ;;  %v1369_v61 = vrot.slane %v1367_v43, 5  ;;  %v4740_v62 = vld [vmem:[%s6421_s21 + $0xb4] sm:$0x1]  ;;  %5425 = vmatprep.subr.bf16.mxu1 %v5940_v36  ;;  %v5907_v43 = vld [vmem:[#allocation6 + $0x178] sm:$0xff]  }
  0xc0   : > { %5266 = vmatpush3.bf16.msra.mxu0 %v5870_v4  ;;  %v5881_v4 = vld [vmem:[#allocation6 + $0xe8] sm:$0xff]   ;;  %5426 = vmatpush3.bf16.msra.mxu1 %v5940_v36 }
  0xc1   : > { %5267 = vmatprep.subr.bf16.mxu0 %v5871_v12  ;;  %5427 = vmatprep.subr.bf16.mxu1 %v5941_v37 }
  0xc4   : > { %5268 = vmatpush3.bf16.msra.mxu0 %v5871_v12  ;;  %v5894_v12 = vld [vmem:[%s6421_s21 + $0xc0] ss:$8 sps:$4 sm:$0xff]   ;;  %5428 = vmatpush3.bf16.msra.mxu1 %v5941_v37 }
  0xc5   : > { %5269 = vmatprep.subr.bf16.mxu0 %v5873_v30  ;;  %v5930_v37 = vld [vmem:[%s6421_s21 + $0x60] ss:$8 sps:$4 sm:$0xff]  }
  0xc8   : > { %5270 = vmatpush3.bf16.msra.mxu0 %v5873_v30  ;;  %v1341_v30 = vrot.slane %v1339_v23, 5 }
  0xc9   : > { %5271 = vmatprep.subr.bf16.mxu0 %v5875_v38 }
  0xca   : > { %v1342_v40 = vor.u32 %v1341_v30, %v1338_v29 }
  0xcc   : > { %5272 = vmatpush3.bf16.msra.mxu0 %v5875_v38  ;;  %v4741_v38 = vld [vmem:[%s6421_s21 + $0xb8] sm:$0xf]  ;;  %v1343_v58 = vrot.slane %v1342_v40, 4  ;;  %v5903_v40 = vld [vmem:[#allocation6 + $0x168] sm:$0xff]  }
  0xcd   : > { %5281 = vmatprep.subr.bf16.mxu0 %v5876_v51  ;;  %v1392_v53 = vshrl.u32 %v4741_v38, 16 }
  0xcf   : > { %5274 = vmatmul.mubr.bf16.vlgmr.msra.gmra.mrb[0].mxu0 %v4680_v54  ;;  %v1395_v54 = vshll.u32 %v4741_v38, 16 }
  0xd0   : > { %5282 = vmatpush3.bf16.msra.mxu0 %v5876_v51  ;;  %5277 = vmatprep.mubr.bf16.mxu0 %v4681_v56  ;;  %v1347_v51 = vrot.slane %v1345_v34, 5  ;;  %v4738_v56 = vld [vmem:[%s6421_s21 + $0xac] sm:$0x1] }
  0xd1   : > { %5283 = vmatprep.subr.bf16.mxu0 %v5877_v60 }
  0xd4   : > { %5284 = vmatpush3.bf16.msra.mxu0 %v5877_v60  ;;  %v1366_v60 = vrot.slane %v1364_v42, 4  ;;  %v4744_v42 = vld [vmem:[%s6421_s21 + $0xc4] sm:$0x1] }
  0xd5   : > { %5285 = vmatprep.subr.bf16.mxu0 %v5878_v63 }
  0xd7   : > { %5278 = vmatmul.mubr.bf16.gmra.mrb[4].mxu0 %v4682_v1  ;;  %v1359_v1 = vshll.u32 %v4736_v52, 16  ;;  %v5908_v52 = vld [vmem:[#allocation6 + $0x180] sm:$0xff]  }
  0xd8   : > { %5286 = vmatpush3.bf16.msra.mxu0 %v5878_v63  ;;  %5297 = vmatprep.mubr.bf16.mxu0 %v5884_v2  ;;  %v1380_v63 = vrot.slane %v1378_v46, 4  ;;  %v1373_v2 = vshll.u32 %v4738_v56, 16  ;;  %v1415_v46 = vshll.u32 %v4744_v42, 16 }
  0xd9   : > { %5287 = vmatprep.subr.bf16.mxu0 %v5879_v0  ;;  %v1361_v23 = vrot.slane %v1359_v1, 5 }
  0xda   : > { %v1375_v24 = vrot.slane %v1373_v2, 5  ;;  %v1417_v56 = vrot.slane %v1415_v46, 5  ;;  %v5916_v2 = vld [vmem:[%s6421_s21 + $0x8] ss:$8 sps:$4 sm:$0xff]  }
  0xdc   : > { %5288 = vmatpush3.bf16.msra.mxu0 %v5879_v0  ;;  %v1383_v0 = vrot.slane %v1381_v48, 5 }
  0xdd   : > { %5289 = vmatprep.subr.bf16.mxu0 %v5880_v3 }
  0xe0   : > { %5290 = vmatpush3.bf16.msra.mxu0 %v5880_v3  ;;  %v4742_v3 = vld [vmem:[%s6421_s21 + $0xbc] sm:$0x1] }
  0xe1   : > { %5291 = vmatprep.subr.bf16.mxu0 %v5881_v4  ;;  %v1401_v16 = vshll.u32 %v4742_v3, 16  ;;  %v5911_v3 = vld [vmem:[#allocation6 + $0x198] sm:$0xff]  }
  0xe3   : > { %v1403_v30 = vrot.slane %v1401_v16, 5  ;;  %v5922_v16 = vld [vmem:[#allocation6 + $0x1e0] sm:$0xff]  }
  0xe4   : > { %5292 = vmatpush3.bf16.msra.mxu0 %v5881_v4  ;;  %v1394_v4 = vrot.slane %v1392_v53, 4 }
  0xe5   : > { %5293 = vmatprep.subr.bf16.mxu0 %v5882_v5 }
  0xe8   : > { %5294 = vmatpush3.bf16.msra.mxu0 %v5882_v5  ;;  %v1397_v5 = vrot.slane %v1395_v54, 5 }
  0xe9   : > { %5295 = vmatprep.subr.bf16.mxu0 %v5883_v6 }
  0xea   : > { %v1398_v18 = vor.u32 %v1397_v5, %v1394_v4  ;;  %v5912_v4 = vld [vmem:[#allocation6 + $0x1a0] sm:$0xff]   ;;  %v5913_v5 = vld [vmem:[#allocation6 + $0x1a8] sm:$0xff]  }
  0xec   : > { %5296 = vmatpush3.bf16.msra.mxu0 %v5883_v6  ;;  %v1334_v6 = vsel %vm6446_vm2, %v1329_v55, %v1333_v50  ;;  %v1399_v32 = vrot.slane %v1398_v18, 4  ;;  %v4799_v18 = vld [vmem:[%s6421_s21 + $0x8] sm:$0xf] }
  0xed   : > { %5305 = vmatprep.subr.bf16.mxu0 %v5885_v7 }
  0xee   : > { %v1404_v54 = vsel %vm6446_vm2, %v1399_v32, %v1403_v30  ;;  %v4800_v30 = vld [vmem:[%s6421_s21 + $0xc] sm:$0x1]  ;;  %v5929_v32 = vld [vmem:[#allocation6 + $0x200] sm:$0xff]  }
  0xef   : > { %5298 = vmatmul.mubr.bf16.vlgmr.msra.gmra.mrb[0].mxu0 %v5886_v8  ;;  %v4745_v8 = vld [vmem:[%s6421_s21 + $0xc8] sm:$0xf] }
  0xf0   : > { %5306 = vmatpush3.bf16.msra.mxu0 %v5885_v7  ;;  %5301 = vmatprep.mubr.bf16.mxu0 %v5892_v9  ;;  %v4743_v7 = vld [vmem:[%s6421_s21 + $0xc0] sm:$0xf]  ;;  %v5900_v9 = vld [vmem:[#allocation6 + $0x150] sm:$0xff]  }
  0xf1   : > { %5307 = vmatprep.subr.bf16.mxu0 %v5887_v10  ;;  %v1406_v19 = vshrl.u32 %v4743_v7, 16  ;;  %v1409_v20 = vshll.u32 %v4743_v7, 16  ;;  %v5915_v7 = vld [vmem:[#allocation6 + $0x1b8] sm:$0xff]  }
  0xf3   : > { %v1408_v33 = vrot.slane %v1406_v19, 4  ;;  %v1411_v34 = vrot.slane %v1409_v20, 5  ;;  %v4801_v19 = vld [vmem:[%s6421_s21 + $0x10] sm:$0xf] }
  0xf4   : > { %5308 = vmatpush3.bf16.msra.mxu0 %v5887_v10  ;;  %v1348_v10 = vsel %vm6446_vm2, %v1343_v58, %v1347_v51  ;;  %v5925_v20 = vld [vmem:[#allocation6 + $0x1f0] sm:$0xff]  }
  0xf5   : > { %5309 = vmatprep.subr.bf16.mxu0 %v5888_v11  ;;  %v4747_v22 = vcombine.low %v1334_v6, %v1348_v10  ;;  %v5914_v6 = vld [vmem:[#allocation6 + $0x1b0] sm:$0xff]  }
  0xf6   : > { %v5924_v10 = vld [vmem:[%s6421_s21 + $0x28] ss:$8 sps:$4 sm:$0xff]  }
  0xf7   : > { %5302 = vmatmul.mubr.bf16.gmra.mrb[4].mxu0 %v5894_v12  ;;  %v1370_v12 = vor.u32 %v1369_v61, %v1366_v60  ;;  %v5909_v61 = vld [vmem:[#allocation6 + $0x188] sm:$0xff]  }
  0xf8   : > { %5310 = vmatpush3.bf16.msra.mxu0 %v5888_v11  ;;  %5321 = vmatprep.mubr.bf16.mxu0 %v5896_v14  ;;  %v1356_v11 = vor.u32 %v1355_v59, %v1352_v57  ;;  %v5906_v14 = vld [vmem:[%s6421_s21 + $0x108] ss:$8 sps:$4 sm:$0xff]  }
  0xf9   : > { %5311 = vmatprep.subr.bf16.mxu0 %v5889_v13  ;;  %v1371_v26 = vrot.slane %v1370_v12, 4  ;;  %v5920_v12 = vld [vmem:[#allocation6 + $0x1d0] sm:$0xff]  }
  0xfa   : > { %v1357_v25 = vrot.slane %v1356_v11, 4  ;;  %v5919_v11 = vld [vmem:[#allocation6 + $0x1c8] sm:$0xff]  }
  0xfb   : > { %v1376_v48 = vsel %vm6446_vm2, %v1371_v26, %v1375_v24  ;;  %v1963_v24 = vshll.u32 %v4801_v19, 16 }
  0xfc   : > { %5312 = vmatpush3.bf16.msra.mxu0 %v5889_v13  ;;  %v1387_v13 = vshll.u32 %v4740_v62, 16 }
  0xfd   : > { %5313 = vmatprep.subr.bf16.mxu0 %v5890_v15 }
  0xfe   : > { %v1389_v27 = vrot.slane %v1387_v13, 5  ;;  %v5926_v13 = vld [vmem:[%s6421_s21 + $0x38] ss:$8 sps:$4 sm:$0xff]  }
 0x100   : > { %5314 = vmatpush3.bf16.msra.mxu0 %v5890_v15  ;;  %v1384_v15 = vor.u32 %v1383_v0, %v1380_v63  ;;  %v5910_v0 = vld [vmem:[#allocation6 + $0x190] sm:$0xff]  }
 0x101   : > { %5315 = vmatprep.subr.bf16.mxu0 %v5891_v17 }
 0x102   : > { %v1385_v29 = vrot.slane %v1384_v15, 4  ;;  %v5921_v15 = vld [vmem:[#allocation6 + $0x1d8] sm:$0xff]  }
 0x104   : > { %5316 = vmatpush3.bf16.msra.mxu0 %v5891_v17  ;;  %v5901_v17 = vld [vmem:[#allocation6 + $0x158] sm:$0xff]   ;;  %v1390_v53 = vsel %vm6446_vm2, %v1385_v29, %v1389_v27  ;;  %v1965_v29 = vrot.slane %v1963_v24, 5 }
 0x105   : > { %5317 = vmatprep.subr.bf16.mxu0 %v5893_v21  ;;  %v4749_v57 = vcombine.low %v1390_v53, %v1404_v54  ;;  %v4807_v53 = vld [vmem:[%s6421_s21 + $0x28] sm:$0xf]  ;;  %v4809_v54 = vld [vmem:[%s6421_s21 + $0x30] sm:$0xf] }
 0x108   : > { %5318 = vmatpush3.bf16.msra.mxu0 %v5893_v21  ;;  %v1420_v21 = vshrl.u32 %v4745_v8, 16 }
 0x109   : > { %5319 = vmatprep.subr.bf16.mxu0 %v5895_v28 }
 0x10a   : > { %v1422_v35 = vrot.slane %v1420_v21, 4  ;;  %v1946_v21 = vshrl.u32 %v4799_v18, 16 }
 0x10c   : > { %5320 = vmatpush3.bf16.msra.mxu0 %v5895_v28  ;;  %v1423_v28 = vshll.u32 %v4745_v8, 16  ;;  %v5917_v8 = vld [vmem:[#allocation6 + $0x1c0] sm:$0xff]   ;;  %v1948_v26 = vrot.slane %v1946_v21, 4 }
 0x10d   : > { %5329 = vmatprep.subr.bf16.mxu0 %v5897_v39 }
 0x10e   : > { %v1425_v38 = vrot.slane %v1423_v28, 5 }
 0x10f   : > { %5322 = vmatmul.mubr.bf16.vlgmr.msra.gmra.mrb[0].mxu0 %v5898_v44  ;;  %v4746_v44 = vld [vmem:[%s6421_s21 + $0xcc] sm:$0x1] }
 0x110   : > { %5330 = vmatpush3.bf16.msra.mxu0 %v5897_v39  ;;  %5325 = vmatprep.mubr.bf16.mxu0 %v5904_v45  ;;  %v5942_v39 = vld [vmem:[#allocation8 + $0x50] sm:$0xff]   ;;  %v1362_v45 = vsel %vm6446_vm2, %v1357_v25, %v1361_v23  ;;  %v1426_v50 = vor.u32 %v1425_v38, %v1422_v35  ;;  %v1429_v51 = vshll.u32 %v4746_v44, 16  ;;  %v1960_v23 = vshrl.u32 %v4801_v19, 16  ;;  %v5927_v25 = vld [vmem:[#allocation6 + $0x1f8] sm:$0xff]  }
 0x111   : > { %5331 = vmatprep.subr.bf16.mxu0 %v5899_v49  ;;  %5429 = vmatprep.subr.bf16.mxu1 %v5942_v39  ;;  %v4748_v55 = vcombine.low %v1362_v45, %v1376_v48  ;;  %v5936_v38 = vld [vmem:[%s6421_s21 + $0x70] ss:$8 sps:$4 sm:$0xff]   ;;  %v5937_v48 = vld [vmem:[%s6421_s21 + $0x80] ss:$8 sps:$4 sm:$0xff]  }
 0x112   : > { %5430 = vmatpush3.bf16.msra.mxu1 %v5942_v39  ;;  %v1427_v59 = vrot.slane %v1426_v50, 4  ;;  %v1431_v60 = vrot.slane %v1429_v51, 5  ;;  %v1962_v28 = vrot.slane %v1960_v23, 4  ;;  %v5931_v39 = vld [vmem:[#allocation6 + $0x208] sm:$0xff]   ;;  %v5932_v44 = vld [vmem:[#allocation6 + $0x210] sm:$0xff]  }
 0x113   : > { %v4803_v50 = vld [vmem:[%s6421_s21 + $0x18] sm:$0xf]  ;;  %v4805_v51 = vld [vmem:[%s6421_s21 + $0x20] sm:$0xf]  ;;  %v5938_v23 = vld [vmem:[#allocation6 + $0x230] sm:$0xff]  }
 0x114   : > { %5332 = vmatpush3.bf16.msra.mxu0 %v5899_v49  ;;  %v1412_v49 = vor.u32 %v1411_v34, %v1408_v33  ;;  %v1432_v63 = vsel %vm6446_vm2, %v1427_v59, %v1431_v60  ;;  %v1955_v34 = vshll.u32 %v4800_v30, 16  ;;  %v1966_v35 = vor.u32 %v1965_v29, %v1962_v28  ;;  %v5934_v59 = vld [vmem:[#allocation6 + $0x220] sm:$0xff]   ;;  %v5939_v28 = vld [vmem:[#allocation6 + $0x238] sm:$0xff]  }
 0x115   : > { %5333 = vmatprep.subr.bf16.mxu0 %v5900_v9  ;;  %v2002_v60 = vshrl.u32 %v4807_v53, 16 }
 0x116   : > { %v1413_v58 = vrot.slane %v1412_v49, 4  ;;  %v1967_v42 = vrot.slane %v1966_v35, 4 }
 0x117   : > { %5326 = vmatmul.mubr.bf16.gmra.mrb[4].mxu0 %v5906_v14  ;;  %v5928_v14 = vld [vmem:[%s6421_s21 + $0x50] ss:$8 sps:$4 sm:$0xff]  }
 0x118   : > { %5334 = vmatpush3.bf16.msra.mxu0 %v5900_v9  ;;  %5345 = vmatprep.mubr.bf16.mxu0 %v4747_v22  ;;  %v1418_v62 = vsel %vm6446_vm2, %v1413_v58, %v1417_v56  ;;  %v5918_v9 = vld [vmem:[%s6421_s21 + $0x18] ss:$8 sps:$4 sm:$0xff]   ;;  %v1949_v22 = vshll.u32 %v4799_v18, 16  ;;  %v1977_v56 = vshll.u32 %v4803_v50, 16  ;;  %v1991_v58 = vshll.u32 %v4805_v51, 16 }
 0x119   : > { %5335 = vmatprep.subr.bf16.mxu0 %v5901_v17  ;;  %v4750_v1 = vcombine.low %v1418_v62, %v1432_v63  ;;  %v2016_v62 = vshrl.u32 %v4809_v54, 16  ;;  %v2019_v63 = vshll.u32 %v4809_v54, 16 }
 0x11a   : > { %v1951_v27 = vrot.slane %v1949_v22, 5 }
 0x11c   : > { %5336 = vmatpush3.bf16.msra.mxu0 %v5901_v17  ;;  %v5923_v17 = vld [vmem:[#allocation6 + $0x1e8] sm:$0xff]   ;;  %v1952_v33 = vor.u32 %v1951_v27, %v1948_v26 }
 0x11d   : > { %5337 = vmatprep.subr.bf16.mxu0 %v5902_v31 }
 0x120   : > { %5338 = vmatpush3.bf16.msra.mxu0 %v5902_v31  ;;  %v4802_v31 = vld [vmem:[%s6421_s21 + $0x14] sm:$0x1] }
 0x121   : > { %5339 = vmatprep.subr.bf16.mxu0 %v5903_v40  ;;  %v1969_v36 = vshll.u32 %v4802_v31, 16 }
 0x124   : > { %5340 = vmatpush3.bf16.msra.mxu0 %v5903_v40  ;;  %v1953_v40 = vrot.slane %v1952_v33, 4  ;;  %v4812_v33 = vld [vmem:[%s6421_s21 + $0x3c] sm:$0x1] }
 0x125   : > { %5341 = vmatprep.subr.bf16.mxu0 %v5905_v41 }
 0x128   : > { %5342 = vmatpush3.bf16.msra.mxu0 %v5905_v41  ;;  %v1957_v41 = vrot.slane %v1955_v34, 5 }
 0x129   : > { %5343 = vmatprep.subr.bf16.mxu0 %v5907_v43 }
 0x12a   : > { %v1958_v45 = vsel %vm6446_vm2, %v1953_v40, %v1957_v41 }
 0x12c   : > { %5344 = vmatpush3.bf16.msra.mxu0 %v5907_v43  ;;  %v1971_v43 = vrot.slane %v1969_v36, 5 }
 0x12d   : > { %5353 = vmatprep.subr.bf16.mxu0 %v5908_v52 }
 0x12e   : > { %v1972_v46 = vsel %vm6446_vm2, %v1967_v42, %v1971_v43  ;;  %v4814_v42 = vld [vmem:[%s6421_s21 + $0x44] sm:$0x1] }
 0x12f   : > { %5346 = vmatmul.mubr.bf16.vlgmr.msra.gmra.mrb[0].mxu0 %v4748_v55  ;;  %v4815_v49 = vcombine.low %v1958_v45, %v1972_v46  ;;  %v1974_v55 = vshrl.u32 %v4803_v50, 16 }
 0x130   : > { %5354 = vmatpush3.bf16.msra.mxu0 %v5908_v52  ;;  %5349 = vmatprep.mubr.bf16.mxu0 %v4749_v57  ;;  %v5933_v52 = vld [vmem:[#allocation6 + $0x218] sm:$0xff]   ;;  %v1988_v57 = vshrl.u32 %v4805_v51, 16 }
 0x131   : > { %5355 = vmatprep.subr.bf16.mxu0 %v5909_v61 }
 0x134   : > { %5356 = vmatpush3.bf16.msra.mxu0 %v5909_v61  ;;  %v2005_v61 = vshll.u32 %v4807_v53, 16 }
 0x135   : > { %5357 = vmatprep.subr.bf16.mxu0 %v5910_v0 }
 0x137   : > { %5350 = vmatmul.mubr.bf16.gmra.mrb[4].mxu0 %v4750_v1  ;;  %v1976_v1 = vrot.slane %v1974_v55, 4 }
 0x138   : > { %5358 = vmatpush3.bf16.msra.mxu0 %v5910_v0  ;;  %5369 = vmatprep.mubr.bf16.mxu0 %v5916_v2  ;;  %v5935_v0 = vld [vmem:[#allocation6 + $0x228] sm:$0xff]   ;;  %v1979_v2 = vrot.slane %v1977_v56, 5 }
 0x139   : > { %5359 = vmatprep.subr.bf16.mxu0 %v5911_v3 }
 0x13c   : > { %5360 = vmatpush3.bf16.msra.mxu0 %v5911_v3  ;;  %v1990_v3 = vrot.slane %v1988_v57, 4 }
 0x13d   : > { %5361 = vmatprep.subr.bf16.mxu0 %v5912_v4 }
 0x140   : > { %5362 = vmatpush3.bf16.msra.mxu0 %v5912_v4  ;;  %v1993_v4 = vrot.slane %v1991_v58, 5 }
 0x141   : > { %5363 = vmatprep.subr.bf16.mxu0 %v5913_v5 }
 0x144   : > { %5364 = vmatpush3.bf16.msra.mxu0 %v5913_v5  ;;  %v4804_v5 = vld [vmem:[%s6421_s21 + $0x1c] sm:$0x1] }
 0x145   : > { %5365 = vmatprep.subr.bf16.mxu0 %v5914_v6 }
 0x148   : > { %5366 = vmatpush3.bf16.msra.mxu0 %v5914_v6  ;;  %v4806_v6 = vld [vmem:[%s6421_s21 + $0x24] sm:$0x1] }
 0x149   : > { %5367 = vmatprep.subr.bf16.mxu0 %v5915_v7  ;;  %v1997_v18 = vshll.u32 %v4806_v6, 16  ;;  %v4828_v6 = vld [vmem:[%s6847_s3] ss:$0 sm:$0xff] }
 0x14c   : > { %5368 = vmatpush3.bf16.msra.mxu0 %v5915_v7  ;;  %v4811_v7 = vld [vmem:[%s6421_s21 + $0x38] sm:$0xf] }
 0x14d   : > { %5377 = vmatprep.subr.bf16.mxu0 %v5917_v8  ;;  %v2030_v19 = vshrl.u32 %v4811_v7, 16 }
 0x14f   : > { %5370 = vmatmul.mubr.bf16.vlgmr.msra.gmra.mrb[0].mxu0 %v5918_v9  ;;  %v2007_v9 = vrot.slane %v2005_v61, 5  ;;  %v2032_v34 = vrot.slane %v2030_v19, 4  ;;  %v5943_v61 = vld [vmem:[#allocation8 + $0x58] sm:$0xff]  }
 0x150   : > { %5378 = vmatpush3.bf16.msra.mxu0 %v5917_v8  ;;  %5373 = vmatprep.mubr.bf16.mxu0 %v5924_v10  ;;  %v2004_v8 = vrot.slane %v2002_v60, 4  ;;  %v2018_v10 = vrot.slane %v2016_v62, 4  ;;  %v5944_v62 = vld [vmem:[#allocation8 + $0x60] sm:$0xff]  }
 0x151   : > { %5379 = vmatprep.subr.bf16.mxu0 %v5919_v11  ;;  %5431 = vmatprep.subr.bf16.mxu1 %v5943_v61 }
 0x152   : > { %v2008_v24 = vor.u32 %v2007_v9, %v2004_v8  ;;  %5432 = vmatpush3.bf16.msra.mxu1 %v5943_v61 }
 0x153   : > { %5433 = vmatprep.subr.bf16.mxu1 %v5944_v62 }
 0x154   : > { %5380 = vmatpush3.bf16.msra.mxu0 %v5919_v11  ;;  %v2021_v11 = vrot.slane %v2019_v63, 5  ;;  %v5945_v63 = vld [vmem:[#allocation8 + $0x68] sm:$0xff]  }
 0x155   : > { %5381 = vmatprep.subr.bf16.mxu0 %v5920_v12 }
 0x156   : > { %v2022_v26 = vor.u32 %v2021_v11, %v2018_v10  ;;  %5434 = vmatpush3.bf16.msra.mxu1 %v5944_v62 }
 0x157   : > { %5374 = vmatmul.mubr.bf16.gmra.mrb[4].mxu0 %v5926_v13  ;;  %v4808_v13 = vld [vmem:[%s6421_s21 + $0x2c] sm:$0x1]  ;;  %5435 = vmatprep.subr.bf16.mxu1 %v5945_v63 }
 0x158   : > { %5382 = vmatpush3.bf16.msra.mxu0 %v5920_v12  ;;  %5393 = vmatprep.mubr.bf16.mxu0 %v5928_v14  ;;  %v4813_v12 = vld [vmem:[%s6421_s21 + $0x40] sm:$0xf]  ;;  %v4810_v14 = vld [vmem:[%s6421_s21 + $0x34] sm:$0x1]  ;;  %v2023_v40 = vrot.slane %v2022_v26, 4 }
 0x159   : > { %5383 = vmatprep.subr.bf16.mxu0 %v5921_v15  ;;  %v2044_v21 = vshrl.u32 %v4813_v12, 16  ;;  %v2047_v22 = vshll.u32 %v4813_v12, 16  ;;  %v2025_v27 = vshll.u32 %v4810_v14, 16 }
 0x15a   : > { %5436 = vmatpush3.bf16.msra.mxu1 %v5945_v63  ;;  %v5951_v63 = vld [vmem:[#allocation8 + $0x8] sm:$0xff]  }
 0x15b   : > { %v2046_v36 = vrot.slane %v2044_v21, 4  ;;  %v2027_v41 = vrot.slane %v2025_v27, 5 }
 0x15c   : > { %5384 = vmatpush3.bf16.msra.mxu0 %v5921_v15  ;;  %v1980_v15 = vor.u32 %v1979_v2, %v1976_v1  ;;  %v5946_v1 = vld [vmem:[#allocation8 + $0x70] sm:$0xff]   ;;  %v5947_v2 = vld [vmem:[#allocation8 + $0x78] sm:$0xff]  }
 0x15d   : > { %5385 = vmatprep.subr.bf16.mxu0 %v5922_v16  ;;  %v2028_v51 = vsel %vm6446_vm2, %v2023_v40, %v2027_v41  ;;  %5437 = vmatprep.subr.bf16.mxu1 %v5946_v1 }
 0x15e   : > { %v1981_v29 = vrot.slane %v1980_v15, 4  ;;  %5438 = vmatpush3.bf16.msra.mxu1 %v5946_v1 }
 0x15f   : > { %5439 = vmatprep.subr.bf16.mxu1 %v5947_v2 }
 0x160   : > { %5386 = vmatpush3.bf16.msra.mxu0 %v5922_v16  ;;  %v1983_v16 = vshll.u32 %v4804_v5, 16 }
 0x161   : > { %5387 = vmatprep.subr.bf16.mxu0 %v5923_v17 }
 0x162   : > { %v1985_v30 = vrot.slane %v1983_v16, 5  ;;  %5440 = vmatpush3.bf16.msra.mxu1 %v5947_v2 }
 0x164   : > { %5388 = vmatpush3.bf16.msra.mxu0 %v5923_v17  ;;  %v1994_v17 = vor.u32 %v1993_v4, %v1990_v3  ;;  %v1986_v43 = vsel %vm6446_vm2, %v1981_v29, %v1985_v30  ;;  %v6557_v3 = vld [vmem:[#allocation8] sm:$0xff]   ;;  %v4827_v4 = vld [vmem:[%s6846_s2] ss:$0 sm:$0xff] }
 0x165   : > { %5389 = vmatprep.subr.bf16.mxu0 %v5925_v20  ;;  %5449 = vmatprep.subr.bf16.mxu1 %v6557_v3 }
 0x166   : > { %v1995_v31 = vrot.slane %v1994_v17, 4 }
 0x168   : > { %5390 = vmatpush3.bf16.msra.mxu0 %v5925_v20  ;;  %v2033_v20 = vshll.u32 %v4811_v7, 16 }
 0x169   : > { %5391 = vmatprep.subr.bf16.mxu0 %v5927_v25 }
 0x16a   : > { %v2035_v35 = vrot.slane %v2033_v20, 5 }
 0x16c   : > { %5392 = vmatpush3.bf16.msra.mxu0 %v5927_v25  ;;  %v2011_v25 = vshll.u32 %v4808_v13, 16  ;;  %v2036_v46 = vor.u32 %v2035_v35, %v2032_v34 }
 0x16d   : > { %5401 = vmatprep.subr.bf16.mxu0 %v5929_v32 }
 0x16e   : > { %v2037_v55 = vrot.slane %v2036_v46, 4 }
 0x16f   : > { %5394 = vmatmul.mubr.bf16.vlgmr.msra.gmra.mrb[0].mxu0 %v5930_v37  ;;  %v2049_v37 = vrot.slane %v2047_v22, 5 }
 0x170   : > { %5402 = vmatpush3.bf16.msra.mxu0 %v5929_v32  ;;  %5397 = vmatprep.mubr.bf16.mxu0 %v5936_v38  ;;  %v1999_v32 = vrot.slane %v1997_v18, 5  ;;  %v2009_v38 = vrot.slane %v2008_v24, 4 }
 0x171   : > { %5403 = vmatprep.subr.bf16.mxu0 %v5931_v39 }
 0x172   : > { %v2000_v45 = vsel %vm6446_vm2, %v1995_v31, %v1999_v32 }
 0x174   : > { %5404 = vmatpush3.bf16.msra.mxu0 %v5931_v39  ;;  %v2013_v39 = vrot.slane %v2011_v25, 5 }
 0x175   : > { %5405 = vmatprep.subr.bf16.mxu0 %v5932_v44 }
 0x176   : > { %v2014_v50 = vsel %vm6446_vm2, %v2009_v38, %v2013_v39 }
 0x177   : > { %5398 = vmatmul.mubr.bf16.gmra.mrb[4].mxu0 %v5937_v48  ;;  %v2050_v48 = vor.u32 %v2049_v37, %v2046_v36  ;;  %v4817_v54 = vcombine.low %v2014_v50, %v2028_v51 }
 0x178   : > { %5406 = vmatpush3.bf16.msra.mxu0 %v5932_v44  ;;  %5417 = vmatprep.mubr.bf16.mxu0 %v4815_v49  ;;  %v2039_v44 = vshll.u32 %v4812_v33, 16  ;;  %v2053_v49 = vshll.u32 %v4814_v42, 16 }
 0x179   : > { %5407 = vmatprep.subr.bf16.mxu0 %v5933_v52  ;;  %v2051_v56 = vrot.slane %v2050_v48, 4 }
 0x17a   : > { %v2041_v53 = vrot.slane %v2039_v44, 5  ;;  %v2055_v57 = vrot.slane %v2053_v49, 5 }
 0x17c   : > { %5408 = vmatpush3.bf16.msra.mxu0 %v5933_v52  ;;  %v4816_v52 = vcombine.low %v1986_v43, %v2000_v45  ;;  %v2042_v58 = vsel %vm6446_vm2, %v2037_v55, %v2041_v53 }
 0x17d   : > { %5409 = vmatprep.subr.bf16.mxu0 %v5934_v59 }
 0x180   : > { %5410 = vmatpush3.bf16.msra.mxu0 %v5934_v59  ;;  %v2056_v59 = vsel %vm6446_vm2, %v2051_v56, %v2055_v57 }
 0x181   : > { %5411 = vmatprep.subr.bf16.mxu0 %v5935_v0  ;;  %v4818_v60 = vcombine.low %v2042_v58, %v2056_v59 }
 0x184   : > { %5412 = vmatpush3.bf16.msra.mxu0 %v5935_v0  ;;  %v6187_v0 = vmov 0  }
 0x185   : > { %5413 = vmatprep.subr.bf16.mxu0 %v5938_v23  ;;  %2291 = vst [vmem:[#allocation2 + $0x28] sm:$0xf] %v6187_v0  ;;  %2281 = vst [vmem:[#allocation2] sm:$0xf] %v6187_v0 }
 0x186   : > { %2282 = vst [vmem:[#allocation2 + $0x4] sm:$0xf] %v6187_v0  ;;  %2283 = vst [vmem:[#allocation2 + $0x8] sm:$0xf] %v6187_v0 }
 0x187   : > { %2284 = vst [vmem:[#allocation2 + $0xc] sm:$0xf] %v6187_v0  ;;  %2285 = vst [vmem:[#allocation2 + $0x10] sm:$0xf] %v6187_v0 }
 0x188   : > { %5414 = vmatpush3.bf16.msra.mxu0 %v5938_v23  ;;  %2286 = vst [vmem:[#allocation2 + $0x14] sm:$0xf] %v6187_v0  ;;  %2287 = vst [vmem:[#allocation2 + $0x18] sm:$0xf] %v6187_v0 }
 0x189   : > { %5415 = vmatprep.subr.bf16.mxu0 %v5939_v28  ;;  %2288 = vst [vmem:[#allocation2 + $0x1c] sm:$0xf] %v6187_v0  ;;  %2289 = vst [vmem:[#allocation2 + $0x20] sm:$0xf] %v6187_v0 }
 0x18a   : > { %2290 = vst [vmem:[#allocation2 + $0x24] sm:$0xf] %v6187_v0  ;;  %2292 = vst [vmem:[#allocation2 + $0x2c] sm:$0xf] %v6187_v0 }
 0x18b   : > { %2293 = vst [vmem:[#allocation2 + $0x30] sm:$0xf] %v6187_v0  ;;  %2294 = vst [vmem:[#allocation2 + $0x34] sm:$0xf] %v6187_v0 }
 0x18c   : > { %5416 = vmatpush3.bf16.msra.mxu0 %v5939_v28  ;;  %2295 = vst [vmem:[#allocation2 + $0x38] sm:$0xf] %v6187_v0  ;;  %2296 = vst [vmem:[#allocation2 + $0x3c] sm:$0xf] %v6187_v0  ;;  %v2320_v42 = vld [vmem:[#allocation2] sm:$0x8] }
 0x18d   : > { %2297 = vst [vmem:[#allocation2 + $0x40] sm:$0xf] %v6187_v0  ;;  %2298 = vst [vmem:[#allocation2 + $0x44] sm:$0xf] %v6187_v0  ;;  %v2321_v31 = vld [vmem:[#allocation2 + $0x4] sm:$0xf] }
 0x18e   : > { %2299 = vst [vmem:[#allocation2 + $0x48] sm:$0xf] %v6187_v0  ;;  %2300 = vst [vmem:[#allocation2 + $0x4c] sm:$0xf] %v6187_v0  ;;  %v2345_v39 = vshrl.u32 %v2321_v31, 16  ;;  %v2340_v53 = vshrl.u32 %v2320_v42, 16 }
 0x18f   : > { %5418 = vmatmul.mubr.bf16.vlgmr.msra.gmra.mrb[0].mxu0 %v4816_v52  ;;  %2301 = vst [vmem:[#allocation2 + $0x50] sm:$0xf] %v6187_v0  ;;  %2302 = vst [vmem:[#allocation2 + $0x54] sm:$0xf] %v6187_v0  ;;  %v2322_v45 = vld [vmem:[#allocation2 + $0xc] sm:$0x8] }
 0x190   : > { %5421 = vmatprep.mubr.bf16.mxu0 %v4817_v54  ;;  %2303 = vst [vmem:[#allocation2 + $0x58] sm:$0xf] %v6187_v0  ;;  %2304 = vst [vmem:[#allocation2 + $0x5c] sm:$0xf] %v6187_v0  ;;  %v2347_v51 = vrot.slane %v2345_v39, 7  ;;  %v2348_v52 = vshll.u32 %v2321_v31, 16 }
 0x191   : > { %2305 = vst [vmem:[#allocation2 + $0x60] sm:$0xf] %v6187_v0  ;;  %2306 = vst [vmem:[#allocation2 + $0x64] sm:$0xf] %v6187_v0  ;;  %v2353_v57 = vshrl.u32 %v2322_v45, 16  ;;  %v4837_v2 = vrot.slane %v2340_v53, 11 }
 0x192   : > { %2307 = vst [vmem:[#allocation2 + $0x68] sm:$0xf] %v6187_v0  ;;  %2308 = vst [vmem:[#allocation2 + $0x6c] sm:$0xf] %v6187_v0 }
 0x193   : > { %2309 = vst [vmem:[#allocation2 + $0x70] sm:$0xf] %v6187_v0  ;;  %2310 = vst [vmem:[#allocation2 + $0x74] sm:$0xf] %v6187_v0  ;;  %v2350_v0 = vor.u32 %v2348_v52, %v2347_v51  ;;  %v2743_v52 = vld [vmem:[#allocation2 + $0x8] sm:$0x1] }
 0x197   : > { %5422 = vmatmul.mubr.bf16.gmra.mrb[4].mxu0 %v4818_v60 }
 0x262   : > { %v5419_v5 = vpop.f32.mrb[0].mxu0 }
 0x263   : > { %v2220_v7 = vmul.f32 %v5419_v5, %v4827_v4  ;;  %v2172_v8 = vpop.f32.mrb[1].mxu0  ;;  %v6011_v5 = vld [vmem:[#allocation8 + $0x1f0] sm:$0xff]  }
 0x264   : > { %v2218_v9 = vmul.f32 %v4827_v4, %v2172_v8  ;;  %v5420_v10 = vpop.f32.mrb[2].mxu0 }
 0x265   : > { %v2235_v11 = vadd.f32 %v4828_v6, %v2220_v7  ;;  %v2221_v12 = vmul.f32 %v5420_v10, %v4827_v4  ;;  %v2175_v13 = vpop.f32.mrb[3].mxu0  ;;  %v2351_v10 = vsel %vm6573_vm5, %v4837_v2, %v2350_v0 }
 0x266   : > { %v2233_v14 = vadd.f32 %v4828_v6, %v2218_v9  ;;  %v2219_v15 = vmul.f32 %v4827_v4, %v2175_v13 }
 0x267   : > { %v2243_v16 = vmax.f32 %v2235_v11, 0.0  ;;  %v2236_v17 = vadd.f32 %v4828_v6, %v2221_v12 }
 0x268   : > { %v2241_v18 = vmax.f32 %v2233_v14, 0.0  ;;  %v2234_v19 = vadd.f32 %v4828_v6, %v2219_v15  ;;  %v5955_v14 = vld [vmem:[#allocation8 + $0x18] sm:$0xff]  }
 0x269   : > { %v4986_v20 = vpack.c.bf16 %v2243_v16, %v2243_v16  ;;  %v2244_v21 = vmax.f32 %v2236_v17, 0.0  ;;  %v5956_v16 = vld [vmem:[#allocation8 + $0x20] sm:$0xff]   ;;  %v5957_v17 = vld [vmem:[#allocation8 + $0x28] sm:$0xff]  }
 0x26a   : > { %v4984_v22 = vpack.c.bf16 %v2241_v18, %v2241_v18  ;;  %v2242_v23 = vmax.f32 %v2234_v19, 0.0  ;;  %v5423_v24 = vpop.f32.mrb[4].mxu0  ;;  %v2742_v18 = vld [vmem:[#allocation2 + $0x4] sm:$0xf] }
 0x26b   : > { %2314 = vst [vmem:[#allocation2 + $0x28] sm:$0xf] %v4986_v20  ;;  %v4987_v25 = vpack.c.bf16 %v2244_v21, %v2244_v21  ;;  %v2224_v26 = vmul.f32 %v5423_v24, %v4827_v4  ;;  %v2188_v27 = vpop.f32.mrb[5].mxu0  ;;  %v2324_v20 = vld [vmem:[#allocation2 + $0x18] sm:$0x8] }
 0x26c   : > { %2312 = vst [vmem:[#allocation2 + $0x10] sm:$0xf] %v4984_v22  ;;  %v4985_v28 = vpack.c.bf16 %v2242_v23, %v2242_v23  ;;  %v2222_v29 = vmul.f32 %v4827_v4, %v2188_v27  ;;  %v5424_v30 = vpop.f32.mrb[6].mxu0  ;;  %v2330_v22 = vld [vmem:[#allocation2 + $0x3c] sm:$0x8] }
 0x26d   : > { %2315 = vst [vmem:[#allocation2 + $0x34] sm:$0xf] %v4987_v25  ;;  %v2239_v32 = vadd.f32 %v4828_v6, %v2224_v26  ;;  %v2225_v33 = vmul.f32 %v5424_v30, %v4827_v4  ;;  %v2191_v34 = vpop.f32.mrb[7].mxu0  ;;  %v2326_v24 = vld [vmem:[#allocation2 + $0x24] sm:$0x8]  ;;  %v2759_v26 = vshrl.u32 %v2742_v18, 16 }
 0x26e   : > { %2313 = vst [vmem:[#allocation2 + $0x1c] sm:$0xf] %v4985_v28  ;;  %v2237_v35 = vadd.f32 %v4828_v6, %v2222_v29  ;;  %v2223_v36 = vmul.f32 %v4827_v4, %v2191_v34  ;;  %v4838_v4 = vrot.slane %v2353_v57, 11  ;;  %v5958_v28 = vld [vmem:[#allocation8 + $0x30] sm:$0xff]   ;;  %v2366_v29 = vshrl.u32 %v2324_v20, 16 }
 0x26f   : > { %v2247_v37 = vmax.f32 %v2239_v32, 0.0  ;;  %v2240_v38 = vadd.f32 %v4828_v6, %v2225_v33  ;;  %v2328_v30 = vld [vmem:[#allocation2 + $0x30] sm:$0x8]  ;;  %v2405_v33 = vshrl.u32 %v2330_v22, 16 }
 0x270   : > { %v2245_v40 = vmax.f32 %v2237_v35, 0.0  ;;  %v2238_v41 = vadd.f32 %v4828_v6, %v2223_v36  ;;  %v5953_v6 = vld [vmem:[#allocation8 + $0x10] sm:$0xff]   ;;  %v2379_v35 = vshrl.u32 %v2326_v24, 16  ;;  %v4839_v45 = vrot.slane %v2366_v29, 11 }
 0x271   : > { %v4990_v43 = vpack.c.bf16 %v2247_v37, %v2247_v37  ;;  %v2248_v44 = vmax.f32 %v2240_v38, 0.0  ;;  %v4842_v51 = vrot.slane %v2405_v33, 11  ;;  %v5962_v29 = vld [vmem:[#allocation8 + $0x90] sm:$0xff]  }
 0x272   : > { %v4988_v46 = vpack.c.bf16 %v2245_v40, %v2245_v40  ;;  %v2246_v48 = vmax.f32 %v2238_v41, 0.0  ;;  %v6568_v59 = vld [vmem:[#allocation2 + $0x28] sm:$0xf]  ;;  %v2392_v40 = vshrl.u32 %v2328_v30, 16  ;;  %v2761_v41 = vrot.slane %v2759_v26, 4 }
 0x273   : > { %2318 = vst [vmem:[#allocation2 + $0x58] sm:$0xf] %v4990_v43  ;;  %v4991_v49 = vpack.c.bf16 %v2248_v44, %v2248_v44  ;;  %v2323_v50 = vld [vmem:[#allocation2 + $0x10] sm:$0xf]  ;;  %v2384_v23 = vshrl.u32 %v6568_v59, 16 }
 0x274   : > { %2316 = vst [vmem:[#allocation2 + $0x40] sm:$0xf] %v4988_v46  ;;  %v4989_v54 = vpack.c.bf16 %v2246_v48, %v2246_v48  ;;  %v2358_v55 = vshrl.u32 %v2323_v50, 16  ;;  %v4845_v56 = vcombine.low %v2321_v31, %v2323_v50  ;;  %v2361_v61 = vshll.u32 %v2323_v50, 16  ;;  %v6577_v7 = vld [vmem:[#allocation2 + $0x34] sm:$0xf] }
 0x275   : > { %2319 = vst [vmem:[#allocation2 + $0x64] sm:$0xf] %v4991_v49  ;;  %v6566_v58 = vld [vmem:[#allocation2 + $0x1c] sm:$0xf]  ;;  %v2744_v25 = vld [vmem:[#allocation2 + $0x10] sm:$0xf] }
 0x276   : > { %2317 = vst [vmem:[#allocation2 + $0x4c] sm:$0xf] %v4989_v54  ;;  %v2360_v60 = vrot.slane %v2358_v55, 7  ;;  %5441 = vmatprep.mubr.bf16.mxu1 %v4845_v56  ;;  %v4846_v62 = vcombine.low %v6566_v58, %v6568_v59  ;;  %v2371_v19 = vshrl.u32 %v6566_v58, 16  ;;  %v2397_v27 = vshrl.u32 %v6577_v7, 16  ;;  %v5959_v44 = vld [vmem:[#allocation8 + $0x38] sm:$0xff]  }
 0x277   : > { %v2762_v31 = vshll.u32 %v2742_v18, 16  ;;  %v2773_v36 = vshrl.u32 %v2744_v25, 16  ;;  %v2776_v37 = vshll.u32 %v2744_v25, 16  ;;  %v2374_v38 = vshll.u32 %v6566_v58, 16  ;;  %v2332_v55 = vld [vmem:[#allocation2 + $0x48] sm:$0x8] }
 0x278   : > { %v2363_v1 = vor.u32 %v2361_v61, %v2360_v60  ;;  %5442 = vmatmul.mubr.bf16.vlgmr.msra.gmra.mrb[0].mxu1 %v4846_v62  ;;  %v2373_v32 = vrot.slane %v2371_v19, 7  ;;  %v2386_v39 = vrot.slane %v2384_v23, 7  ;;  %v2399_v42 = vrot.slane %v2397_v27, 7  ;;  %v2745_v62 = vld [vmem:[#allocation2 + $0x14] sm:$0x1]  ;;  %v5961_v19 = vld [vmem:[#allocation8 + $0x88] sm:$0xff]  }
 0x279   : > { %5450 = vmatpush3.bf16.msra.mxu1 %v6557_v3  ;;  %v2764_v46 = vrot.slane %v2762_v31, 5  ;;  %v2387_v49 = vshll.u32 %v6568_v59, 16  ;;  %v2400_v53 = vshll.u32 %v6577_v7, 16  ;;  %v2775_v56 = vrot.slane %v2773_v36, 4  ;;  %v2746_v36 = vld [vmem:[#allocation2 + $0x1c] sm:$0xf] }
 0x27a   : > { %5451 = vmatprep.subr.bf16.mxu1 %v5951_v63  ;;  %v2364_v11 = vsel %vm6573_vm5, %v4838_v4, %v2363_v1  ;;  %v6586_v3 = vld [vmem:[#allocation2 + $0x58] sm:$0xf]  ;;  %v2376_v48 = vor.u32 %v2374_v38, %v2373_v32  ;;  %v2778_v57 = vrot.slane %v2776_v37, 5  ;;  %v4840_v61 = vrot.slane %v2379_v35, 11  ;;  %v2334_v1 = vld [vmem:[#allocation2 + $0x54] sm:$0x8] }
 0x27b   : > { %v2331_v8 = vld [vmem:[#allocation2 + $0x40] sm:$0xf]  ;;  %v4857_v15 = vcombine.low %v2351_v10, %v2364_v11  ;;  %v2389_v58 = vor.u32 %v2387_v49, %v2386_v39  ;;  %v2436_v60 = vshrl.u32 %v6586_v3, 16  ;;  %v4841_v0 = vrot.slane %v2392_v40, 11  ;;  %v5964_v38 = vld [vmem:[#allocation8 + $0xa0] sm:$0xff]  }
 0x27c   : > { %v4847_v9 = vcombine.low %v6577_v7, %v2331_v8  ;;  %v2410_v21 = vshrl.u32 %v2331_v8, 16  ;;  %v2413_v43 = vshll.u32 %v2331_v8, 16  ;;  %v2402_v59 = vor.u32 %v2400_v53, %v2399_v42  ;;  %v2752_v37 = vld [vmem:[#allocation2 + $0x40] sm:$0xf]  ;;  %v2748_v39 = vld [vmem:[#allocation2 + $0x28] sm:$0xf] }
 0x27d   : > { %5452 = vmatpush3.bf16.msra.mxu1 %v5951_v63  ;;  %v6584_v12 = vld [vmem:[#allocation2 + $0x4c] sm:$0xf]  ;;  %v5960_v63 = vld [vmem:[#allocation8 + $0x80] sm:$0xff]   ;;  %v2377_v4 = vsel %vm6573_vm5, %v4839_v45, %v2376_v48  ;;  %v2768_v7 = vshll.u32 %v2743_v52, 16  ;;  %v2779_v10 = vor.u32 %v2778_v57, %v2775_v56  ;;  %v2782_v11 = vshll.u32 %v2745_v62, 16  ;;  %v5965_v48 = vld [vmem:[#allocation8 + $0xa8] sm:$0xff]  }
 0x27e   : > { %5445 = vmatprep.mubr.bf16.mxu1 %v4847_v9  ;;  %5453 = vmatprep.subr.bf16.mxu1 %v5953_v6  ;;  %v4848_v13 = vcombine.low %v6584_v12, %v6586_v3  ;;  %v2412_v34 = vrot.slane %v2410_v21, 7  ;;  %v2423_v50 = vshrl.u32 %v6584_v12, 16  ;;  %v2765_v9 = vor.u32 %v2764_v46, %v2761_v41  ;;  %v2750_v42 = vld [vmem:[#allocation2 + $0x34] sm:$0xf]  ;;  %v2747_v53 = vld [vmem:[#allocation2 + $0x20] sm:$0x1] }
 0x27f   : > { %v2403_v18 = vsel %vm6573_vm5, %v4841_v0, %v2402_v59  ;;  %v2439_v20 = vshll.u32 %v6586_v3, 16  ;;  %v2780_v25 = vrot.slane %v2779_v10, 4  ;;  %v2784_v26 = vrot.slane %v2782_v11, 5  ;;  %v2754_v56 = vld [vmem:[#allocation2 + $0x4c] sm:$0xf] }
 0x280   : > { %5446 = vmatmul.mubr.bf16.gmra.mrb[4].mxu1 %v4848_v13  ;;  %v2415_v54 = vor.u32 %v2413_v43, %v2412_v34  ;;  %v2425_v2 = vrot.slane %v2423_v50, 7  ;;  %v2426_v13 = vshll.u32 %v6584_v12, 16  ;;  %v2766_v24 = vrot.slane %v2765_v9, 4  ;;  %v5963_v34 = vld [vmem:[#allocation8 + $0x98] sm:$0xff]   ;;  %v2749_v57 = vld [vmem:[#allocation2 + $0x2c] sm:$0x1] }
 0x281   : > { %5454 = vmatpush3.bf16.msra.mxu1 %v5953_v6  ;;  %5465 = vmatprep.mubr.bf16.mxu1 %v4857_v15  ;;  %v2418_v6 = vshrl.u32 %v2332_v55, 16  ;;  %v2390_v15 = vsel %vm6573_vm5, %v4840_v61, %v2389_v58  ;;  %v2770_v12 = vrot.slane %v2768_v7, 5  ;;  %v2785_v31 = vsel %vm6446_vm2, %v2780_v25, %v2784_v26  ;;  %v2753_v61 = vld [vmem:[#allocation2 + $0x44] sm:$0x1]  ;;  %v5966_v62 = vld [vmem:[#allocation8 + $0xb0] sm:$0xff]  }
 0x282   : > { %5455 = vmatprep.subr.bf16.mxu1 %v5955_v14  ;;  %v2416_v8 = vsel %vm6573_vm5, %v4842_v51, %v2415_v54  ;;  %v2428_v23 = vor.u32 %v2426_v13, %v2425_v2  ;;  %v2787_v40 = vshrl.u32 %v2746_v36, 16  ;;  %v2790_v41 = vshll.u32 %v2746_v36, 16  ;;  %v2756_v59 = vld [vmem:[#allocation2 + $0x58] sm:$0xf]  ;;  %v2755_v25 = vld [vmem:[#allocation2 + $0x50] sm:$0x1] }
 0x283   : > { %v4859_v21 = vcombine.low %v2403_v18, %v2416_v8  ;;  %v4843_v22 = vrot.slane %v2418_v6, 11  ;;  %v2771_v3 = vsel %vm6446_vm2, %v2766_v24, %v2770_v12  ;;  %v2829_v43 = vshrl.u32 %v2752_v37, 16  ;;  %v3024_v26 = vld [vmem:[#allocation2 + $0xc] sm:$0x8] }
 0x284   : > { %v4869_v35 = vcombine.low %v2771_v3, %v2785_v31  ;;  %v2801_v45 = vshrl.u32 %v2748_v39, 16  ;;  %v2804_v46 = vshll.u32 %v2748_v39, 16  ;;  %v2815_v49 = vshrl.u32 %v2750_v42, 16  ;;  %v3026_v31 = vld [vmem:[#allocation2 + $0x18] sm:$0x8] }
 0x285   : > { %5456 = vmatpush3.bf16.msra.mxu1 %v5955_v14  ;;  %v2438_v14 = vrot.slane %v2436_v60, 7  ;;  %v2429_v30 = vsel %vm6573_vm5, %v4843_v22, %v2428_v23  ;;  %v2818_v50 = vshll.u32 %v2750_v42, 16  ;;  %v2789_v51 = vrot.slane %v2787_v40, 4  ;;  %v6618_v23 = vld [vmem:[#allocation2 + $0x10] sm:$0xf] }
 0x286   : > { %5457 = vmatprep.subr.bf16.mxu1 %v5956_v16  ;;  %v2792_v52 = vrot.slane %v2790_v41, 5  ;;  %v2831_v54 = vrot.slane %v2829_v43, 4  ;;  %v2803_v58 = vrot.slane %v2801_v45, 4  ;;  %v2806_v60 = vrot.slane %v2804_v46, 5 }
 0x287   : > { %v2820_v0 = vrot.slane %v2818_v50, 5  ;;  %v2796_v2 = vshll.u32 %v2747_v53, 16  ;;  %v2843_v6 = vshrl.u32 %v2754_v56, 16  ;;  %v2846_v7 = vshll.u32 %v2754_v56, 16  ;;  %v5969_v50 = vld [vmem:[#allocation8 + $0xc8] sm:$0xff]  }
 0x288   : > { %v2838_v9 = vshll.u32 %v2753_v61, 16  ;;  %v2807_v10 = vor.u32 %v2806_v60, %v2803_v58  ;;  %v2810_v11 = vshll.u32 %v2749_v57, 16  ;;  %v2857_v13 = vshrl.u32 %v2756_v59, 16 }
 0x289   : > { %5458 = vmatpush3.bf16.msra.mxu1 %v5956_v16  ;;  %v2431_v16 = vshrl.u32 %v2334_v1, 16  ;;  %v2793_v1 = vor.u32 %v2792_v52, %v2789_v51  ;;  %v2848_v22 = vrot.slane %v2846_v7, 5  ;;  %v3046_v36 = vshrl.u32 %v6618_v23, 16  ;;  %v5971_v7 = vld [vmem:[#allocation8 + $0xd8] sm:$0xff]  }
 0x28a   : > { %5459 = vmatprep.subr.bf16.mxu1 %v5957_v17  ;;  %v2840_v12 = vrot.slane %v2838_v9, 5  ;;  %v2852_v39 = vshll.u32 %v2755_v25, 16  ;;  %v3054_v41 = vshrl.u32 %v3026_v31, 16  ;;  %v3041_v46 = vshrl.u32 %v3024_v26, 16  ;;  %v5972_v9 = vld [vmem:[#allocation8 + $0xe0] sm:$0xff]  }
 0x28b   : > { %v4844_v27 = vrot.slane %v2431_v16, 11  ;;  %v5967_v16 = vld [vmem:[#allocation8 + $0xb8] sm:$0xff]   ;;  %v3048_v51 = vrot.slane %v3046_v36, 7  ;;  %v3049_v56 = vshll.u32 %v6618_v23, 16 }
 0x28c   : > { %v4882_v57 = vrot.slane %v3054_v41, 11 }
 0x28d   : > { %5460 = vmatpush3.bf16.msra.mxu1 %v5957_v17  ;;  %v4858_v17 = vcombine.low %v2377_v4, %v2390_v15  ;;  %v2751_v4 = vld [vmem:[#allocation2 + $0x38] sm:$0x1]  ;;  %v6616_v15 = vld [vmem:[#allocation2 + $0x1c] sm:$0xf] }
 0x28e   : > { %5461 = vmatprep.subr.bf16.mxu1 %v5958_v28  ;;  %v2824_v18 = vshll.u32 %v2751_v4, 16  ;;  %v3062_v52 = vshll.u32 %v6616_v15, 16 }
 0x291   : > { %5462 = vmatpush3.bf16.msra.mxu1 %v5958_v28  ;;  %v2441_v28 = vor.u32 %v2439_v20, %v2438_v14  ;;  %v2860_v14 = vshll.u32 %v2756_v59, 16  ;;  %v2798_v20 = vrot.slane %v2796_v2, 5 }
 0x292   : > { %5463 = vmatprep.subr.bf16.mxu1 %v5959_v44 }
 0x293   : > { %v2442_v32 = vsel %vm6573_vm5, %v4844_v27, %v2441_v28  ;;  %v3059_v27 = vshrl.u32 %v6616_v15, 16  ;;  %v2808_v28 = vrot.slane %v2807_v10, 4  ;;  %v2862_v3 = vrot.slane %v2860_v14, 5  ;;  %v6640_v10 = vld [vmem:[#allocation2 + $0x34] sm:$0xf] }
 0x294   : > { %v4860_v33 = vcombine.low %v2429_v30, %v2442_v32  ;;  %v2859_v30 = vrot.slane %v2857_v13, 4  ;;  %v5968_v32 = vld [vmem:[#allocation8 + $0xc0] sm:$0xff]   ;;  %v5973_v13 = vld [vmem:[#allocation8 + $0xe8] sm:$0xff]   ;;  %v6644_v14 = vld [vmem:[#allocation2 + $0x28] sm:$0xf] }
 0x295   : > { %5464 = vmatpush3.bf16.msra.mxu1 %v5959_v44  ;;  %v2832_v44 = vshll.u32 %v2752_v37, 16  ;;  %v3061_v42 = vrot.slane %v3059_v27, 7  ;;  %v3032_v27 = vld [vmem:[#allocation2 + $0x3c] sm:$0x8] }
 0x296   : > { %5473 = vmatprep.subr.bf16.mxu1 %v5960_v63 }
 0x297   : > { %v2834_v55 = vrot.slane %v2832_v44, 5  ;;  %v2863_v44 = vor.u32 %v2862_v3, %v2859_v30  ;;  %v3064_v58 = vor.u32 %v3062_v52, %v3061_v42  ;;  %v6652_v30 = vld [vmem:[#allocation2 + $0x64] sm:$0xf] }
 0x298   : > { %5466 = vmatmul.mubr.bf16.vlgmr.msra.gmra.mrb[0].mxu1 %v4858_v17  ;;  %v3137_v41 = vshrl.u32 %v6652_v30, 16 }
 0x299   : > { %5469 = vmatprep.mubr.bf16.mxu1 %v4859_v21  ;;  %5474 = vmatpush3.bf16.msra.mxu1 %v5960_v63  ;;  %v2817_v63 = vrot.slane %v2815_v49, 4  ;;  %v2835_v8 = vor.u32 %v2834_v55, %v2831_v54  ;;  %v2845_v21 = vrot.slane %v2843_v6, 4  ;;  %v2854_v55 = vrot.slane %v2852_v39, 5 }
 0x29a   : > { %5475 = vmatprep.subr.bf16.mxu1 %v5961_v19  ;;  %v2864_v60 = vrot.slane %v2863_v44, 4 }
 0x29b   : > { %v2821_v17 = vor.u32 %v2820_v0, %v2817_v63  ;;  %v2836_v24 = vrot.slane %v2835_v8, 4  ;;  %v4881_v63 = vrot.slane %v3041_v46, 11  ;;  %v3051_v0 = vor.u32 %v3049_v56, %v3048_v51 }
 0x29c   : > { %v3139_v56 = vrot.slane %v3137_v41, 7 }
 0x29d   : > { %5476 = vmatpush3.bf16.msra.mxu1 %v5961_v19  ;;  %v2794_v19 = vrot.slane %v2793_v1, 4  ;;  %v2841_v40 = vsel %vm6446_vm2, %v2836_v24, %v2840_v12  ;;  %v3065_v1 = vsel %vm6573_vm5, %v4882_v57, %v3064_v58  ;;  %v3052_v6 = vsel %vm6573_vm5, %v4881_v63, %v3051_v0  ;;  %v3028_v24 = vld [vmem:[#allocation2 + $0x24] sm:$0x8] }
 0x29e   : > { %5477 = vmatprep.subr.bf16.mxu1 %v5962_v29  ;;  %v4889_v8 = vcombine.low %v3052_v6, %v3065_v1  ;;  %v3067_v3 = vshrl.u32 %v3028_v24, 16  ;;  %v3462_v24 = vld [vmem:[#allocation2 + $0x1c] sm:$0xf] }
 0x29f   : > { %v2799_v37 = vsel %vm6446_vm2, %v2794_v19, %v2798_v20  ;;  %v3072_v20 = vshrl.u32 %v6644_v14, 16 }
 0x2a0   : > { %5470 = vmatmul.mubr.bf16.gmra.mrb[4].mxu1 %v4860_v33  ;;  %v2822_v33 = vrot.slane %v2821_v17, 4  ;;  %v6647_v17 = vld [vmem:[#allocation2 + $0x40] sm:$0xf]  ;;  %v4883_v46 = vrot.slane %v3067_v3, 11 }
 0x2a1   : > { %5478 = vmatpush3.bf16.msra.mxu1 %v5962_v29  ;;  %5489 = vmatprep.mubr.bf16.mxu1 %v4869_v35  ;;  %v2812_v29 = vrot.slane %v2810_v11, 5  ;;  %v2757_v35 = vld [vmem:[#allocation2 + $0x5c] sm:$0x1]  ;;  %v6642_v11 = vld [vmem:[#allocation2 + $0x4c] sm:$0xf]  ;;  %v3098_v12 = vshrl.u32 %v6647_v17, 16 }
 0x2a2   : > { %5479 = vmatprep.subr.bf16.mxu1 %v5963_v34  ;;  %v2866_v45 = vshll.u32 %v2757_v35, 16  ;;  %v3111_v19 = vshrl.u32 %v6642_v11, 16  ;;  %v3074_v31 = vrot.slane %v3072_v20, 7  ;;  %v3114_v36 = vshll.u32 %v6642_v11, 16 }
 0x2a3   : > { %v2813_v43 = vsel %vm6446_vm2, %v2808_v28, %v2812_v29  ;;  %v3100_v35 = vrot.slane %v3098_v12, 7  ;;  %v3101_v42 = vshll.u32 %v6647_v17, 16  ;;  %v4901_v20 = vcombine.low %v6618_v23, %v6616_v15  ;;  %v5983_v12 = vld [vmem:[#allocation8 + $0x130] sm:$0xff]  }
 0x2a4   : > { %v2868_v61 = vrot.slane %v2866_v45, 5  ;;  %v3113_v29 = vrot.slane %v3111_v19, 7  ;;  %v3038_v45 = vld [vmem:[#allocation2 + $0x60] sm:$0x8]  ;;  %v5980_v19 = vld [vmem:[#allocation8 + $0x118] sm:$0xff]  }
 0x2a5   : > { %5480 = vmatpush3.bf16.msra.mxu1 %v5963_v34  ;;  %v2826_v34 = vrot.slane %v2824_v18, 5  ;;  %v3030_v18 = vld [vmem:[#allocation2 + $0x30] sm:$0x8]  ;;  %v3103_v52 = vor.u32 %v3101_v42, %v3100_v35  ;;  %v3461_v35 = vld [vmem:[#allocation2 + $0x14] sm:$0x1] }
 0x2a6   : > { %5481 = vmatprep.subr.bf16.mxu1 %v5964_v38  ;;  %v2869_v2 = vsel %vm6446_vm2, %v2864_v60, %v2868_v61  ;;  %v3080_v25 = vshrl.u32 %v3030_v18, 16  ;;  %v3116_v44 = vor.u32 %v3114_v36, %v3113_v29  ;;  %v3486_v42 = vshll.u32 %v3461_v35, 16 }
 0x2a7   : > { %v2827_v49 = vsel %vm6446_vm2, %v2822_v33, %v2826_v34  ;;  %v5975_v33 = vld [vmem:[#allocation8 + $0xf8] sm:$0xff]   ;;  %v3093_v34 = vshrl.u32 %v3032_v27, 16  ;;  %v3494_v27 = vshll.u32 %v3462_v24, 16 }
 0x2a8   : > { %v4871_v53 = vcombine.low %v2827_v49, %v2841_v40  ;;  %v4884_v39 = vrot.slane %v3080_v25, 11  ;;  %v3460_v25 = vld [vmem:[#allocation2 + $0x10] sm:$0xf] }
 0x2a9   : > { %5482 = vmatpush3.bf16.msra.mxu1 %v5964_v38  ;;  %v2849_v38 = vor.u32 %v2848_v22, %v2845_v21  ;;  %v3034_v21 = vld [vmem:[#allocation2 + $0x48] sm:$0x8]  ;;  %v4885_v51 = vrot.slane %v3093_v34, 11  ;;  %v3477_v29 = vshrl.u32 %v3460_v25, 16  ;;  %v3480_v15 = vshll.u32 %v3460_v25, 16 }
 0x2aa   : > { %5483 = vmatprep.subr.bf16.mxu1 %v5965_v48  ;;  %v5974_v22 = vld [vmem:[#allocation8 + $0xf0] sm:$0xff]   ;;  %v3106_v28 = vshrl.u32 %v3034_v21, 16  ;;  %v5981_v21 = vld [vmem:[#allocation8 + $0x120] sm:$0xff]   ;;  %v3496_v3 = vrot.slane %v3494_v27, 5 }
 0x2ab   : > { %v2850_v54 = vrot.slane %v2849_v38, 4  ;;  %v3075_v38 = vshll.u32 %v6644_v14, 16  ;;  %v3104_v0 = vsel %vm6573_vm5, %v4885_v51, %v3103_v52  ;;  %v3482_v34 = vrot.slane %v3480_v15, 5  ;;  %v3466_v51 = vld [vmem:[#allocation2 + $0x34] sm:$0xf] }
 0x2ac   : > { %v3470_v52 = vld [vmem:[#allocation2 + $0x4c] sm:$0xf] }
 0x2ad   : > { %5484 = vmatpush3.bf16.msra.mxu1 %v5965_v48  ;;  %v4870_v48 = vcombine.low %v2799_v37, %v2813_v43  ;;  %v2855_v59 = vsel %vm6446_vm2, %v2850_v54, %v2854_v55  ;;  %v6656_v37 = vld [vmem:[#allocation2 + $0x58] sm:$0xf]  ;;  %v4886_v43 = vrot.slane %v3106_v28, 11  ;;  %v3132_v55 = vshrl.u32 %v3038_v45, 16  ;;  %v5984_v28 = vld [vmem:[#allocation8 + $0x138] sm:$0xff]  }
 0x2ae   : > { %5485 = vmatprep.subr.bf16.mxu1 %v5966_v62  ;;  %v4872_v4 = vcombine.low %v2855_v59, %v2869_v2  ;;  %v3124_v49 = vshrl.u32 %v6656_v37, 16  ;;  %v5977_v59 = vld [vmem:[#allocation8 + $0x108] sm:$0xff]   ;;  %v3127_v2 = vshll.u32 %v6656_v37, 16 }
 0x2af   : > { %v3117_v57 = vsel %vm6573_vm5, %v4886_v43, %v3116_v44  ;;  %v4903_v43 = vcombine.low %v6647_v17, %v6642_v11 }
 0x2b0   : > { %v3126_v61 = vrot.slane %v3124_v49, 7  ;;  %v4891_v1 = vcombine.low %v3104_v0, %v3117_v57  ;;  %v3488_v49 = vrot.slane %v3486_v42, 5  ;;  %v3468_v57 = vld [vmem:[#allocation2 + $0x40] sm:$0xf]  ;;  %v3475_v42 = vld [vmem:[#allocation2 + $0x68] sm:$0x1] }
 0x2b1   : > { %5486 = vmatpush3.bf16.msra.mxu1 %v5966_v62  ;;  %v5970_v62 = vld [vmem:[#allocation8 + $0xd0] sm:$0xff]  }
 0x2b2   : > { %5487 = vmatprep.subr.bf16.mxu1 %v5967_v16 }
 0x2b5   : > { %5488 = vmatpush3.bf16.msra.mxu1 %v5967_v16  ;;  %v3085_v16 = vshrl.u32 %v6640_v10, 16 }
 0x2b6   : > { %5497 = vmatprep.subr.bf16.mxu1 %v5968_v32 }
 0x2b7   : > { %v3087_v26 = vrot.slane %v3085_v16, 7 }
 0x2b8   : > { %5490 = vmatmul.mubr.bf16.vlgmr.msra.gmra.mrb[0].mxu1 %v4870_v48  ;;  %v3077_v48 = vor.u32 %v3075_v38, %v3074_v31  ;;  %v3463_v31 = vld [vmem:[#allocation2 + $0x20] sm:$0x1] }
 0x2b9   : > { %5493 = vmatprep.mubr.bf16.mxu1 %v4871_v53  ;;  %5498 = vmatpush3.bf16.msra.mxu1 %v5968_v32  ;;  %v3088_v32 = vshll.u32 %v6640_v10, 16  ;;  %v3036_v53 = vld [vmem:[#allocation2 + $0x54] sm:$0x8]  ;;  %v3500_v38 = vshll.u32 %v3463_v31, 16 }
 0x2ba   : > { %5499 = vmatprep.subr.bf16.mxu1 %v5969_v50  ;;  %v3078_v58 = vsel %vm6573_vm5, %v4883_v46, %v3077_v48  ;;  %v3119_v60 = vshrl.u32 %v3036_v53, 16  ;;  %v5990_v46 = vld [vmem:[#allocation8 + $0x150] sm:$0xff]   ;;  %v5992_v53 = vld [vmem:[#allocation8 + $0x160] sm:$0xff]   ;;  %v5995_v31 = vld [vmem:[#allocation8 + $0x178] sm:$0xff]  }
 0x2bb   : > { %v3090_v40 = vor.u32 %v3088_v32, %v3087_v26  ;;  %v3491_v26 = vshrl.u32 %v3462_v24, 16  ;;  %v5986_v32 = vld [vmem:[#allocation8 + $0x140] sm:$0xff]   ;;  %v3502_v45 = vrot.slane %v3500_v38, 5  ;;  %v3469_v24 = vld [vmem:[#allocation2 + $0x44] sm:$0x1] }
 0x2bd   : > { %5500 = vmatpush3.bf16.msra.mxu1 %v5969_v50  ;;  %v5976_v50 = vld [vmem:[#allocation8 + $0x100] sm:$0xff]   ;;  %v3091_v54 = vsel %vm6573_vm5, %v4884_v39, %v3090_v40  ;;  %v3493_v23 = vrot.slane %v3491_v26, 4  ;;  %v4902_v39 = vcombine.low %v6644_v14, %v6640_v10  ;;  %v5988_v40 = vld [vmem:[#allocation8 + $0x148] sm:$0xff]   ;;  %v4904_v10 = vcombine.low %v6656_v37, %v6652_v30  ;;  %v5991_v14 = vld [vmem:[#allocation8 + $0x158] sm:$0xff]  }
 0x2be   : > { %5501 = vmatprep.subr.bf16.mxu1 %v5970_v62  ;;  %v4890_v63 = vcombine.low %v3078_v58, %v3091_v54  ;;  %v3464_v54 = vld [vmem:[#allocation2 + $0x28] sm:$0xf]  ;;  %v3547_v58 = vshrl.u32 %v3470_v52, 16 }
 0x2bf   : > { %v3497_v36 = vor.u32 %v3496_v3, %v3493_v23  ;;  %v3508_v37 = vshll.u32 %v3464_v54, 16  ;;  %v6688_v3 = vld [vmem:[#allocation2 + $0x1c] sm:$0xf] }
 0x2c0   : > { %5494 = vmatmul.mubr.bf16.gmra.mrb[4].mxu1 %v4872_v4  ;;  %v4888_v4 = vrot.slane %v3132_v55, 11  ;;  %v3519_v55 = vshrl.u32 %v3466_v51, 16 }
 0x2c1   : > { %5502 = vmatpush3.bf16.msra.mxu1 %v5970_v62  ;;  %5513 = vmatprep.mubr.bf16.mxu1 %v4889_v8  ;;  %v3140_v62 = vshll.u32 %v6652_v30, 16  ;;  %v3129_v8 = vor.u32 %v3127_v2, %v3126_v61  ;;  %v3498_v44 = vrot.slane %v3497_v36, 4  ;;  %v3505_v30 = vshrl.u32 %v3464_v54, 16  ;;  %v5993_v61 = vld [vmem:[#allocation8 + $0x168] sm:$0xff]  }
 0x2c2   : > { %5503 = vmatprep.subr.bf16.mxu1 %v5971_v7  ;;  %v3521_v0 = vrot.slane %v3519_v55, 4  ;;  %v3549_v2 = vrot.slane %v3547_v58, 4  ;;  %v3584_v54 = vshll.u32 %v3475_v42, 16 }
 0x2c3   : > { %v3142_v6 = vor.u32 %v3140_v62, %v3139_v56  ;;  %v3522_v56 = vshll.u32 %v3466_v51, 16  ;;  %v3533_v62 = vshrl.u32 %v3468_v57, 16 }
 0x2c5   : > { %5504 = vmatpush3.bf16.msra.mxu1 %v5971_v7  ;;  %v4887_v7 = vrot.slane %v3119_v60, 11  ;;  %v3550_v60 = vshll.u32 %v3470_v52, 16 }
 0x2c6   : > { %5505 = vmatprep.subr.bf16.mxu1 %v5972_v9 }
 0x2c7   : > { %v3130_v16 = vsel %vm6573_vm5, %v4887_v7, %v3129_v8  ;;  %v3465_v7 = vld [vmem:[#allocation2 + $0x2c] sm:$0x1]  ;;  %v3507_v8 = vrot.slane %v3505_v30, 4 }
 0x2c9   : > { %5506 = vmatpush3.bf16.msra.mxu1 %v5972_v9  ;;  %v5978_v9 = vld [vmem:[#allocation8 + $0x110] sm:$0xff]  }
 0x2ca   : > { %5507 = vmatprep.subr.bf16.mxu1 %v5973_v13 }
 0x2cd   : > { %5508 = vmatpush3.bf16.msra.mxu1 %v5973_v13  ;;  %v3143_v13 = vsel %vm6573_vm5, %v4888_v4, %v3142_v6  ;;  %v3552_v4 = vrot.slane %v3550_v60, 5  ;;  %v3474_v6 = vld [vmem:[#allocation2 + $0x64] sm:$0xf] }
 0x2ce   : > { %5509 = vmatprep.subr.bf16.mxu1 %v5974_v22  ;;  %v4892_v18 = vcombine.low %v3130_v16, %v3143_v13  ;;  %v3471_v13 = vld [vmem:[#allocation2 + $0x50] sm:$0x1]  ;;  %v5994_v16 = vld [vmem:[#allocation8 + $0x170] sm:$0xff]   ;;  %v3578_v25 = vshll.u32 %v3474_v6, 16 }
 0x2cf   : > { %v3553_v26 = vor.u32 %v3552_v4, %v3549_v2  ;;  %v3556_v27 = vshll.u32 %v3471_v13, 16  ;;  %v3586_v4 = vrot.slane %v3584_v54, 5 }
 0x2d0   : > { %v3580_v38 = vrot.slane %v3578_v25, 5  ;;  %v5999_v25 = vld [vmem:[#allocation8 + $0x198] sm:$0xff]  }
 0x2d1   : > { %5510 = vmatpush3.bf16.msra.mxu1 %v5974_v22  ;;  %v5982_v22 = vld [vmem:[#allocation8 + $0x128] sm:$0xff]  }
 0x2d2   : > { %5511 = vmatprep.subr.bf16.mxu1 %v5975_v33 }
 0x2d5   : > { %5512 = vmatpush3.bf16.msra.mxu1 %v5975_v33  ;;  %v3479_v33 = vrot.slane %v3477_v29, 4  ;;  %v3514_v29 = vshll.u32 %v3465_v7, 16 }
 0x2d6   : > { %5521 = vmatprep.subr.bf16.mxu1 %v5976_v50 }
 0x2d7   : > { %v3483_v41 = vor.u32 %v3482_v34, %v3479_v33  ;;  %v3542_v33 = vshll.u32 %v3469_v24, 16 }
 0x2d8   : > { %5514 = vmatmul.mubr.bf16.vlgmr.msra.gmra.mrb[0].mxu1 %v4890_v63  ;;  %v3536_v63 = vshll.u32 %v3468_v57, 16 }
 0x2d9   : > { %5517 = vmatprep.mubr.bf16.mxu1 %v4891_v1  ;;  %5522 = vmatpush3.bf16.msra.mxu1 %v5976_v50  ;;  %v3484_v48 = vrot.slane %v3483_v41, 4  ;;  %v3503_v50 = vsel %vm6446_vm2, %v3498_v44, %v3502_v45  ;;  %v3467_v1 = vld [vmem:[#allocation2 + $0x38] sm:$0x1]  ;;  %v3558_v41 = vrot.slane %v3556_v27, 5  ;;  %v3765_v44 = vshrl.u32 %v6688_v3, 16 }
 0x2da   : > { %5523 = vmatprep.subr.bf16.mxu1 %v5977_v59  ;;  %v6000_v27 = vld [vmem:[#allocation8 + $0x1a0] sm:$0xff]  }
 0x2db   : > { %v3489_v11 = vsel %vm6446_vm2, %v3484_v48, %v3488_v49  ;;  %v3767_v57 = vrot.slane %v3765_v44, 7 }
 0x2dc   : > { %v4913_v17 = vcombine.low %v3489_v11, %v3503_v50  ;;  %v3743_v50 = vld [vmem:[#allocation2 + $0x18] sm:$0x8] }
 0x2dd   : > { %5524 = vmatpush3.bf16.msra.mxu1 %v5977_v59  ;;  %v3524_v59 = vrot.slane %v3522_v56, 5  ;;  %v3760_v56 = vshrl.u32 %v3743_v50, 16 }
 0x2de   : > { %5525 = vmatprep.subr.bf16.mxu1 %v5978_v9 }
 0x2e0   : > { %5518 = vmatmul.mubr.bf16.gmra.mrb[4].mxu1 %v4892_v18  ;;  %v3535_v18 = vrot.slane %v3533_v62, 4 }
 0x2e1   : > { %5526 = vmatpush3.bf16.msra.mxu1 %v5978_v9  ;;  %5537 = vmatprep.mubr.bf16.mxu1 %v4901_v20  ;;  %v3510_v9 = vrot.slane %v3508_v37, 5  ;;  %v3472_v20 = vld [vmem:[#allocation2 + $0x58] sm:$0xf] }
 0x2e2   : > { %5527 = vmatprep.subr.bf16.mxu1 %v5980_v19  ;;  %v3561_v15 = vshrl.u32 %v3472_v20, 16  ;;  %v3564_v23 = vshll.u32 %v3472_v20, 16 }
 0x2e4   : > { %v3563_v48 = vrot.slane %v3561_v15, 4  ;;  %v3566_v49 = vrot.slane %v3564_v23, 5  ;;  %v6001_v15 = vld [vmem:[#allocation8 + $0x1a8] sm:$0xff]   ;;  %v6716_v23 = vld [vmem:[#allocation2 + $0x34] sm:$0xf] }
 0x2e5   : > { %5528 = vmatpush3.bf16.msra.mxu1 %v5980_v19  ;;  %v3538_v19 = vrot.slane %v3536_v63, 5  ;;  %v5997_v63 = vld [vmem:[#allocation8 + $0x188] sm:$0xff]  }
 0x2e6   : > { %5529 = vmatprep.subr.bf16.mxu1 %v5981_v21  ;;  %v3567_v60 = vor.u32 %v3566_v49, %v3563_v48  ;;  %v6726_v49 = vld [vmem:[#allocation2 + $0x64] sm:$0xf] }
 0x2e9   : > { %5530 = vmatpush3.bf16.msra.mxu1 %v5981_v21  ;;  %v3525_v21 = vor.u32 %v3524_v59, %v3521_v0  ;;  %v3768_v0 = vshll.u32 %v6688_v3, 16 }
 0x2ea   : > { %5531 = vmatprep.subr.bf16.mxu1 %v5982_v22 }
 0x2eb   : > { %v3526_v34 = vrot.slane %v3525_v21, 4  ;;  %v3770_v7 = vor.u32 %v3768_v0, %v3767_v57  ;;  %v6004_v0 = vld [vmem:[#allocation8 + $0x1c0] sm:$0xff]  }
 0x2ed   : > { %5532 = vmatpush3.bf16.msra.mxu1 %v5982_v22  ;;  %v3528_v22 = vshll.u32 %v3467_v1, 16 }
 0x2ee   : > { %5533 = vmatprep.subr.bf16.mxu1 %v5983_v12 }
 0x2ef   : > { %v3530_v35 = vrot.slane %v3528_v22, 5 }
 0x2f1   : > { %5534 = vmatpush3.bf16.msra.mxu1 %v5983_v12  ;;  %v3575_v12 = vshrl.u32 %v3474_v6, 16  ;;  %v3531_v52 = vsel %vm6446_vm2, %v3526_v34, %v3530_v35  ;;  %v4925_v6 = vrot.slane %v3760_v56, 11  ;;  %v3791_v35 = vshrl.u32 %v6716_v23, 16 }
 0x2f2   : > { %5535 = vmatprep.subr.bf16.mxu1 %v5984_v28 }
 0x2f3   : > { %v3577_v36 = vrot.slane %v3575_v12, 4  ;;  %v3771_v21 = vsel %vm6573_vm5, %v4925_v6, %v3770_v7 }
 0x2f5   : > { %5536 = vmatpush3.bf16.msra.mxu1 %v5984_v28  ;;  %v3511_v28 = vor.u32 %v3510_v9, %v3507_v8  ;;  %v3568_v9 = vrot.slane %v3567_v60, 4  ;;  %v3843_v60 = vshrl.u32 %v6726_v49, 16 }
 0x2f6   : > { %5545 = vmatprep.subr.bf16.mxu1 %v5986_v32 }
 0x2f7   : > { %v3512_v45 = vrot.slane %v3511_v28, 4  ;;  %v6712_v28 = vld [vmem:[#allocation2 + $0x40] sm:$0xf]  ;;  %v3845_v7 = vrot.slane %v3843_v60, 7 }
 0x2f8   : > { %5538 = vmatmul.mubr.bf16.vlgmr.msra.gmra.mrb[0].mxu1 %v4902_v39  ;;  %v6690_v39 = vld [vmem:[#allocation2 + $0x28] sm:$0xf] }
 0x2f9   : > { %5541 = vmatprep.mubr.bf16.mxu1 %v4903_v43  ;;  %5546 = vmatpush3.bf16.msra.mxu1 %v5986_v32  ;;  %v3539_v32 = vor.u32 %v3538_v19, %v3535_v18  ;;  %v3745_v43 = vld [vmem:[#allocation2 + $0x24] sm:$0x8]  ;;  %v3778_v51 = vshrl.u32 %v6690_v39, 16  ;;  %v3781_v8 = vshll.u32 %v6690_v39, 16 }
 0x2fa   : > { %5547 = vmatprep.subr.bf16.mxu1 %v5988_v40  ;;  %v3773_v37 = vshrl.u32 %v3745_v43, 16 }
 0x2fb   : > { %v3540_v11 = vrot.slane %v3539_v32, 4  ;;  %v3780_v59 = vrot.slane %v3778_v51, 7  ;;  %v6719_v32 = vld [vmem:[#allocation2 + $0x58] sm:$0xf] }
 0x2fc   : > { %v4926_v18 = vrot.slane %v3773_v37, 11  ;;  %v3830_v42 = vshrl.u32 %v6719_v32, 16 }
 0x2fd   : > { %5548 = vmatpush3.bf16.msra.mxu1 %v5988_v40  ;;  %v3554_v40 = vrot.slane %v3553_v26, 4  ;;  %v3783_v19 = vor.u32 %v3781_v8, %v3780_v59 }
 0x2fe   : > { %5549 = vmatprep.subr.bf16.mxu1 %v5990_v46 }
 0x2ff   : > { %v3559_v55 = vsel %vm6446_vm2, %v3554_v40, %v3558_v41  ;;  %v3784_v12 = vsel %vm6573_vm5, %v4926_v18, %v3783_v19  ;;  %v3747_v40 = vld [vmem:[#allocation2 + $0x30] sm:$0x8]  ;;  %v3753_v41 = vld [vmem:[#allocation2 + $0x54] sm:$0x8]  ;;  %v3846_v18 = vshll.u32 %v6726_v49, 16 }
 0x300   : > { %5542 = vmatmul.mubr.bf16.gmra.mrb[4].mxu1 %v4904_v10  ;;  %v5996_v10 = vld [vmem:[#allocation8 + $0x180] sm:$0xff]   ;;  %v4933_v26 = vcombine.low %v3771_v21, %v3784_v12  ;;  %v3786_v50 = vshrl.u32 %v3747_v40, 16  ;;  %v6005_v21 = vld [vmem:[#allocation8 + $0x1c8] sm:$0xff]  }
 0x301   : > { %5550 = vmatpush3.bf16.msra.mxu1 %v5990_v46  ;;  %5561 = vmatprep.mubr.bf16.mxu1 %v4913_v17  ;;  %v3516_v46 = vrot.slane %v3514_v29, 5  ;;  %v3473_v17 = vld [vmem:[#allocation2 + $0x5c] sm:$0x1]  ;;  %v6714_v29 = vld [vmem:[#allocation2 + $0x4c] sm:$0xf]  ;;  %v3848_v12 = vor.u32 %v3846_v18, %v3845_v7 }
 0x302   : > { %5551 = vmatprep.subr.bf16.mxu1 %v5991_v14  ;;  %v3570_v30 = vshll.u32 %v3473_v17, 16  ;;  %v3817_v34 = vshrl.u32 %v6714_v29, 16  ;;  %v6003_v17 = vld [vmem:[#allocation8 + $0x1b8] sm:$0xff]   ;;  %v3820_v51 = vshll.u32 %v6714_v29, 16  ;;  %v4179_v40 = vld [vmem:[#allocation2 + $0x1c] sm:$0xf] }
 0x303   : > { %v3517_v58 = vsel %vm6446_vm2, %v3512_v45, %v3516_v46  ;;  %v6724_v45 = vld [vmem:[#allocation2 + $0x70] sm:$0xf] }
 0x304   : > { %v3572_v13 = vrot.slane %v3570_v30, 5  ;;  %v3819_v48 = vrot.slane %v3817_v34, 7  ;;  %v3856_v54 = vshrl.u32 %v6724_v45, 16  ;;  %v6008_v34 = vld [vmem:[#allocation8 + $0x1d8] sm:$0xff]  }
 0x305   : > { %5552 = vmatpush3.bf16.msra.mxu1 %v5991_v14  ;;  %v3544_v14 = vrot.slane %v3542_v33, 5  ;;  %v3749_v33 = vld [vmem:[#allocation2 + $0x3c] sm:$0x8] }
 0x306   : > { %5553 = vmatprep.subr.bf16.mxu1 %v5992_v53  ;;  %v3573_v22 = vsel %vm6446_vm2, %v3568_v9, %v3572_v13  ;;  %v3799_v43 = vshrl.u32 %v3749_v33, 16  ;;  %v3822_v37 = vor.u32 %v3820_v51, %v3819_v48  ;;  %v3858_v8 = vrot.slane %v3856_v54, 7  ;;  %v6016_v54 = vld [vmem:[#allocation8 + $0x208] sm:$0xff]  }
 0x307   : > { %v3545_v62 = vsel %vm6446_vm2, %v3540_v11, %v3544_v14  ;;  %v3807_v11 = vshll.u32 %v6712_v28, 16  ;;  %v3825_v14 = vshrl.u32 %v3753_v41, 16  ;;  %v3859_v9 = vshll.u32 %v6724_v45, 16  ;;  %v4181_v41 = vld [vmem:[#allocation2 + $0x28] sm:$0xf] }
 0x308   : > { %v4915_v1 = vcombine.low %v3545_v62, %v3559_v55  ;;  %v3794_v55 = vshll.u32 %v6716_v23, 16  ;;  %v4928_v56 = vrot.slane %v3799_v43, 11  ;;  %v4927_v62 = vrot.slane %v3786_v50, 11  ;;  %v4180_v50 = vld [vmem:[#allocation2 + $0x20] sm:$0x1] }
 0x309   : > { %5554 = vmatpush3.bf16.msra.mxu1 %v5992_v53  ;;  %v3581_v53 = vor.u32 %v3580_v38, %v3577_v36  ;;  %v3751_v36 = vld [vmem:[#allocation2 + $0x48] sm:$0x8]  ;;  %v4930_v59 = vrot.slane %v3825_v14, 11  ;;  %v4199_v43 = vshll.u32 %v4179_v40, 16 }
 0x30a   : > { %5555 = vmatprep.subr.bf16.mxu1 %v5993_v61  ;;  %v6002_v38 = vld [vmem:[#allocation8 + $0x1b0] sm:$0xff]   ;;  %v3812_v46 = vshrl.u32 %v3751_v36, 16  ;;  %v6009_v36 = vld [vmem:[#allocation8 + $0x1e0] sm:$0xff]  }
 0x30b   : > { %v3582_v2 = vrot.slane %v3581_v53, 4  ;;  %v3755_v53 = vld [vmem:[#allocation2 + $0x60] sm:$0x8]  ;;  %v4201_v48 = vrot.slane %v4199_v43, 5 }
 0x30c   : > { %v4929_v30 = vrot.slane %v3812_v46, 11  ;;  %v4210_v46 = vshrl.u32 %v4181_v41, 16 }
 0x30d   : > { %5556 = vmatpush3.bf16.msra.mxu1 %v5993_v61  ;;  %v4914_v61 = vcombine.low %v3517_v58, %v3531_v52  ;;  %v3587_v20 = vsel %vm6446_vm2, %v3582_v2, %v3586_v4  ;;  %v3832_v52 = vrot.slane %v3830_v42, 7  ;;  %v3757_v58 = vld [vmem:[#allocation2 + $0x6c] sm:$0x8]  ;;  %v3838_v2 = vshrl.u32 %v3755_v53, 16 }
 0x30e   : > { %5557 = vmatprep.subr.bf16.mxu1 %v5994_v16  ;;  %v4916_v24 = vcombine.low %v3573_v22, %v3587_v20  ;;  %v3851_v4 = vshrl.u32 %v3757_v58, 16  ;;  %v3823_v13 = vsel %vm6573_vm5, %v4929_v30, %v3822_v37  ;;  %v4196_v42 = vshrl.u32 %v4179_v40, 16  ;;  %v6018_v30 = vld [vmem:[#allocation8 + $0x210] sm:$0xff]  }
 0x30f   : > { %v4931_v22 = vrot.slane %v3838_v2, 11  ;;  %v4946_v53 = vcombine.low %v6716_v23, %v6712_v28  ;;  %v6019_v23 = vld [vmem:[#allocation8 + $0x218] sm:$0xff]  }
 0x311   : > { %5558 = vmatpush3.bf16.msra.mxu1 %v5994_v16  ;;  %v5998_v16 = vld [vmem:[#allocation8 + $0x190] sm:$0xff]  }
 0x312   : > { %5559 = vmatprep.subr.bf16.mxu1 %v5995_v31 }
 0x315   : > { %5560 = vmatpush3.bf16.msra.mxu1 %v5995_v31  ;;  %v3804_v31 = vshrl.u32 %v6712_v28, 16  ;;  %v4948_v28 = vcombine.low %v6726_v49, %v6724_v45 }
 0x316   : > { %5569 = vmatprep.subr.bf16.mxu1 %v5996_v10 }
 0x317   : > { %v3806_v44 = vrot.slane %v3804_v31, 7 }
 0x318   : > { %5562 = vmatmul.mubr.bf16.vlgmr.msra.gmra.mrb[0].mxu1 %v4914_v61  ;;  %v3833_v61 = vshll.u32 %v6719_v32, 16 }
 0x319   : > { %5565 = vmatprep.mubr.bf16.mxu1 %v4915_v1  ;;  %5570 = vmatpush3.bf16.msra.mxu1 %v5996_v10  ;;  %v3793_v10 = vrot.slane %v3791_v35, 7  ;;  %v3809_v57 = vor.u32 %v3807_v11, %v3806_v44  ;;  %v4945_v35 = vcombine.low %v6688_v3, %v6690_v39  ;;  %v6012_v44 = vld [vmem:[#allocation8 + $0x1f8] sm:$0xff]   ;;  %v4213_v3 = vshll.u32 %v4181_v41, 16 }
 0x31a   : > { %5571 = vmatprep.subr.bf16.mxu1 %v5997_v63  ;;  %v3835_v1 = vor.u32 %v3833_v61, %v3832_v52  ;;  %v4198_v39 = vrot.slane %v4196_v42, 4  ;;  %v4212_v11 = vrot.slane %v4210_v46, 4  ;;  %v4205_v52 = vshll.u32 %v4180_v50, 16 }
 0x31b   : > { %v3810_v6 = vsel %vm6573_vm5, %v4928_v56, %v3809_v57  ;;  %v4215_v14 = vrot.slane %v4213_v3, 5  ;;  %v4947_v57 = vcombine.low %v6714_v29, %v6719_v32 }
 0x31c   : > { %v3836_v20 = vsel %vm6573_vm5, %v4930_v59, %v3835_v1  ;;  %v4202_v51 = vor.u32 %v4201_v48, %v4198_v39  ;;  %v4207_v60 = vrot.slane %v4205_v52, 5  ;;  %v6020_v59 = vld [vmem:[#allocation8 + $0x220] sm:$0xff]   ;;  %v4183_v1 = vld [vmem:[#allocation2 + $0x34] sm:$0xf] }
 0x31d   : > { %5572 = vmatpush3.bf16.msra.mxu1 %v5997_v63  ;;  %v3796_v63 = vor.u32 %v3794_v55, %v3793_v10  ;;  %v6014_v10 = vld [vmem:[#allocation8 + $0x200] sm:$0xff]   ;;  %v4216_v55 = vor.u32 %v4215_v14, %v4212_v11  ;;  %v4224_v45 = vshrl.u32 %v4183_v1, 16  ;;  %v4227_v49 = vshll.u32 %v4183_v1, 16  ;;  %v6023_v39 = vld [vmem:[#allocation8 + $0x238] sm:$0xff]  }
 0x31e   : > { %5573 = vmatprep.subr.bf16.mxu1 %v5998_v16  ;;  %v4203_v58 = vrot.slane %v4202_v51, 4  ;;  %v4192_v51 = vld [vmem:[#allocation2 + $0x68] sm:$0x1] }
 0x31f   : > { %v4217_v37 = vrot.slane %v4216_v55, 4 }
 0x320   : > { %5566 = vmatmul.mubr.bf16.gmra.mrb[4].mxu1 %v4916_v24  ;;  %v4935_v24 = vcombine.low %v3823_v13, %v3836_v20  ;;  %v4193_v20 = vld [vmem:[#allocation2 + $0x70] sm:$0xf] }
 0x321   : > { %5574 = vmatpush3.bf16.msra.mxu1 %v5998_v16  ;;  %5585 = vmatprep.mubr.bf16.mxu1 %v4933_v26  ;;  %v3797_v16 = vsel %vm6573_vm5, %v4927_v62, %v3796_v63  ;;  %v3861_v26 = vor.u32 %v3859_v9, %v3858_v8  ;;  %v4208_v62 = vsel %vm6446_vm2, %v4203_v58, %v4207_v60  ;;  %v4185_v63 = vld [vmem:[#allocation2 + $0x40] sm:$0xf] }
 0x322   : > { %5575 = vmatprep.subr.bf16.mxu1 %v5999_v25  ;;  %v4934_v19 = vcombine.low %v3797_v16, %v3810_v6  ;;  %v4238_v2 = vshrl.u32 %v4185_v63, 16  ;;  %v4189_v6 = vld [vmem:[#allocation2 + $0x58] sm:$0xf]  ;;  %v6021_v9 = vld [vmem:[#allocation8 + $0x228] sm:$0xff]  }
 0x323   : > { %v4266_v13 = vshrl.u32 %v4189_v6, 16  ;;  %v4269_v16 = vshll.u32 %v4189_v6, 16 }
 0x324   : > { %v4240_v18 = vrot.slane %v4238_v2, 4 }
 0x325   : > { %5576 = vmatpush3.bf16.msra.mxu1 %v5999_v25  ;;  %v4932_v25 = vrot.slane %v3851_v4, 11  ;;  %v4241_v4 = vshll.u32 %v4185_v63, 16 }
 0x326   : > { %5577 = vmatprep.subr.bf16.mxu1 %v6000_v27 }
 0x327   : > { %v3862_v31 = vsel %vm6573_vm5, %v4932_v25, %v3861_v26  ;;  %v4184_v25 = vld [vmem:[#allocation2 + $0x38] sm:$0x1]  ;;  %v4226_v26 = vrot.slane %v4224_v45, 4 }
 0x328   : > { %v4233_v3 = vshll.u32 %v4184_v25, 16 }
 0x329   : > { %5578 = vmatpush3.bf16.msra.mxu1 %v6000_v27  ;;  %v6006_v27 = vld [vmem:[#allocation8 + $0x1d0] sm:$0xff]  }
 0x32a   : > { %5579 = vmatprep.subr.bf16.mxu1 %v6001_v15  ;;  %v4235_v58 = vrot.slane %v4233_v3, 5 }
 0x32d   : > { %5580 = vmatpush3.bf16.msra.mxu1 %v6001_v15  ;;  %v3849_v15 = vsel %vm6573_vm5, %v4931_v22, %v3848_v12  ;;  %v4191_v12 = vld [vmem:[#allocation2 + $0x64] sm:$0xf] }
 0x32e   : > { %5581 = vmatprep.subr.bf16.mxu1 %v6002_v38  ;;  %v4936_v33 = vcombine.low %v3849_v15, %v3862_v31  ;;  %v4188_v15 = vld [vmem:[#allocation2 + $0x50] sm:$0x1]  ;;  %v6022_v31 = vld [vmem:[#allocation8 + $0x230] sm:$0xff]   ;;  %v4280_v41 = vshrl.u32 %v4191_v12, 16  ;;  %v4283_v42 = vshll.u32 %v4191_v12, 16 }
 0x330   : > { %v4282_v52 = vrot.slane %v4280_v41, 4 }
 0x331   : > { %5582 = vmatpush3.bf16.msra.mxu1 %v6002_v38  ;;  %v6010_v38 = vld [vmem:[#allocation8 + $0x1e8] sm:$0xff]  }
 0x332   : > { %5583 = vmatprep.subr.bf16.mxu1 %v6003_v17 }
 0x335   : > { %5584 = vmatpush3.bf16.msra.mxu1 %v6003_v17  ;;  %v4182_v17 = vld [vmem:[#allocation2 + $0x2c] sm:$0x1] }
 0x336   : > { %5593 = vmatprep.subr.bf16.mxu1 %v6004_v0  ;;  %v4219_v56 = vshll.u32 %v4182_v17, 16 }
 0x338   : > { %5586 = vmatmul.mubr.bf16.vlgmr.msra.gmra.mrb[0].mxu1 %v4934_v19  ;;  %v4221_v61 = vrot.slane %v4219_v56, 5  ;;  %v4243_v19 = vrot.slane %v4241_v4, 5  ;;  %v4194_v56 = vld [vmem:[#allocation2 + $0x74] sm:$0x1] }
 0x339   : > { %5589 = vmatprep.mubr.bf16.mxu1 %v4935_v24  ;;  %5594 = vmatpush3.bf16.msra.mxu1 %v6004_v0  ;;  %v4187_v0 = vld [vmem:[#allocation2 + $0x4c] sm:$0xf] }
 0x33a   : > { %5595 = vmatprep.subr.bf16.mxu1 %v6005_v21  ;;  %v4222_v29 = vsel %vm6446_vm2, %v4217_v37, %v4221_v61  ;;  %v4252_v7 = vshrl.u32 %v4187_v0, 16  ;;  %v4255_v8 = vshll.u32 %v4187_v0, 16  ;;  %v4289_v37 = vshll.u32 %v4192_v51, 16 }
 0x33b   : > { %v4957_v32 = vcombine.low %v4208_v62, %v4222_v29  ;;  %v4303_v29 = vshll.u32 %v4194_v56, 16 }
 0x33c   : > { %v4254_v22 = vrot.slane %v4252_v7, 4  ;;  %v4257_v24 = vrot.slane %v4255_v8, 5 }
 0x33d   : > { %5596 = vmatpush3.bf16.msra.mxu1 %v6005_v21  ;;  %v4186_v21 = vld [vmem:[#allocation2 + $0x44] sm:$0x1]  ;;  %v4305_v6 = vrot.slane %v4303_v29, 5 }
 0x33e   : > { %5597 = vmatprep.subr.bf16.mxu1 %v6006_v27  ;;  %v4247_v40 = vshll.u32 %v4186_v21, 16  ;;  %v4258_v43 = vor.u32 %v4257_v24, %v4254_v22 }
 0x340   : > { %5590 = vmatmul.mubr.bf16.gmra.mrb[4].mxu1 %v4936_v33  ;;  %v4268_v33 = vrot.slane %v4266_v13, 4  ;;  %v4249_v17 = vrot.slane %v4247_v40, 5  ;;  %v4977_v40 = vld [vmem:[%s6421_s21 + $0xf8] ss:$16 sps:$4 sm:$0xff]  }
 0x341   : > { %5598 = vmatpush3.bf16.msra.mxu1 %v6006_v27  ;;  %5609 = vmatprep.mubr.bf16.mxu1 %v4945_v35  ;;  %v4229_v27 = vrot.slane %v4227_v49, 5  ;;  %v4294_v35 = vshrl.u32 %v4193_v20, 16  ;;  %v4969_v49 = vld [vmem:[%s6849_s5] ss:$0 sm:$0xff] }
 0x342   : > { %5599 = vmatprep.subr.bf16.mxu1 %v6008_v34 }
 0x343   : > { %v4230_v46 = vor.u32 %v4229_v27, %v4226_v26 }
 0x345   : > { %5600 = vmatpush3.bf16.msra.mxu1 %v6008_v34  ;;  %v4271_v34 = vrot.slane %v4269_v16, 5  ;;  %v4970_v16 = vld [vmem:[%s6850_s6] ss:$0 sm:$0xff] }
 0x346   : > { %5601 = vmatprep.subr.bf16.mxu1 %v6009_v36 }
 0x347   : > { %v4272_v48 = vor.u32 %v4271_v34, %v4268_v33 }
 0x349   : > { %5602 = vmatpush3.bf16.msra.mxu1 %v6009_v36  ;;  %v4297_v36 = vshll.u32 %v4193_v20, 16  ;;  %v4273_v60 = vrot.slane %v4272_v48, 4  ;;  %v4505_v48 = vunpack.c.h.bf16 %v4977_v40 }
 0x34a   : > { %5603 = vmatprep.subr.bf16.mxu1 %v6010_v38 }
 0x34b   : > { %v4299_v11 = vrot.slane %v4297_v36, 5 }
 0x34d   : > { %5604 = vmatpush3.bf16.msra.mxu1 %v6010_v38  ;;  %v4244_v38 = vor.u32 %v4243_v19, %v4240_v18  ;;  %v4974_v18 = vld [vmem:[%s6421_s21 + $0xe0] ss:$16 sps:$4 sm:$0xff]  }
 0x34e   : > { %5605 = vmatprep.subr.bf16.mxu1 %v6011_v5  ;;  %v4502_v26 = vunpack.c.h.bf16 %v4974_v18  ;;  %v4500_v33 = vunpack.c.l.bf16 %v4974_v18 }
 0x34f   : > { %v4245_v14 = vrot.slane %v4244_v38, 4 }
 0x351   : > { %5606 = vmatpush3.bf16.msra.mxu1 %v6011_v5  ;;  %v4190_v5 = vld [vmem:[#allocation2 + $0x5c] sm:$0x1]  ;;  %v4250_v61 = vsel %vm6446_vm2, %v4245_v14, %v4249_v17  ;;  %v4503_v14 = vunpack.c.l.bf16 %v4977_v40 }
 0x352   : > { %5607 = vmatprep.subr.bf16.mxu1 %v6012_v44  ;;  %v4275_v50 = vshll.u32 %v4190_v5, 16 }
 0x355   : > { %5608 = vmatpush3.bf16.msra.mxu1 %v6012_v44  ;;  %v4261_v44 = vshll.u32 %v4188_v15, 16 }
 0x356   : > { %5617 = vmatprep.subr.bf16.mxu1 %v6014_v10 }
 0x357   : > { %v4263_v55 = vrot.slane %v4261_v44, 5 }
 0x358   : > { %5610 = vmatmul.mubr.bf16.vlgmr.msra.gmra.mrb[0].mxu1 %v4946_v53  ;;  %v4285_v53 = vrot.slane %v4283_v42, 5 }
 0x359   : > { %5613 = vmatprep.mubr.bf16.mxu1 %v4947_v57  ;;  %5618 = vmatpush3.bf16.msra.mxu1 %v6014_v10  ;;  %v4296_v10 = vrot.slane %v4294_v35, 4  ;;  %v4231_v57 = vrot.slane %v4230_v46, 4  ;;  %v4978_v46 = vld [vmem:[%s6421_s21 + $0x100] ss:$16 sps:$4 sm:$0xff]  }
 0x35a   : > { %5619 = vmatprep.subr.bf16.mxu1 %v6016_v54  ;;  %v4286_v62 = vor.u32 %v4285_v53, %v4282_v52  ;;  %v4506_v53 = vunpack.c.h.bf16 %v4978_v46 }
 0x35c   : > { %v4287_v2 = vrot.slane %v4286_v62, 4 }
 0x35d   : > { %5620 = vmatpush3.bf16.msra.mxu1 %v6016_v54  ;;  %v4259_v54 = vrot.slane %v4258_v43, 4 }
 0x35e   : > { %5621 = vmatprep.subr.bf16.mxu1 %v6018_v30 }
 0x360   : > { %5614 = vmatmul.mubr.bf16.gmra.mrb[4].mxu1 %v4948_v28  ;;  %v4300_v28 = vor.u32 %v4299_v11, %v4296_v10 }
 0x361   : > { %5622 = vmatpush3.bf16.msra.mxu1 %v6018_v30  ;;  %5633 = vmatprep.mubr.bf16.mxu1 %v4957_v32  ;;  %v4277_v30 = vrot.slane %v4275_v50, 5  ;;  %v4236_v32 = vsel %vm6446_vm2, %v4231_v57, %v4235_v58  ;;  %v4504_v57 = vunpack.c.l.bf16 %v4978_v46 }
 0x362   : > { %5623 = vmatprep.subr.bf16.mxu1 %v6019_v23  ;;  %v4958_v63 = vcombine.low %v4236_v32, %v4250_v61  ;;  %v4301_v4 = vrot.slane %v4300_v28, 4 }
 0x363   : > { %v4278_v0 = vsel %vm6446_vm2, %v4273_v60, %v4277_v30 }
 0x364   : > { %v4306_v8 = vsel %vm6446_vm2, %v4301_v4, %v4305_v6 }
 0x365   : > { %5624 = vmatpush3.bf16.msra.mxu1 %v6019_v23  ;;  %v4264_v23 = vsel %vm6446_vm2, %v4259_v54, %v4263_v55 }
 0x366   : > { %5625 = vmatprep.subr.bf16.mxu1 %v6020_v59  ;;  %v4959_v1 = vcombine.low %v4264_v23, %v4278_v0 }
 0x369   : > { %5626 = vmatpush3.bf16.msra.mxu1 %v6020_v59  ;;  %v4291_v59 = vrot.slane %v4289_v37, 5 }
 0x36a   : > { %5627 = vmatprep.subr.bf16.mxu1 %v6021_v9 }
 0x36b   : > { %v4292_v7 = vsel %vm6446_vm2, %v4287_v2, %v4291_v59 }
 0x36c   : > { %v4960_v45 = vcombine.low %v4292_v7, %v4306_v8 }
 0x36d   : > { %5628 = vmatpush3.bf16.msra.mxu1 %v6021_v9  ;;  %v4973_v9 = vld [vmem:[%s6421_s21 + $0xd8] ss:$16 sps:$4 sm:$0xff]  }
 0x36e   : > { %5629 = vmatprep.subr.bf16.mxu1 %v6022_v31  ;;  %v4501_v20 = vunpack.c.h.bf16 %v4973_v9  ;;  %v4499_v47 = vunpack.c.l.bf16 %v4973_v9 }
 0x371   : > { %5630 = vmatpush3.bf16.msra.mxu1 %v6022_v31 }
 0x372   : > { %5631 = vmatprep.subr.bf16.mxu1 %v6023_v39 }
 0x375   : > { %5632 = vmatpush3.bf16.msra.mxu1 %v6023_v39 }
 0x378   : > { %5634 = vmatmul.mubr.bf16.vlgmr.msra.gmra.mrb[0].mxu1 %v4958_v63 }
 0x379   : > { %5637 = vmatprep.mubr.bf16.mxu1 %v4959_v1 }
 0x380   : > { %5638 = vmatmul.mubr.bf16.gmra.mrb[4].mxu1 %v4960_v45 }
 0x44b   : > { %v5635_v13 = vpop.f32.mrb[0].mxu1 }
 0x44c   : > { %v4470_v19 = vmul.f32 %v5635_v13, %v4969_v49  ;;  %v4422_v21 = vpop.f32.mrb[1].mxu1 }
 0x44d   : > { %v4468_v22 = vmul.f32 %v4969_v49, %v4422_v21  ;;  %v5636_v24 = vpop.f32.mrb[2].mxu1 }
 0x44e   : > { %v4485_v12 = vadd.f32 %v4970_v16, %v4470_v19  ;;  %v4471_v25 = vmul.f32 %v5636_v24, %v4969_v49  ;;  %v4425_v27 = vpop.f32.mrb[3].mxu1 }
 0x44f   : > { %v4483_v15 = vadd.f32 %v4970_v16, %v4468_v22  ;;  %v4469_v31 = vmul.f32 %v4969_v49, %v4425_v27 }
 0x450   : > { %v4509_v34 = vadd.f32 %v4501_v20, %v4485_v12  ;;  %v4486_v35 = vadd.f32 %v4970_v16, %v4471_v25 }
 0x451   : > { %v4507_v36 = vadd.f32 %v4499_v47, %v4483_v15  ;;  %v4484_v38 = vadd.f32 %v4970_v16, %v4469_v31 }
 0x452   : > { %v4517_v5 = vmax.f32 %v4509_v34, 0.0  ;;  %v4510_v41 = vadd.f32 %v4502_v26, %v4486_v35 }
 0x453   : > { %v4515_v42 = vmax.f32 %v4507_v36, 0.0  ;;  %v4508_v43 = vadd.f32 %v4500_v33, %v4484_v38  ;;  %v5639_v44 = vpop.f32.mrb[4].mxu1 }
 0x454   : > { %4525 = vst [vmem:[%s6783_s26 + $0x10] sm:$0xff] %v4517_v5  ;;  %v4518_v3 = vmax.f32 %v4510_v41, 0.0  ;;  %v4474_v39 = vmul.f32 %v5639_v44, %v4969_v49  ;;  %v4438_v50 = vpop.f32.mrb[5].mxu1 }
 0x455   : > { %4523 = vst [vmem:[%s6783_s26] sm:$0xff] %v4515_v42  ;;  %v4516_v10 = vmax.f32 %v4508_v43, 0.0  ;;  %v4472_v11 = vmul.f32 %v4969_v49, %v4438_v50  ;;  %v5640_v17 = vpop.f32.mrb[6].mxu1 }
 0x456   : > { %4526 = vst [vmem:[%s6783_s26 + $0x18] sm:$0xff] %v4518_v3  ;;  %v4489_v51 = vadd.f32 %v4970_v16, %v4474_v39  ;;  %v4475_v52 = vmul.f32 %v5640_v17, %v4969_v49  ;;  %v4441_v54 = vpop.f32.mrb[7].mxu1 }
 0x457   : > { %4524 = vst [vmem:[%s6783_s26 + $0x8] sm:$0xff] %v4516_v10  ;;  %v4487_v55 = vadd.f32 %v4970_v16, %v4472_v11  ;;  %v4473_v56 = vmul.f32 %v4969_v49, %v4441_v54 }
 0x458   : > { %v4513_v58 = vadd.f32 %v4505_v48, %v4489_v51  ;;  %v4490_v60 = vadd.f32 %v4970_v16, %v4475_v52 }
 0x459   : > { %v4511_v30 = vadd.f32 %v4503_v14, %v4487_v55  ;;  %v4488_v37 = vadd.f32 %v4970_v16, %v4473_v56 }
 0x45a   : > { %v4521_v61 = vmax.f32 %v4513_v58, 0.0  ;;  %v4514_v62 = vadd.f32 %v4506_v53, %v4490_v60 }
 0x45b   : > { %v4519_v28 = vmax.f32 %v4511_v30, 0.0  ;;  %v4512_v29 = vadd.f32 %v4504_v57, %v4488_v37 }
 0x45c   : > { %4529 = vst [vmem:[%s6783_s26 + $0x30] sm:$0xff] %v4521_v61  ;;  %v4522_v23 = vmax.f32 %v4514_v62, 0.0 }
 0x45d   : > { %4527 = vst [vmem:[%s6783_s26 + $0x20] sm:$0xff] %v4519_v28  ;;  %v4520_v32 = vmax.f32 %v4512_v29, 0.0 }
 0x45e   : > { %4530 = vst [vmem:[%s6783_s26 + $0x38] sm:$0xff] %v4522_v23 }
 0x45f   : > { %4528 = vst [vmem:[%s6783_s26 + $0x28] sm:$0xff] %v4520_v32 }
 0x460   : > { %6123 = shalt.err (!%p6120_p1)
}
 0x461   : > { %s6124_s18 = scalar_lea.hbm %s6795_s10, 1024  ;;  %s6128_s1 = scalar_lea.hbm %s6852_s8, 2048 }
 0x462   : > { %p6125_p13 = scmp.ne.s32.totalorder %s6795_s10, %s6124_s18  ;;  %p6129_p4 = scmp.lt.u32.totalorder %s6795_s10, %s6852_s8 }
 0x463   : > { %p6130_p5 = scmp.lt.u32.totalorder %s6128_s1, %s6124_s18  ;;  %p6132_p11 = scmp.lt.u32.totalorder %s6124_s18, %s6795_s10 }
 0x464   : > { %p6126_p6 = pnand %p6125_p13, %p6876_p0 }
 0x465   : > { %p6131_p8 = por %p6130_p5, %p6129_p4 }
 0x466   : > { %p6127_p10 = pneg %p6126_p6 }
 0x467   : > { %p6133_p2 = por %p6132_p11, %p6131_p8 }
 0x469   : > { %p6134_p3 = pnand %p6133_p2, %p6127_p10 }
 0x46b   : > { %6137 = shalt.err (!%p6134_p3)
}
 0x46c   : > { %s6189_s14 = smov 128   ;;  %s6190_s21 = smov 8  }
 0x46d   : > { %5782 = dma.vmem_to_hbm [thread:$0]  (%p6876_p0), %s6797_s24, 1024, %s6795_s10, %s4532_s7, %s6189_s14, %s6189_s14, %s6190_s21  }
 0x46e PF: > { %s4560_s12 = sand.u32 1, %s6168_s27   ;;  %p6877_p7 = scmp.ne.s32.totalorder %s6860_s11, 0 }
 0x46f   : > { %p6878_p9 = scmp.ge.s32.totalorder %s6180_s30, 2  ;;  %s4561_s23 = scalar_lea.sflag [#allocation5], %s4560_s12 }
 0x471   : > { %p5796_p12 = pnand %p6878_p9, %p6877_p7 }
 0x473   : > { %6163 = dma.done.wait (!%p5796_p12), %s4561_s23, 1024  }
 0x474   : > { %6165 = vsyncadd (!%p5796_p12), %s4561_s23, 4294966272  ;;  %p22_p1 = scmp.ge.s32.totalorder %s6352_s15, 4   ;;  %s6879_s27 = smov %s6172_s28 }
 0x475   : > { %s6880_s28 = smov %s6176_s29  ;;  %s6881_s29 = smov %s6368_s20 }
 0x476   : > { %s6882_s30 = smov %s6352_s15  ;;  %24 = sbr.rel (!%p22_p1) target bundleno = 8 (0x8), region = 128 }
 0x47d   :  { %4566 = vsyncpa [#allocation4], 1 }
 0x47e   :  { %4568 = vsyncpa [#allocation4 + $0x1], 1 }
 0x47f   :  { %4569 = vsyncpa [#allocation7], 1 }
 0x480   :  { %4570 = vsyncpa [#allocation5], 1 }
 0x481   :  { %4572 = vsyncpa [#allocation5 + $0x1], 1 }

// kernel: tpu_custom_call.1
= control target key start
LH: loop header
LB: loop body
LE: loop exit
PB: predicated region body
PF: predicated region fallthrough
CT: control target
= control target key end

     0   :  { %s6844_s0 = inlined_call_operand.hbm [shape: bf16[2,4,9,16,128], index: 0, kind: input, shape index: {}]   ;;  %s6845_s1 = inlined_call_operand.hbm [shape: bf16[3,3,128,128], index: 1, kind: input, shape index: {}]   ;;  %s6846_s2 = inlined_call_operand.vmem [shape: f32[1,128], index: 2, kind: input, shape index: {}]   ;;  %s6847_s3 = inlined_call_operand.vmem [shape: f32[1,128], index: 3, kind: input, shape index: {}]   ;;  %s6848_s4 = inlined_call_operand.hbm [shape: bf16[3,3,128,128], index: 4, kind: input, shape index: {}]   ;;  %s6849_s5 = inlined_call_operand.vmem [shape: f32[1,128], index: 5, kind: input, shape index: {}]   ;;  %s6850_s6 = inlined_call_operand.vmem [shape: f32[1,128], index: 6, kind: input, shape index: {}]   ;;  %s6851_s7 = inlined_call_operand.vmem [shape: bf16[1,1,8,128], index: 7, kind: input, shape index: {}]   ;;  %s6852_s8 = inlined_call_operand.hbm [shape: f32[2,8,8,128], index: 8, kind: output, shape index: {}]  }
   0x1   :  { %6858 = sst [smem:[#allocation13_spill]] %s6845_s1 }
   0x2   :  { %13 = vsyncpa [#allocation4], 0 }
   0x3   :  { %15 = vsyncpa [#allocation4 + $0x1], 0 }
   0x4   :  { %16 = vsyncpa [#allocation7], 0 }
   0x5   :  { %17 = vsyncpa [#allocation5], 0 }
   0x6   :  { %19 = vsyncpa [#allocation5 + $0x1], 0  ;;  %s6236_s27 = smov 0   ;;  %s6238_s28 = smov 0  }
   0x7   :  { %s6240_s29 = smov 0   ;;  %s6242_s30 = smov 0  }
   0x8 LB: > { %s6257_s7 = sadd.s32 4294967295, %s6180_s30   ;;  %s4637_s9 = sadd.s32 4294967294, %s6180_s30   ;;  %s6180_s30 = sphi %s6242_s30, %s6882_s30   ;;  %s6176_s29 = sphi %s6240_s29, %s6881_s29   ;;  %s6172_s28 = sphi %s6238_s28, %s6880_s28   ;;  %s6168_s27 = sphi %s6236_s27, %s6879_s27  }
   0x9   : > { %p45_p0 = scmp.ne.s32.totalorder %s6172_s28, %s6168_s27  ;;  %p6853_p1 = scmp.eq.s32.totalorder %s6257_s7, 0 }
   0xa   : > { %p222_p3 = scmp.eq.s32.totalorder %s4637_s9, 1  ;;  %p4638_p5 = scmp.ge.s32.totalorder %s6180_s30, 1 }
   0xb   : > { %p6266_p4 = por %p6853_p1, %p45_p0  ;;  %p229_p7 = scmp.lt.s32.totalorder %s6180_s30, 3 }
   0xc   : > { %p6271_p6 = por %p222_p3, %p45_p0  ;;  %s6182_s13 = smov [#allocation6]  }
   0xd   : > { %s6859_s10 = scalar_select %p6266_p4, 1, 0 }
   0xe   : > { %s6860_s11 = scalar_select %p6271_p6, 1, 0 }
   0xf   : > { %p6276_p8 = pnand %p4638_p5, %p229_p7  ;;  %s241_s14 = sshll.u32 %s6182_s13, 4  ;;  %s6280_s14 = int_to_ptr.vmem [resolvable:$true] %s241_s14 }
  0x10   : > { %s6183_s16 = smov [#allocation8]   ;;  %s6863_s1 = sld [smem:[#allocation13_spill]] }
  0x11   : > { %p5784_p9 = pneg %p6276_p8  ;;  %s260_s17 = sshll.u32 %s6183_s16, 4  ;;  %s6291_s17 = int_to_ptr.vmem [resolvable:$true] %s260_s17 }
  0x13   : > { %p6287_p11 = pnand %p5784_p9, %p6853_p1 }
  0x15   : > { %p6026_p13 = pneg %p6287_p11 }
  0x16   : > { %s6024_s20 = scalar_lea.hbm %s6863_s1, 9216 }
  0x17   : > { %p6025_p12 = scmp.ne.s32.totalorder %s6863_s1, %s6024_s20  ;;  %p6031_p5 = scmp.lt.u32.totalorder %s6024_s20, %s6863_s1 }
  0x19   : > { %p6027_p0 = pnand %p6026_p13, %p6025_p12 }
  0x1b   : > { %p6028_p3 = pneg %p6027_p0 }
  0x1d   : > { %p6033_p7 = pnand %p6031_p5, %p6028_p3 }
  0x1f   : > { %6036 = shalt.err (!%p6033_p7)
}
  0x20   : > { %s6037_s25 = scalar_lea.vmem %s6280_s14, 9216  ;;  %p6045_p2 = scmp.lt.s32.totalorder %s6280_s14, %s6280_s14 }
  0x21   : > { %p6038_p9 = scmp.ne.s32.totalorder %s6280_s14, %s6037_s25  ;;  %p6046_p12 = scmp.lt.s32.totalorder %s6037_s25, %s6037_s25 }
  0x23   : > { %p6040_p10 = pnand %p6038_p9, %p6026_p13  ;;  %p6047_p0 = por %p6046_p12, %p6045_p2 }
  0x25   : > { %p6041_p1 = pneg %p6040_p10 }
  0x27   : > { %p6048_p6 = pnand %p6047_p0, %p6041_p1 }
  0x29   : > { %6051 = shalt.err (!%p6048_p6)
}
  0x2a   : > { %s6854_s26 = smov 64   ;;  %s6855_s9 = smov 4  }
  0x2b   : > { %5787 = dma.hbm_to_vmem [thread:$0]  (!%p6287_p11), %s6863_s1, 9216, %s6280_s14, [#allocation7], %s6854_s26, %s6854_s26, %s6855_s9  }
  0x2c   : > { %s6052_s20 = scalar_lea.hbm %s6848_s4, 9216 }
  0x2d   : > { %p6053_p1 = scmp.ne.s32.totalorder %s6848_s4, %s6052_s20  ;;  %p6059_p10 = scmp.lt.u32.totalorder %s6052_s20, %s6848_s4 }
  0x2f   : > { %p6055_p2 = pnand %p6053_p1, %p6026_p13 }
  0x31   : > { %p6056_p6 = pneg %p6055_p2 }
  0x33   : > { %p6061_p3 = pnand %p6059_p10, %p6056_p6 }
  0x35   : > { %6064 = shalt.err (!%p6061_p3)
}
  0x36   : > { %s6065_s14 = scalar_lea.vmem %s6291_s17, 9216  ;;  %p6073_p12 = scmp.lt.s32.totalorder %s6291_s17, %s6291_s17 }
  0x37   : > { %p6066_p5 = scmp.ne.s32.totalorder %s6291_s17, %s6065_s14  ;;  %p6074_p0 = scmp.lt.s32.totalorder %s6065_s14, %s6065_s14 }
  0x39   : > { %p6068_p7 = pnand %p6066_p5, %p6026_p13  ;;  %p6075_p1 = por %p6074_p0, %p6073_p12 }
  0x3b   : > { %p6069_p9 = pneg %p6068_p7 }
  0x3d   : > { %p6076_p2 = pnand %p6075_p1, %p6069_p9 }
  0x3f   : > { %6079 = shalt.err (!%p6076_p2)
}
  0x40   : > { %5790 = dma.hbm_to_vmem [thread:$0]  (!%p6287_p11), %s6848_s4, 9216, %s6291_s17, [#allocation7], %s6854_s26, %s6854_s26, %s6855_s9  }
  0x41   : > { %s6352_s15 = sadd.s32 1, %s6180_s30   ;;  %s32_s16 = sadd.s32 1, %s6176_s29 }
  0x42   : > { %s29_s18 = ssub.s32 %s6180_s30, %s6352_s15  ;;  %p39_p13 = scmp.ne.s32.totalorder %s6176_s29, %s6172_s28 }
  0x43   : > { %p30_p6 = scmp.eq.s32.totalorder %s29_s18, 0  ;;  %p40_p10 = scmp.eq.s32.totalorder %s6180_s30, 0 }
  0x44   : > { %p6864_p3 = scmp.eq.s32.totalorder %s6257_s7, 1  ;;  %p5801_p7 = scmp.lt.s32.totalorder %s6180_s30, 2 }
  0x45   : > { %s6368_s20 = scalar_select %p30_p6, %s6176_s29, %s32_s16  }
  0x46   : > { %p6362_p5 = por %p6864_p3, %p39_p13  ;;  %p41_p9 = por %p40_p10, %p39_p13 }
  0x47   : > { %s283_s21 = sand.u32 1, %s6176_s29   ;;  %s5770_s17 = smul.u32 4608, %s6180_s30 }
  0x48   : > { %s6865_s19 = scalar_select %p6362_p5, 1, 0 }
  0x49   : > { %s5769_s22 = smul.u32 288, %s283_s21  ;;  %p6372_p11 = pnand %p5801_p7, %p41_p9 }
  0x4a   : > { %s6379_s25 = scalar_lea.hbm %s6844_s0, %s5770_s17  ;;  %s6383_s18 = scalar_lea.sflag [#allocation4], %s283_s21 }
  0x4b   : > { %s287_s13 = scalar_lea.vmem [#allocation3], %s5769_s22  ;;  %s6080_s26 = scalar_lea.hbm %s6379_s25, 4608 }
  0x4c   : > { %s294_s16 = sshll.u32 %s287_s13, 4  ;;  %p6081_p12 = scmp.ne.s32.totalorder %s6379_s25, %s6080_s26  ;;  %s6381_s16 = int_to_ptr.vmem [resolvable:$true] %s294_s16 }
  0x4d   : > { %p6082_p0 = pneg %p6372_p11  ;;  %s6085_s14 = scalar_lea.hbm %s6844_s0, 9216 }
  0x4e   : > { %p6086_p13 = scmp.lt.u32.totalorder %s6379_s25, %s6844_s0  ;;  %p6087_p6 = scmp.lt.u32.totalorder %s6085_s14, %s6080_s26 }
  0x4f   : > { %p6083_p1 = pnand %p6082_p0, %p6081_p12  ;;  %p6089_p3 = scmp.lt.u32.totalorder %s6080_s26, %s6379_s25 }
  0x50   : > { %p6088_p10 = por %p6087_p6, %p6086_p13 }
  0x51   : > { %p6084_p2 = pneg %p6083_p1 }
  0x52   : > { %p6090_p7 = por %p6089_p3, %p6088_p10 }
  0x54   : > { %p6091_p9 = pnand %p6090_p7, %p6084_p2 }
  0x56   : > { %6094 = shalt.err (!%p6091_p9)
}
  0x57   : > { %s6095_s21 = scalar_lea.vmem %s6381_s16, 4608  ;;  %s6186_s22 = smov [#allocation3]  }
  0x58   : > { %p6096_p12 = scmp.ne.s32.totalorder %s6381_s16, %s6095_s21  ;;  %s6100_s13 = sshll.u32 %s6186_s22, 4  ;;  %s6101_s13 = int_to_ptr.vmem [resolvable:$false] %s6100_s13 }
  0x59   : > { %s6102_s1 = scalar_lea.vmem %s6101_s13, 9216  ;;  %p6103_p4 = scmp.lt.s32.totalorder %s6381_s16, %s6101_s13 }
  0x5a   : > { %p6098_p1 = pnand %p6096_p12, %p6082_p0  ;;  %p6104_p13 = scmp.lt.s32.totalorder %s6102_s1, %s6095_s21 }
  0x5c   : > { %p6099_p5 = pneg %p6098_p1  ;;  %p6105_p6 = por %p6104_p13, %p6103_p4 }
  0x5e   : > { %p6106_p10 = pnand %p6105_p6, %p6099_p5 }
  0x60   : > { %6109 = shalt.err (!%p6106_p10)
}
  0x61   : > { %s6867_s26 = smov 4   ;;  %s6868_s9 = smov 64  }
  0x62   : > { %5794 = dma.hbm_to_vmem [thread:$0]  (!%p6372_p11), %s6379_s25, 4608, %s6381_s16, %s6383_s18, %s6868_s9, %s6868_s9, %s6867_s26  }
  0x63   : > { %306 = sbr.rel (%p6276_p8) target bundleno = 1134 (0x46e), region = 52  ;;  %s6417_s17 = sand.u32 (!%p6276_p8), 1, %s6172_s28  }
  0x64   : > { %s5771_s24 = smul.u32 (!%p6276_p8), 288, %s6417_s17  ;;  %s309_s14 = scalar_lea.sflag (!%p6276_p8), [#allocation4], %s6417_s17 }
  0x65   : > { %p6869_p4 = scmp.ne.s32.totalorder (!%p6276_p8), %s6859_s10, 0 }
  0x66   : > { %s6421_s21 = scalar_lea.vmem (!%p6276_p8), [#allocation3], %s5771_s24 }
  0x6a   : > { %6155 = dma.done.wait (%p6869_p4), %s309_s14, 4608  }
  0x6b   : > { %6157 = vsyncadd (%p6869_p4), %s309_s14, 4294962688  ;;  %p6870_p5 = scmp.eq.s32.totalorder %s6257_s7, 0 }
  0x6d   : > { %6159 = dma.done.wait (%p6870_p5), [#allocation7], 18432   ;;  %p6871_p8 = pmov %p6870_p5 }
  0x6e   : > { %v5844_v0 = vld [vmem:[#allocation6 + $0x40] sm:$0xff]   ;;  %v5845_v1 = vld [vmem:[#allocation6 + $0x48] sm:$0xff]   ;;  %v5846_v2 = vld [vmem:[#allocation6 + $0x50] sm:$0xff]   ;;  %vm694_vm0 = vsmask.f32 3328  ;;  %s4646_s1 = sshll.u32 %s6417_s17, 6 }
  0x6f   : > { %6161 = vsyncadd (%p6871_p8), [#allocation7], 4294948864  ;;  %5209 = vmatprep.subr.bf16.mxu0 %v5844_v0  ;;  %v5847_v3 = vld [vmem:[#allocation6 + $0x58] sm:$0xff]   ;;  %v5852_v4 = vld [vmem:[%s6421_s21 + $0x48] ss:$8 sps:$4 sm:$0xff]   ;;  %s6783_s26 = scalar_lea.vmem [#allocation9], %s4646_s1 }
  0x70   : > { %5210 = vmatpush3.bf16.msra.mxu0 %v5844_v0  ;;  %5225 = vmatprep.mubr.bf16.mxu0 %v5852_v4  ;;  %v5848_v5 = vld [vmem:[#allocation6 + $0x60] sm:$0xff]   ;;  %v5849_v6 = vld [vmem:[#allocation6 + $0x68] sm:$0xff]   ;;  %v5850_v7 = vld [vmem:[#allocation6 + $0x70] sm:$0xff]   ;;  %vm695_vm1 = vsmask.f32 7440  ;;  %s4992_s9 = sshll.u32 %s6257_s7, 10 }
  0x71   : > { %5211 = vmatprep.subr.bf16.mxu0 %v5845_v1  ;;  %v5851_v8 = vld [vmem:[#allocation6 + $0x78] sm:$0xff]   ;;  %v5853_v9 = vld [vmem:[#allocation6] sm:$0xff]   ;;  %v5860_v11 = vld [vmem:[%s6421_s21 + $0x68] ss:$8 sps:$4 sm:$0xff]   ;;  %vm2336_vm3 = vsmask.f32 256  ;;  %s6795_s10 = scalar_lea.hbm %s6852_s8, %s4992_s9 }
  0x72   : > { %v5854_v10 = vld [vmem:[%s6421_s21 + $0x58] ss:$8 sps:$4 sm:$0xff]   ;;  %v5855_v12 = vld [vmem:[#allocation6 + $0x8] sm:$0xff]   ;;  %v5856_v13 = vld [vmem:[#allocation6 + $0x10] sm:$0xff]   ;;  %vm2337_vm4 = vsmask.f32 4368 }
  0x73   : > { %v5862_v14 = vld [vmem:[%s6421_s21 + $0x78] ss:$8 sps:$4 sm:$0xff]   ;;  %v5859_v18 = vld [vmem:[#allocation6 + $0x28] sm:$0xff]   ;;  %v5861_v23 = vld [vmem:[#allocation6 + $0x30] sm:$0xff]   ;;  %s4545_s24 = sshll.u32 %s6783_s26, 4  ;;  %s4532_s7 = scalar_lea.sflag [#allocation5], %s6417_s17  ;;  %s6797_s24 = int_to_ptr.vmem [resolvable:$true] %s4545_s24 }
  0x74   : > { %5212 = vmatpush3.bf16.msra.mxu0 %v5845_v1  ;;  %v5864_v15 = vld [vmem:[%s6421_s21] ss:$8 sps:$4 sm:$0xff]   ;;  %v5857_v16 = vld [vmem:[#allocation6 + $0x18] sm:$0xff]   ;;  %v679_v26 = vld [vmem:[%s6421_s21 + $0x4] sm:$0x1]  ;;  %s6110_s12 = scalar_lea.vmem %s6797_s24, 1024 }
  0x75   : > { %5213 = vmatprep.subr.bf16.mxu0 %v5846_v2  ;;  %v5858_v17 = vld [vmem:[#allocation6 + $0x20] sm:$0xff]   ;;  %v680_v20 = vld [vmem:[%s6421_s21 + $0x8] sm:$0xf]  ;;  %v5863_v27 = vld [vmem:[#allocation6 + $0x38] sm:$0xff]   ;;  %v707_v33 = vshll.u32 %v679_v26, 16  ;;  %p6111_p11 = scmp.ne.s32.totalorder %s6797_s24, %s6110_s12  ;;  %p6876_p0 = scmp.ne.s32.totalorder %s6865_s19, 0 }
  0x76   : > { %v678_v19 = vld [vmem:[%s6421_s21] sm:$0xf]  ;;  %v712_v24 = vshrl.u32 %v680_v20, 16  ;;  %v715_v25 = vshll.u32 %v680_v20, 16  ;;  %v681_v28 = vld [vmem:[%s6421_s21 + $0xc] sm:$0x1]  ;;  %vm6446_vm2 = vmor %vm694_vm0, %vm695_vm1 }
  0x77   : > { %v698_v21 = vshrl.u32 %v678_v19, 16  ;;  %v701_v22 = vshll.u32 %v678_v19, 16  ;;  %v721_v34 = vshll.u32 %v681_v28, 16  ;;  %v5865_v35 = vld [vmem:[#allocation6 + $0x80] sm:$0xff]   ;;  %v5866_v36 = vld [vmem:[%s6421_s21 + $0x10] ss:$8 sps:$4 sm:$0xff]   ;;  %vm6573_vm5 = vmor %vm2336_vm3, %vm2337_vm4  ;;  %p6112_p2 = pnand %p6111_p11, %p6876_p0 }
  0x78   : > { %5214 = vmatpush3.bf16.msra.mxu0 %v5846_v2  ;;  %v714_v31 = vrot.slane %v712_v24, 4  ;;  %v717_v32 = vrot.slane %v715_v25, 5  ;;  %v5872_v39 = vld [vmem:[%s6421_s21 + $0x20] ss:$8 sps:$4 sm:$0xff]   ;;  %v709_v40 = vrot.slane %v707_v33, 5  ;;  %v5868_v51 = vld [vmem:[#allocation6 + $0x90] sm:$0xff]  }
  0x79   : > { %5215 = vmatprep.subr.bf16.mxu0 %v5847_v3  ;;  %v700_v29 = vrot.slane %v698_v21, 4  ;;  %v703_v30 = vrot.slane %v701_v22, 5  ;;  %v723_v41 = vrot.slane %v721_v34, 5  ;;  %v5867_v42 = vld [vmem:[#allocation6 + $0x88] sm:$0xff]   ;;  %v682_v43 = vld [vmem:[%s6421_s21 + $0x10] sm:$0xf]  ;;  %p6113_p3 = pneg %p6112_p2 }
  0x7a   : > { %v718_v38 = vor.u32 %v717_v32, %v714_v31  ;;  %v684_v44 = vld [vmem:[%s6421_s21 + $0x18] sm:$0xf]  ;;  %v726_v48 = vshrl.u32 %v682_v43, 16  ;;  %v729_v49 = vshll.u32 %v682_v43, 16  ;;  %v686_v61 = vld [vmem:[%s6421_s21 + $0x20] sm:$0xf] }
  0x7b   : > { %v704_v37 = vor.u32 %v703_v30, %v700_v29  ;;  %v740_v50 = vshrl.u32 %v684_v44, 16  ;;  %v5874_v54 = vld [vmem:[%s6421_s21 + $0x30] ss:$8 sps:$4 sm:$0xff]   ;;  %v743_v57 = vshll.u32 %v684_v44, 16  ;;  %v683_v62 = vld [vmem:[%s6421_s21 + $0x14] sm:$0x1] }
  0x7c   : > { %5216 = vmatpush3.bf16.msra.mxu0 %v5847_v3  ;;  %v719_v46 = vrot.slane %v718_v38, 4  ;;  %v5869_v55 = vld [vmem:[#allocation6 + $0x98] sm:$0xff]   ;;  %v728_v56 = vrot.slane %v726_v48, 4  ;;  %v731_v59 = vrot.slane %v729_v49, 5  ;;  %v688_v0 = vld [vmem:[%s6421_s21 + $0x28] sm:$0xf] }
  0x7d   : > { %5217 = vmatprep.subr.bf16.mxu0 %v5848_v5  ;;  %v705_v45 = vrot.slane %v704_v37, 4  ;;  %v742_v60 = vrot.slane %v740_v50, 4  ;;  %v685_v63 = vld [vmem:[%s6421_s21 + $0x1c] sm:$0x1]  ;;  %v687_v1 = vld [vmem:[%s6421_s21 + $0x24] sm:$0x1] }
  0x7e   : > { %v724_v53 = vsel %vm6446_vm2, %v719_v46, %v723_v41  ;;  %v745_v2 = vrot.slane %v743_v57, 5  ;;  %v754_v3 = vshrl.u32 %v686_v61, 16  ;;  %v5870_v4 = vld [vmem:[#allocation6 + $0xa0] sm:$0xff]   ;;  %v692_v21 = vld [vmem:[%s6421_s21 + $0x38] sm:$0xf]  ;;  %v5873_v30 = vld [vmem:[#allocation6 + $0xb0] sm:$0xff]  }
  0x7f   : > { %v710_v52 = vsel %vm6446_vm2, %v705_v45, %v709_v40  ;;  %v796_v28 = vshrl.u32 %v692_v21, 16  ;;  %v799_v29 = vshll.u32 %v692_v21, 16  ;;  %v5875_v38 = vld [vmem:[#allocation6 + $0xb8] sm:$0xff]   ;;  %v5893_v21 = vld [vmem:[#allocation6 + $0x130] sm:$0xff]   ;;  %s6188_s23 = smov [#allocation9]  }
  0x80   : > { %5218 = vmatpush3.bf16.msra.mxu0 %v5848_v5  ;;  %v4679_v58 = vcombine.low %v710_v52, %v724_v53  ;;  %v757_v5 = vshll.u32 %v686_v61, 16  ;;  %s6114_s25 = sshll.u32 %s6188_s23, 4  ;;  %s6115_s25 = int_to_ptr.vmem [resolvable:$false] %s6114_s25 }
  0x81   : > { %5219 = vmatprep.subr.bf16.mxu0 %v5849_v6  ;;  %v798_v40 = vrot.slane %v796_v28, 4  ;;  %v801_v41 = vrot.slane %v799_v29, 5  ;;  %v5895_v28 = vld [vmem:[#allocation6 + $0x138] sm:$0xff]   ;;  %s6116_s16 = scalar_lea.vmem %s6115_s25, 2048  ;;  %p6117_p7 = scmp.lt.s32.totalorder %s6797_s24, %s6115_s25 }
  0x82   : > { %p6118_p9 = scmp.lt.s32.totalorder %s6116_s16, %s6110_s12 }
  0x83   : > { %v802_v49 = vor.u32 %v801_v41, %v798_v40 }
  0x84   : > { %5220 = vmatpush3.bf16.msra.mxu0 %v5849_v6  ;;  %v768_v6 = vshrl.u32 %v688_v0, 16  ;;  %p6119_p12 = por %p6118_p9, %p6117_p7 }
  0x85   : > { %5221 = vmatprep.subr.bf16.mxu0 %v5850_v7 }
  0x86   : > { %p6120_p1 = pnand %p6119_p12, %p6113_p3 }
  0x88   : > { %5222 = vmatpush3.bf16.msra.mxu0 %v5850_v7  ;;  %v771_v7 = vshll.u32 %v688_v0, 16  ;;  %v5879_v0 = vld [vmem:[#allocation6 + $0xd8] sm:$0xff]  }
  0x89   : > { %5223 = vmatprep.subr.bf16.mxu0 %v5851_v8 }
  0x8a   : > { %v773_v19 = vrot.slane %v771_v7, 5  ;;  %v5885_v7 = vld [vmem:[#allocation6 + $0x100] sm:$0xff]  }
  0x8c   : > { %5224 = vmatpush3.bf16.msra.mxu0 %v5851_v8  ;;  %v689_v8 = vld [vmem:[%s6421_s21 + $0x2c] sm:$0x1] }
  0x8d   : > { %5233 = vmatprep.subr.bf16.mxu0 %v5853_v9  ;;  %v777_v20 = vshll.u32 %v689_v8, 16  ;;  %v5886_v8 = vld [vmem:[%s6421_s21 + $0xa0] ss:$8 sps:$4 sm:$0xff]  }
  0x8f   : > { %5226 = vmatmul.mubr.bf16.vlgmr.msra.gmra.mrb[0].mxu0 %v5854_v10  ;;  %v749_v10 = vshll.u32 %v685_v63, 16  ;;  %v779_v34 = vrot.slane %v777_v20, 5  ;;  %v5878_v63 = vld [vmem:[#allocation6 + $0xd0] sm:$0xff]  }
  0x90   : > { %5234 = vmatpush3.bf16.msra.mxu0 %v5853_v9  ;;  %5229 = vmatprep.mubr.bf16.mxu0 %v5860_v11  ;;  %v735_v9 = vshll.u32 %v683_v62, 16  ;;  %v690_v11 = vld [vmem:[%s6421_s21 + $0x30] sm:$0xf] }
  0x91   : > { %5235 = vmatprep.subr.bf16.mxu0 %v5855_v12  ;;  %v782_v22 = vshrl.u32 %v690_v11, 16  ;;  %v751_v25 = vrot.slane %v749_v10, 5  ;;  %v5887_v10 = vld [vmem:[#allocation6 + $0x108] sm:$0xff]  }
  0x92   : > { %v737_v24 = vrot.slane %v735_v9, 5  ;;  %v5892_v9 = vld [vmem:[%s6421_s21 + $0xb0] ss:$8 sps:$4 sm:$0xff]  }
  0x94   : > { %5236 = vmatpush3.bf16.msra.mxu0 %v5855_v12  ;;  %v5871_v12 = vld [vmem:[#allocation6 + $0xa8] sm:$0xff]  }
  0x95   : > { %5237 = vmatprep.subr.bf16.mxu0 %v5856_v13 }
  0x97   : > { %5230 = vmatmul.mubr.bf16.gmra.mrb[4].mxu0 %v5862_v14  ;;  %v746_v14 = vor.u32 %v745_v2, %v742_v60  ;;  %v5877_v60 = vld [vmem:[#allocation6 + $0xc8] sm:$0xff]   ;;  %v5884_v2 = vld [vmem:[%s6421_s21 + $0x90] ss:$8 sps:$4 sm:$0xff]  }
  0x98   : > { %5238 = vmatpush3.bf16.msra.mxu0 %v5856_v13  ;;  %5249 = vmatprep.mubr.bf16.mxu0 %v5864_v15  ;;  %v732_v13 = vor.u32 %v731_v59, %v728_v56  ;;  %v756_v15 = vrot.slane %v754_v3, 4  ;;  %v5880_v3 = vld [vmem:[#allocation6 + $0xe0] sm:$0xff]  }
  0x99   : > { %5239 = vmatprep.subr.bf16.mxu0 %v5857_v16 }
  0x9a   : > { %v733_v26 = vrot.slane %v732_v13, 4  ;;  %v5889_v13 = vld [vmem:[#allocation6 + $0x118] sm:$0xff]  }
  0x9c   : > { %5240 = vmatpush3.bf16.msra.mxu0 %v5857_v16  ;;  %v763_v16 = vshll.u32 %v687_v1, 16  ;;  %v738_v44 = vsel %vm6446_vm2, %v733_v26, %v737_v24  ;;  %v4732_v24 = vld [vmem:[%s6421_s21 + $0x94] sm:$0x1] }
  0x9d   : > { %5241 = vmatprep.subr.bf16.mxu0 %v5858_v17 }
  0x9e   : > { %v765_v32 = vrot.slane %v763_v16, 5  ;;  %v4731_v16 = vld [vmem:[%s6421_s21 + $0x90] sm:$0xf] }
  0x9f   : > { %v1325_v20 = vshll.u32 %v4731_v16, 16 }
  0xa0   : > { %5242 = vmatpush3.bf16.msra.mxu0 %v5858_v17  ;;  %v759_v17 = vrot.slane %v757_v5, 5  ;;  %v5882_v5 = vld [vmem:[#allocation6 + $0xf0] sm:$0xff]  }
  0xa1   : > { %5243 = vmatprep.subr.bf16.mxu0 %v5859_v18 }
  0xa2   : > { %v760_v31 = vor.u32 %v759_v17, %v756_v15  ;;  %v5890_v15 = vld [vmem:[#allocation6 + $0x120] sm:$0xff]   ;;  %v5891_v17 = vld [vmem:[#allocation6 + $0x128] sm:$0xff]  }
  0xa4   : > { %5244 = vmatpush3.bf16.msra.mxu0 %v5859_v18  ;;  %v770_v18 = vrot.slane %v768_v6, 4  ;;  %v5883_v6 = vld [vmem:[#allocation6 + $0xf8] sm:$0xff]  }
  0xa5   : > { %5245 = vmatprep.subr.bf16.mxu0 %v5861_v23 }
  0xa6   : > { %v774_v33 = vor.u32 %v773_v19, %v770_v18  ;;  %v4733_v18 = vld [vmem:[%s6421_s21 + $0x98] sm:$0xf]  ;;  %v1322_v19 = vshrl.u32 %v4731_v16, 16 }
  0xa8   : > { %5246 = vmatpush3.bf16.msra.mxu0 %v5861_v23  ;;  %v785_v23 = vshll.u32 %v690_v11, 16  ;;  %v775_v43 = vrot.slane %v774_v33, 4  ;;  %v5888_v11 = vld [vmem:[#allocation6 + $0x110] sm:$0xff]   ;;  %v1324_v26 = vrot.slane %v1322_v19, 4  ;;  %v1331_v33 = vshll.u32 %v4732_v24, 16 }
  0xa9   : > { %5247 = vmatprep.subr.bf16.mxu0 %v5863_v27 }
  0xaa   : > { %v787_v37 = vrot.slane %v785_v23, 5  ;;  %v780_v53 = vsel %vm6446_vm2, %v775_v43, %v779_v34  ;;  %v1339_v23 = vshll.u32 %v4733_v18, 16 }
  0xac   : > { %5248 = vmatpush3.bf16.msra.mxu0 %v5863_v27  ;;  %v747_v27 = vrot.slane %v746_v14, 4  ;;  %v5896_v14 = vld [vmem:[%s6421_s21 + $0xd8] ss:$8 sps:$4 sm:$0xff]  }
  0xad   : > { %5257 = vmatprep.subr.bf16.mxu0 %v5865_v35 }
  0xae   : > { %v752_v46 = vsel %vm6446_vm2, %v747_v27, %v751_v25  ;;  %v4734_v25 = vld [vmem:[%s6421_s21 + $0x9c] sm:$0x1]  ;;  %v1327_v27 = vrot.slane %v1325_v20, 5 }
  0xaf   : > { %5250 = vmatmul.mubr.bf16.vlgmr.msra.gmra.mrb[0].mxu0 %v5866_v36  ;;  %v784_v36 = vrot.slane %v782_v22, 4  ;;  %v1336_v22 = vshrl.u32 %v4733_v18, 16  ;;  %v1345_v34 = vshll.u32 %v4734_v25, 16 }
  0xb0   : > { %5258 = vmatpush3.bf16.msra.mxu0 %v5865_v35  ;;  %5253 = vmatprep.mubr.bf16.mxu0 %v5872_v39  ;;  %v691_v35 = vld [vmem:[%s6421_s21 + $0x34] sm:$0x1]  ;;  %v693_v39 = vld [vmem:[%s6421_s21 + $0x3c] sm:$0x1] }
  0xb1   : > { %5259 = vmatprep.subr.bf16.mxu0 %v5867_v42  ;;  %v791_v45 = vshll.u32 %v691_v35, 16  ;;  %v788_v48 = vor.u32 %v787_v37, %v784_v36  ;;  %v805_v50 = vshll.u32 %v693_v39, 16  ;;  %v1338_v29 = vrot.slane %v1336_v22, 4  ;;  %v4739_v35 = vld [vmem:[%s6421_s21 + $0xb0] sm:$0xf]  ;;  %v5897_v39 = vld [vmem:[#allocation6 + $0x140] sm:$0xff]  }
  0xb2   : > { %v1328_v36 = vor.u32 %v1327_v27, %v1324_v26 }
  0xb3   : > { %v789_v57 = vrot.slane %v788_v48, 4  ;;  %v807_v59 = vrot.slane %v805_v50, 5  ;;  %v1381_v48 = vshll.u32 %v4739_v35, 16  ;;  %v1333_v50 = vrot.slane %v1331_v33, 5 }
  0xb4   : > { %5260 = vmatpush3.bf16.msra.mxu0 %v5867_v42  ;;  %v761_v42 = vrot.slane %v760_v31, 4  ;;  %v4735_v31 = vld [vmem:[%s6421_s21 + $0xa0] sm:$0xf] }
  0xb5   : > { %5261 = vmatprep.subr.bf16.mxu0 %v5868_v51  ;;  %v1350_v37 = vshrl.u32 %v4735_v31, 16  ;;  %v1353_v41 = vshll.u32 %v4735_v31, 16  ;;  %v5902_v31 = vld [vmem:[#allocation6 + $0x160] sm:$0xff]  }
  0xb6   : > { %v766_v52 = vsel %vm6446_vm2, %v761_v42, %v765_v32  ;;  %v4737_v32 = vld [vmem:[%s6421_s21 + $0xa8] sm:$0xf] }
  0xb7   : > { %5254 = vmatmul.mubr.bf16.gmra.mrb[4].mxu0 %v5874_v54  ;;  %v4680_v54 = vcombine.low %v738_v44, %v752_v46  ;;  %v4681_v56 = vcombine.low %v766_v52, %v780_v53  ;;  %v1364_v42 = vshrl.u32 %v4737_v32, 16  ;;  %v1367_v43 = vshll.u32 %v4737_v32, 16  ;;  %v5898_v44 = vld [vmem:[%s6421_s21 + $0xe8] ss:$8 sps:$4 sm:$0xff]   ;;  %v4736_v52 = vld [vmem:[%s6421_s21 + $0xa4] sm:$0x1] }
  0xb8   : > { %5262 = vmatpush3.bf16.msra.mxu0 %v5868_v51  ;;  %5273 = vmatprep.mubr.bf16.mxu0 %v4679_v58  ;;  %v5876_v51 = vld [vmem:[#allocation6 + $0xc0] sm:$0xff]   ;;  %v803_v58 = vrot.slane %v802_v49, 4  ;;  %v1378_v46 = vshrl.u32 %v4739_v35, 16  ;;  %v5899_v49 = vld [vmem:[#allocation6 + $0x148] sm:$0xff]  }
  0xb9   : > { %5263 = vmatprep.subr.bf16.mxu0 %v5869_v55 }
  0xba   : > { %v808_v62 = vsel %vm6446_vm2, %v803_v58, %v807_v59  ;;  %v1355_v59 = vrot.slane %v1353_v41, 5  ;;  %v5905_v41 = vld [vmem:[#allocation6 + $0x170] sm:$0xff]  }
  0xbc   : > { %5264 = vmatpush3.bf16.msra.mxu0 %v5869_v55  ;;  %v793_v55 = vrot.slane %v791_v45, 5  ;;  %v5904_v45 = vld [vmem:[%s6421_s21 + $0xf8] ss:$8 sps:$4 sm:$0xff]  }
  0xbd   : > { %5265 = vmatprep.subr.bf16.mxu0 %v5870_v4 }
  0xbe   : > { %v794_v61 = vsel %vm6446_vm2, %v789_v57, %v793_v55  ;;  %v1329_v55 = vrot.slane %v1328_v36, 4  ;;  %v1352_v57 = vrot.slane %v1350_v37, 4  ;;  %v5940_v36 = vld [vmem:[#allocation8 + $0x40] sm:$0xff]   ;;  %v5941_v37 = vld [vmem:[#allocation8 + $0x48] sm:$0xff]  }
  0xbf   : > { %v4682_v1 = vcombine.low %v794_v61, %v808_v62  ;;  %v1369_v61 = vrot.slane %v1367_v43, 5  ;;  %v4740_v62 = vld [vmem:[%s6421_s21 + $0xb4] sm:$0x1]  ;;  %5425 = vmatprep.subr.bf16.mxu1 %v5940_v36  ;;  %v5907_v43 = vld [vmem:[#allocation6 + $0x178] sm:$0xff]  }
  0xc0   : > { %5266 = vmatpush3.bf16.msra.mxu0 %v5870_v4  ;;  %v5881_v4 = vld [vmem:[#allocation6 + $0xe8] sm:$0xff]   ;;  %5426 = vmatpush3.bf16.msra.mxu1 %v5940_v36 }
  0xc1   : > { %5267 = vmatprep.subr.bf16.mxu0 %v5871_v12  ;;  %5427 = vmatprep.subr.bf16.mxu1 %v5941_v37 }
  0xc4   : > { %5268 = vmatpush3.bf16.msra.mxu0 %v5871_v12  ;;  %v5894_v12 = vld [vmem:[%s6421_s21 + $0xc0] ss:$8 sps:$4 sm:$0xff]   ;;  %5428 = vmatpush3.bf16.msra.mxu1 %v5941_v37 }
  0xc5   : > { %5269 = vmatprep.subr.bf16.mxu0 %v5873_v30  ;;  %v5930_v37 = vld [vmem:[%s6421_s21 + $0x60] ss:$8 sps:$4 sm:$0xff]  }
  0xc8   : > { %5270 = vmatpush3.bf16.msra.mxu0 %v5873_v30  ;;  %v1341_v30 = vrot.slane %v1339_v23, 5 }
  0xc9   : > { %5271 = vmatprep.subr.bf16.mxu0 %v5875_v38 }
  0xca   : > { %v1342_v40 = vor.u32 %v1341_v30, %v1338_v29 }
  0xcc   : > { %5272 = vmatpush3.bf16.msra.mxu0 %v5875_v38  ;;  %v4741_v38 = vld [vmem:[%s6421_s21 + $0xb8] sm:$0xf]  ;;  %v1343_v58 = vrot.slane %v1342_v40, 4  ;;  %v5903_v40 = vld [vmem:[#allocation6 + $0x168] sm:$0xff]  }
  0xcd   : > { %5281 = vmatprep.subr.bf16.mxu0 %v5876_v51  ;;  %v1392_v53 = vshrl.u32 %v4741_v38, 16 }
  0xcf   : > { %5274 = vmatmul.mubr.bf16.vlgmr.msra.gmra.mrb[0].mxu0 %v4680_v54  ;;  %v1395_v54 = vshll.u32 %v4741_v38, 16 }
  0xd0   : > { %5282 = vmatpush3.bf16.msra.mxu0 %v5876_v51  ;;  %5277 = vmatprep.mubr.bf16.mxu0 %v4681_v56  ;;  %v1347_v51 = vrot.slane %v1345_v34, 5  ;;  %v4738_v56 = vld [vmem:[%s6421_s21 + $0xac] sm:$0x1] }
  0xd1   : > { %5283 = vmatprep.subr.bf16.mxu0 %v5877_v60 }
  0xd4   : > { %5284 = vmatpush3.bf16.msra.mxu0 %v5877_v60  ;;  %v1366_v60 = vrot.slane %v1364_v42, 4  ;;  %v4744_v42 = vld [vmem:[%s6421_s21 + $0xc4] sm:$0x1] }
  0xd5   : > { %5285 = vmatprep.subr.bf16.mxu0 %v5878_v63 }
  0xd7   : > { %5278 = vmatmul.mubr.bf16.gmra.mrb[4].mxu0 %v4682_v1  ;;  %v1359_v1 = vshll.u32 %v4736_v52, 16  ;;  %v5908_v52 = vld [vmem:[#allocation6 + $0x180] sm:$0xff]  }
  0xd8   : > { %5286 = vmatpush3.bf16.msra.mxu0 %v5878_v63  ;;  %5297 = vmatprep.mubr.bf16.mxu0 %v5884_v2  ;;  %v1380_v63 = vrot.slane %v1378_v46, 4  ;;  %v1373_v2 = vshll.u32 %v4738_v56, 16  ;;  %v1415_v46 = vshll.u32 %v4744_v42, 16 }
  0xd9   : > { %5287 = vmatprep.subr.bf16.mxu0 %v5879_v0  ;;  %v1361_v23 = vrot.slane %v1359_v1, 5 }
  0xda   : > { %v1375_v24 = vrot.slane %v1373_v2, 5  ;;  %v1417_v56 = vrot.slane %v1415_v46, 5  ;;  %v5916_v2 = vld [vmem:[%s6421_s21 + $0x8] ss:$8 sps:$4 sm:$0xff]  }
  0xdc   : > { %5288 = vmatpush3.bf16.msra.mxu0 %v5879_v0  ;;  %v1383_v0 = vrot.slane %v1381_v48, 5 }
  0xdd   : > { %5289 = vmatprep.subr.bf16.mxu0 %v5880_v3 }
  0xe0   : > { %5290 = vmatpush3.bf16.msra.mxu0 %v5880_v3  ;;  %v4742_v3 = vld [vmem:[%s6421_s21 + $0xbc] sm:$0x1] }
  0xe1   : > { %5291 = vmatprep.subr.bf16.mxu0 %v5881_v4  ;;  %v1401_v16 = vshll.u32 %v4742_v3, 16  ;;  %v5911_v3 = vld [vmem:[#allocation6 + $0x198] sm:$0xff]  }
  0xe3   : > { %v1403_v30 = vrot.slane %v1401_v16, 5  ;;  %v5922_v16 = vld [vmem:[#allocation6 + $0x1e0] sm:$0xff]  }
  0xe4   : > { %5292 = vmatpush3.bf16.msra.mxu0 %v5881_v4  ;;  %v1394_v4 = vrot.slane %v1392_v53, 4 }
  0xe5   : > { %5293 = vmatprep.subr.bf16.mxu0 %v5882_v5 }
  0xe8   : > { %5294 = vmatpush3.bf16.msra.mxu0 %v5882_v5  ;;  %v1397_v5 = vrot.slane %v1395_v54, 5 }
  0xe9   : > { %5295 = vmatprep.subr.bf16.mxu0 %v5883_v6 }
  0xea   : > { %v1398_v18 = vor.u32 %v1397_v5, %v1394_v4  ;;  %v5912_v4 = vld [vmem:[#allocation6 + $0x1a0] sm:$0xff]   ;;  %v5913_v5 = vld [vmem:[#allocation6 + $0x1a8] sm:$0xff]  }
  0xec   : > { %5296 = vmatpush3.bf16.msra.mxu0 %v5883_v6  ;;  %v1334_v6 = vsel %vm6446_vm2, %v1329_v55, %v1333_v50  ;;  %v1399_v32 = vrot.slane %v1398_v18, 4  ;;  %v4799_v18 = vld [vmem:[%s6421_s21 + $0x8] sm:$0xf] }
  0xed   : > { %5305 = vmatprep.subr.bf16.mxu0 %v5885_v7 }
  0xee   : > { %v1404_v54 = vsel %vm6446_vm2, %v1399_v32, %v1403_v30  ;;  %v4800_v30 = vld [vmem:[%s6421_s21 + $0xc] sm:$0x1]  ;;  %v5929_v32 = vld [vmem:[#allocation6 + $0x200] sm:$0xff]  }
  0xef   : > { %5298 = vmatmul.mubr.bf16.vlgmr.msra.gmra.mrb[0].mxu0 %v5886_v8  ;;  %v4745_v8 = vld [vmem:[%s6421_s21 + $0xc8] sm:$0xf] }
  0xf0   : > { %5306 = vmatpush3.bf16.msra.mxu0 %v5885_v7  ;;  %5301 = vmatprep.mubr.bf16.mxu0 %v5892_v9  ;;  %v4743_v7 = vld [vmem:[%s6421_s21 + $0xc0] sm:$0xf]  ;;  %v5900_v9 = vld [vmem:[#allocation6 + $0x150] sm:$0xff]  }
  0xf1   : > { %5307 = vmatprep.subr.bf16.mxu0 %v5887_v10  ;;  %v1406_v19 = vshrl.u32 %v4743_v7, 16  ;;  %v1409_v20 = vshll.u32 %v4743_v7, 16  ;;  %v5915_v7 = vld [vmem:[#allocation6 + $0x1b8] sm:$0xff]  }
  0xf3   : > { %v1408_v33 = vrot.slane %v1406_v19, 4  ;;  %v1411_v34 = vrot.slane %v1409_v20, 5  ;;  %v4801_v19 = vld [vmem:[%s6421_s21 + $0x10] sm:$0xf] }
  0xf4   : > { %5308 = vmatpush3.bf16.msra.mxu0 %v5887_v10  ;;  %v1348_v10 = vsel %vm6446_vm2, %v1343_v58, %v1347_v51  ;;  %v5925_v20 = vld [vmem:[#allocation6 + $0x1f0] sm:$0xff]  }
  0xf5   : > { %5309 = vmatprep.subr.bf16.mxu0 %v5888_v11  ;;  %v4747_v22 = vcombine.low %v1334_v6, %v1348_v10  ;;  %v5914_v6 = vld [vmem:[#allocation6 + $0x1b0] sm:$0xff]  }
  0xf6   : > { %v5924_v10 = vld [vmem:[%s6421_s21 + $0x28] ss:$8 sps:$4 sm:$0xff]  }
  0xf7   : > { %5302 = vmatmul.mubr.bf16.gmra.mrb[4].mxu0 %v5894_v12  ;;  %v1370_v12 = vor.u32 %v1369_v61, %v1366_v60  ;;  %v5909_v61 = vld [vmem:[#allocation6 + $0x188] sm:$0xff]  }
  0xf8   : > { %5310 = vmatpush3.bf16.msra.mxu0 %v5888_v11  ;;  %5321 = vmatprep.mubr.bf16.mxu0 %v5896_v14  ;;  %v1356_v11 = vor.u32 %v1355_v59, %v1352_v57  ;;  %v5906_v14 = vld [vmem:[%s6421_s21 + $0x108] ss:$8 sps:$4 sm:$0xff]  }
  0xf9   : > { %5311 = vmatprep.subr.bf16.mxu0 %v5889_v13  ;;  %v1371_v26 = vrot.slane %v1370_v12, 4  ;;  %v5920_v12 = vld [vmem:[#allocation6 + $0x1d0] sm:$0xff]  }
  0xfa   : > { %v1357_v25 = vrot.slane %v1356_v11, 4  ;;  %v5919_v11 = vld [vmem:[#allocation6 + $0x1c8] sm:$0xff]  }
  0xfb   : > { %v1376_v48 = vsel %vm6446_vm2, %v1371_v26, %v1375_v24  ;;  %v1963_v24 = vshll.u32 %v4801_v19, 16 }
  0xfc   : > { %5312 = vmatpush3.bf16.msra.mxu0 %v5889_v13  ;;  %v1387_v13 = vshll.u32 %v4740_v62, 16 }
  0xfd   : > { %5313 = vmatprep.subr.bf16.mxu0 %v5890_v15 }
  0xfe   : > { %v1389_v27 = vrot.slane %v1387_v13, 5  ;;  %v5926_v13 = vld [vmem:[%s6421_s21 + $0x38] ss:$8 sps:$4 sm:$0xff]  }
 0x100   : > { %5314 = vmatpush3.bf16.msra.mxu0 %v5890_v15  ;;  %v1384_v15 = vor.u32 %v1383_v0, %v1380_v63  ;;  %v5910_v0 = vld [vmem:[#allocation6 + $0x190] sm:$0xff]  }
 0x101   : > { %5315 = vmatprep.subr.bf16.mxu0 %v5891_v17 }
 0x102   : > { %v1385_v29 = vrot.slane %v1384_v15, 4  ;;  %v5921_v15 = vld [vmem:[#allocation6 + $0x1d8] sm:$0xff]  }
 0x104   : > { %5316 = vmatpush3.bf16.msra.mxu0 %v5891_v17  ;;  %v5901_v17 = vld [vmem:[#allocation6 + $0x158] sm:$0xff]   ;;  %v1390_v53 = vsel %vm6446_vm2, %v1385_v29, %v1389_v27  ;;  %v1965_v29 = vrot.slane %v1963_v24, 5 }
 0x105   : > { %5317 = vmatprep.subr.bf16.mxu0 %v5893_v21  ;;  %v4749_v57 = vcombine.low %v1390_v53, %v1404_v54  ;;  %v4807_v53 = vld [vmem:[%s6421_s21 + $0x28] sm:$0xf]  ;;  %v4809_v54 = vld [vmem:[%s6421_s21 + $0x30] sm:$0xf] }
 0x108   : > { %5318 = vmatpush3.bf16.msra.mxu0 %v5893_v21  ;;  %v1420_v21 = vshrl.u32 %v4745_v8, 16 }
 0x109   : > { %5319 = vmatprep.subr.bf16.mxu0 %v5895_v28 }
 0x10a   : > { %v1422_v35 = vrot.slane %v1420_v21, 4  ;;  %v1946_v21 = vshrl.u32 %v4799_v18, 16 }
 0x10c   : > { %5320 = vmatpush3.bf16.msra.mxu0 %v5895_v28  ;;  %v1423_v28 = vshll.u32 %v4745_v8, 16  ;;  %v5917_v8 = vld [vmem:[#allocation6 + $0x1c0] sm:$0xff]   ;;  %v1948_v26 = vrot.slane %v1946_v21, 4 }
 0x10d   : > { %5329 = vmatprep.subr.bf16.mxu0 %v5897_v39 }
 0x10e   : > { %v1425_v38 = vrot.slane %v1423_v28, 5 }
 0x10f   : > { %5322 = vmatmul.mubr.bf16.vlgmr.msra.gmra.mrb[0].mxu0 %v5898_v44  ;;  %v4746_v44 = vld [vmem:[%s6421_s21 + $0xcc] sm:$0x1] }
 0x110   : > { %5330 = vmatpush3.bf16.msra.mxu0 %v5897_v39  ;;  %5325 = vmatprep.mubr.bf16.mxu0 %v5904_v45  ;;  %v5942_v39 = vld [vmem:[#allocation8 + $0x50] sm:$0xff]   ;;  %v1362_v45 = vsel %vm6446_vm2, %v1357_v25, %v1361_v23  ;;  %v1426_v50 = vor.u32 %v1425_v38, %v1422_v35  ;;  %v1429_v51 = vshll.u32 %v4746_v44, 16  ;;  %v1960_v23 = vshrl.u32 %v4801_v19, 16  ;;  %v5927_v25 = vld [vmem:[#allocation6 + $0x1f8] sm:$0xff]  }
 0x111   : > { %5331 = vmatprep.subr.bf16.mxu0 %v5899_v49  ;;  %5429 = vmatprep.subr.bf16.mxu1 %v5942_v39  ;;  %v4748_v55 = vcombine.low %v1362_v45, %v1376_v48  ;;  %v5936_v38 = vld [vmem:[%s6421_s21 + $0x70] ss:$8 sps:$4 sm:$0xff]   ;;  %v5937_v48 = vld [vmem:[%s6421_s21 + $0x80] ss:$8 sps:$4 sm:$0xff]  }
 0x112   : > { %5430 = vmatpush3.bf16.msra.mxu1 %v5942_v39  ;;  %v1427_v59 = vrot.slane %v1426_v50, 4  ;;  %v1431_v60 = vrot.slane %v1429_v51, 5  ;;  %v1962_v28 = vrot.slane %v1960_v23, 4  ;;  %v5931_v39 = vld [vmem:[#allocation6 + $0x208] sm:$0xff]   ;;  %v5932_v44 = vld [vmem:[#allocation6 + $0x210] sm:$0xff]  }
 0x113   : > { %v4803_v50 = vld [vmem:[%s6421_s21 + $0x18] sm:$0xf]  ;;  %v4805_v51 = vld [vmem:[%s6421_s21 + $0x20] sm:$0xf]  ;;  %v5938_v23 = vld [vmem:[#allocation6 + $0x230] sm:$0xff]  }
 0x114   : > { %5332 = vmatpush3.bf16.msra.mxu0 %v5899_v49  ;;  %v1412_v49 = vor.u32 %v1411_v34, %v1408_v33  ;;  %v1432_v63 = vsel %vm6446_vm2, %v1427_v59, %v1431_v60  ;;  %v1955_v34 = vshll.u32 %v4800_v30, 16  ;;  %v1966_v35 = vor.u32 %v1965_v29, %v1962_v28  ;;  %v5934_v59 = vld [vmem:[#allocation6 + $0x220] sm:$0xff]   ;;  %v5939_v28 = vld [vmem:[#allocation6 + $0x238] sm:$0xff]  }
 0x115   : > { %5333 = vmatprep.subr.bf16.mxu0 %v5900_v9  ;;  %v2002_v60 = vshrl.u32 %v4807_v53, 16 }
 0x116   : > { %v1413_v58 = vrot.slane %v1412_v49, 4  ;;  %v1967_v42 = vrot.slane %v1966_v35, 4 }
 0x117   : > { %5326 = vmatmul.mubr.bf16.gmra.mrb[4].mxu0 %v5906_v14  ;;  %v5928_v14 = vld [vmem:[%s6421_s21 + $0x50] ss:$8 sps:$4 sm:$0xff]  }
 0x118   : > { %5334 = vmatpush3.bf16.msra.mxu0 %v5900_v9  ;;  %5345 = vmatprep.mubr.bf16.mxu0 %v4747_v22  ;;  %v1418_v62 = vsel %vm6446_vm2, %v1413_v58, %v1417_v56  ;;  %v5918_v9 = vld [vmem:[%s6421_s21 + $0x18] ss:$8 sps:$4 sm:$0xff]   ;;  %v1949_v22 = vshll.u32 %v4799_v18, 16  ;;  %v1977_v56 = vshll.u32 %v4803_v50, 16  ;;  %v1991_v58 = vshll.u32 %v4805_v51, 16 }
 0x119   : > { %5335 = vmatprep.subr.bf16.mxu0 %v5901_v17  ;;  %v4750_v1 = vcombine.low %v1418_v62, %v1432_v63  ;;  %v2016_v62 = vshrl.u32 %v4809_v54, 16  ;;  %v2019_v63 = vshll.u32 %v4809_v54, 16 }
 0x11a   : > { %v1951_v27 = vrot.slane %v1949_v22, 5 }
 0x11c   : > { %5336 = vmatpush3.bf16.msra.mxu0 %v5901_v17  ;;  %v5923_v17 = vld [vmem:[#allocation6 + $0x1e8] sm:$0xff]   ;;  %v1952_v33 = vor.u32 %v1951_v27, %v1948_v26 }
 0x11d   : > { %5337 = vmatprep.subr.bf16.mxu0 %v5902_v31 }
 0x120   : > { %5338 = vmatpush3.bf16.msra.mxu0 %v5902_v31  ;;  %v4802_v31 = vld [vmem:[%s6421_s21 + $0x14] sm:$0x1] }
 0x121   : > { %5339 = vmatprep.subr.bf16.mxu0 %v5903_v40  ;;  %v1969_v36 = vshll.u32 %v4802_v31, 16 }
 0x124   : > { %5340 = vmatpush3.bf16.msra.mxu0 %v5903_v40  ;;  %v1953_v40 = vrot.slane %v1952_v33, 4  ;;  %v4812_v33 = vld [vmem:[%s6421_s21 + $0x3c] sm:$0x1] }
 0x125   : > { %5341 = vmatprep.subr.bf16.mxu0 %v5905_v41 }
 0x128   : > { %5342 = vmatpush3.bf16.msra.mxu0 %v5905_v41  ;;  %v1957_v41 = vrot.slane %v1955_v34, 5 }
 0x129   : > { %5343 = vmatprep.subr.bf16.mxu0 %v5907_v43 }
 0x12a   : > { %v1958_v45 = vsel %vm6446_vm2, %v1953_v40, %v1957_v41 }
 0x12c   : > { %5344 = vmatpush3.bf16.msra.mxu0 %v5907_v43  ;;  %v1971_v43 = vrot.slane %v1969_v36, 5 }
 0x12d   : > { %5353 = vmatprep.subr.bf16.mxu0 %v5908_v52 }
 0x12e   : > { %v1972_v46 = vsel %vm6446_vm2, %v1967_v42, %v1971_v43  ;;  %v4814_v42 = vld [vmem:[%s6421_s21 + $0x44] sm:$0x1] }
 0x12f   : > { %5346 = vmatmul.mubr.bf16.vlgmr.msra.gmra.mrb[0].mxu0 %v4748_v55  ;;  %v4815_v49 = vcombine.low %v1958_v45, %v1972_v46  ;;  %v1974_v55 = vshrl.u32 %v4803_v50, 16 }
 0x130   : > { %5354 = vmatpush3.bf16.msra.mxu0 %v5908_v52  ;;  %5349 = vmatprep.mubr.bf16.mxu0 %v4749_v57  ;;  %v5933_v52 = vld [vmem:[#allocation6 + $0x218] sm:$0xff]   ;;  %v1988_v57 = vshrl.u32 %v4805_v51, 16 }
 0x131   : > { %5355 = vmatprep.subr.bf16.mxu0 %v5909_v61 }
 0x134   : > { %5356 = vmatpush3.bf16.msra.mxu0 %v5909_v61  ;;  %v2005_v61 = vshll.u32 %v4807_v53, 16 }
 0x135   : > { %5357 = vmatprep.subr.bf16.mxu0 %v5910_v0 }
 0x137   : > { %5350 = vmatmul.mubr.bf16.gmra.mrb[4].mxu0 %v4750_v1  ;;  %v1976_v1 = vrot.slane %v1974_v55, 4 }
 0x138   : > { %5358 = vmatpush3.bf16.msra.mxu0 %v5910_v0  ;;  %5369 = vmatprep.mubr.bf16.mxu0 %v5916_v2  ;;  %v5935_v0 = vld [vmem:[#allocation6 + $0x228] sm:$0xff]   ;;  %v1979_v2 = vrot.slane %v1977_v56, 5 }
 0x139   : > { %5359 = vmatprep.subr.bf16.mxu0 %v5911_v3 }
 0x13c   : > { %5360 = vmatpush3.bf16.msra.mxu0 %v5911_v3  ;;  %v1990_v3 = vrot.slane %v1988_v57, 4 }
 0x13d   : > { %5361 = vmatprep.subr.bf16.mxu0 %v5912_v4 }
 0x140   : > { %5362 = vmatpush3.bf16.msra.mxu0 %v5912_v4  ;;  %v1993_v4 = vrot.slane %v1991_v58, 5 }
 0x141   : > { %5363 = vmatprep.subr.bf16.mxu0 %v5913_v5 }
 0x144   : > { %5364 = vmatpush3.bf16.msra.mxu0 %v5913_v5  ;;  %v4804_v5 = vld [vmem:[%s6421_s21 + $0x1c] sm:$0x1] }
 0x145   : > { %5365 = vmatprep.subr.bf16.mxu0 %v5914_v6 }
 0x148   : > { %5366 = vmatpush3.bf16.msra.mxu0 %v5914_v6  ;;  %v4806_v6 = vld [vmem:[%s6421_s21 + $0x24] sm:$0x1] }
 0x149   : > { %5367 = vmatprep.subr.bf16.mxu0 %v5915_v7  ;;  %v1997_v18 = vshll.u32 %v4806_v6, 16  ;;  %v4828_v6 = vld [vmem:[%s6847_s3] ss:$0 sm:$0xff] }
 0x14c   : > { %5368 = vmatpush3.bf16.msra.mxu0 %v5915_v7  ;;  %v4811_v7 = vld [vmem:[%s6421_s21 + $0x38] sm:$0xf] }
 0x14d   : > { %5377 = vmatprep.subr.bf16.mxu0 %v5917_v8  ;;  %v2030_v19 = vshrl.u32 %v4811_v7, 16 }
 0x14f   : > { %5370 = vmatmul.mubr.bf16.vlgmr.msra.gmra.mrb[0].mxu0 %v5918_v9  ;;  %v2007_v9 = vrot.slane %v2005_v61, 5  ;;  %v2032_v34 = vrot.slane %v2030_v19, 4  ;;  %v5943_v61 = vld [vmem:[#allocation8 + $0x58] sm:$0xff]  }
 0x150   : > { %5378 = vmatpush3.bf16.msra.mxu0 %v5917_v8  ;;  %5373 = vmatprep.mubr.bf16.mxu0 %v5924_v10  ;;  %v2004_v8 = vrot.slane %v2002_v60, 4  ;;  %v2018_v10 = vrot.slane %v2016_v62, 4  ;;  %v5944_v62 = vld [vmem:[#allocation8 + $0x60] sm:$0xff]  }
 0x151   : > { %5379 = vmatprep.subr.bf16.mxu0 %v5919_v11  ;;  %5431 = vmatprep.subr.bf16.mxu1 %v5943_v61 }
 0x152   : > { %v2008_v24 = vor.u32 %v2007_v9, %v2004_v8  ;;  %5432 = vmatpush3.bf16.msra.mxu1 %v5943_v61 }
 0x153   : > { %5433 = vmatprep.subr.bf16.mxu1 %v5944_v62 }
 0x154   : > { %5380 = vmatpush3.bf16.msra.mxu0 %v5919_v11  ;;  %v2021_v11 = vrot.slane %v2019_v63, 5  ;;  %v5945_v63 = vld [vmem:[#allocation8 + $0x68] sm:$0xff]  }
 0x155   : > { %5381 = vmatprep.subr.bf16.mxu0 %v5920_v12 }
 0x156   : > { %v2022_v26 = vor.u32 %v2021_v11, %v2018_v10  ;;  %5434 = vmatpush3.bf16.msra.mxu1 %v5944_v62 }
 0x157   : > { %5374 = vmatmul.mubr.bf16.gmra.mrb[4].mxu0 %v5926_v13  ;;  %v4808_v13 = vld [vmem:[%s6421_s21 + $0x2c] sm:$0x1]  ;;  %5435 = vmatprep.subr.bf16.mxu1 %v5945_v63 }
 0x158   : > { %5382 = vmatpush3.bf16.msra.mxu0 %v5920_v12  ;;  %5393 = vmatprep.mubr.bf16.mxu0 %v5928_v14  ;;  %v4813_v12 = vld [vmem:[%s6421_s21 + $0x40] sm:$0xf]  ;;  %v4810_v14 = vld [vmem:[%s6421_s21 + $0x34] sm:$0x1]  ;;  %v2023_v40 = vrot.slane %v2022_v26, 4 }
 0x159   : > { %5383 = vmatprep.subr.bf16.mxu0 %v5921_v15  ;;  %v2044_v21 = vshrl.u32 %v4813_v12, 16  ;;  %v2047_v22 = vshll.u32 %v4813_v12, 16  ;;  %v2025_v27 = vshll.u32 %v4810_v14, 16 }
 0x15a   : > { %5436 = vmatpush3.bf16.msra.mxu1 %v5945_v63  ;;  %v5951_v63 = vld [vmem:[#allocation8 + $0x8] sm:$0xff]  }
 0x15b   : > { %v2046_v36 = vrot.slane %v2044_v21, 4  ;;  %v2027_v41 = vrot.slane %v2025_v27, 5 }
 0x15c   : > { %5384 = vmatpush3.bf16.msra.mxu0 %v5921_v15  ;;  %v1980_v15 = vor.u32 %v1979_v2, %v1976_v1  ;;  %v5946_v1 = vld [vmem:[#allocation8 + $0x70] sm:$0xff]   ;;  %v5947_v2 = vld [vmem:[#allocation8 + $0x78] sm:$0xff]  }
 0x15d   : > { %5385 = vmatprep.subr.bf16.mxu0 %v5922_v16  ;;  %v2028_v51 = vsel %vm6446_vm2, %v2023_v40, %v2027_v41  ;;  %5437 = vmatprep.subr.bf16.mxu1 %v5946_v1 }
 0x15e   : > { %v1981_v29 = vrot.slane %v1980_v15, 4  ;;  %5438 = vmatpush3.bf16.msra.mxu1 %v5946_v1 }
 0x15f   : > { %5439 = vmatprep.subr.bf16.mxu1 %v5947_v2 }
 0x160   : > { %5386 = vmatpush3.bf16.msra.mxu0 %v5922_v16  ;;  %v1983_v16 = vshll.u32 %v4804_v5, 16 }
 0x161   : > { %5387 = vmatprep.subr.bf16.mxu0 %v5923_v17 }
 0x162   : > { %v1985_v30 = vrot.slane %v1983_v16, 5  ;;  %5440 = vmatpush3.bf16.msra.mxu1 %v5947_v2 }
 0x164   : > { %5388 = vmatpush3.bf16.msra.mxu0 %v5923_v17  ;;  %v1994_v17 = vor.u32 %v1993_v4, %v1990_v3  ;;  %v1986_v43 = vsel %vm6446_vm2, %v1981_v29, %v1985_v30  ;;  %v6557_v3 = vld [vmem:[#allocation8] sm:$0xff]   ;;  %v4827_v4 = vld [vmem:[%s6846_s2] ss:$0 sm:$0xff] }
 0x165   : > { %5389 = vmatprep.subr.bf16.mxu0 %v5925_v20  ;;  %5449 = vmatprep.subr.bf16.mxu1 %v6557_v3 }
 0x166   : > { %v1995_v31 = vrot.slane %v1994_v17, 4 }
 0x168   : > { %5390 = vmatpush3.bf16.msra.mxu0 %v5925_v20  ;;  %v2033_v20 = vshll.u32 %v4811_v7, 16 }
 0x169   : > { %5391 = vmatprep.subr.bf16.mxu0 %v5927_v25 }
 0x16a   : > { %v2035_v35 = vrot.slane %v2033_v20, 5 }
 0x16c   : > { %5392 = vmatpush3.bf16.msra.mxu0 %v5927_v25  ;;  %v2011_v25 = vshll.u32 %v4808_v13, 16  ;;  %v2036_v46 = vor.u32 %v2035_v35, %v2032_v34 }
 0x16d   : > { %5401 = vmatprep.subr.bf16.mxu0 %v5929_v32 }
 0x16e   : > { %v2037_v55 = vrot.slane %v2036_v46, 4 }
 0x16f   : > { %5394 = vmatmul.mubr.bf16.vlgmr.msra.gmra.mrb[0].mxu0 %v5930_v37  ;;  %v2049_v37 = vrot.slane %v2047_v22, 5 }
 0x170   : > { %5402 = vmatpush3.bf16.msra.mxu0 %v5929_v32  ;;  %5397 = vmatprep.mubr.bf16.mxu0 %v5936_v38  ;;  %v1999_v32 = vrot.slane %v1997_v18, 5  ;;  %v2009_v38 = vrot.slane %v2008_v24, 4 }
 0x171   : > { %5403 = vmatprep.subr.bf16.mxu0 %v5931_v39 }
 0x172   : > { %v2000_v45 = vsel %vm6446_vm2, %v1995_v31, %v1999_v32 }
 0x174   : > { %5404 = vmatpush3.bf16.msra.mxu0 %v5931_v39  ;;  %v2013_v39 = vrot.slane %v2011_v25, 5 }
 0x175   : > { %5405 = vmatprep.subr.bf16.mxu0 %v5932_v44 }
 0x176   : > { %v2014_v50 = vsel %vm6446_vm2, %v2009_v38, %v2013_v39 }
 0x177   : > { %5398 = vmatmul.mubr.bf16.gmra.mrb[4].mxu0 %v5937_v48  ;;  %v2050_v48 = vor.u32 %v2049_v37, %v2046_v36  ;;  %v4817_v54 = vcombine.low %v2014_v50, %v2028_v51 }
 0x178   : > { %5406 = vmatpush3.bf16.msra.mxu0 %v5932_v44  ;;  %5417 = vmatprep.mubr.bf16.mxu0 %v4815_v49  ;;  %v2039_v44 = vshll.u32 %v4812_v33, 16  ;;  %v2053_v49 = vshll.u32 %v4814_v42, 16 }
 0x179   : > { %5407 = vmatprep.subr.bf16.mxu0 %v5933_v52  ;;  %v2051_v56 = vrot.slane %v2050_v48, 4 }
 0x17a   : > { %v2041_v53 = vrot.slane %v2039_v44, 5  ;;  %v2055_v57 = vrot.slane %v2053_v49, 5 }
 0x17c   : > { %5408 = vmatpush3.bf16.msra.mxu0 %v5933_v52  ;;  %v4816_v52 = vcombine.low %v1986_v43, %v2000_v45  ;;  %v2042_v58 = vsel %vm6446_vm2, %v2037_v55, %v2041_v53 }
 0x17d   : > { %5409 = vmatprep.subr.bf16.mxu0 %v5934_v59 }
 0x180   : > { %5410 = vmatpush3.bf16.msra.mxu0 %v5934_v59  ;;  %v2056_v59 = vsel %vm6446_vm2, %v2051_v56, %v2055_v57 }
 0x181   : > { %5411 = vmatprep.subr.bf16.mxu0 %v5935_v0  ;;  %v4818_v60 = vcombine.low %v2042_v58, %v2056_v59 }
 0x184   : > { %5412 = vmatpush3.bf16.msra.mxu0 %v5935_v0  ;;  %v6187_v0 = vmov 0  }
 0x185   : > { %5413 = vmatprep.subr.bf16.mxu0 %v5938_v23  ;;  %2291 = vst [vmem:[#allocation2 + $0x28] sm:$0xf] %v6187_v0  ;;  %2281 = vst [vmem:[#allocation2] sm:$0xf] %v6187_v0 }
 0x186   : > { %2282 = vst [vmem:[#allocation2 + $0x4] sm:$0xf] %v6187_v0  ;;  %2283 = vst [vmem:[#allocation2 + $0x8] sm:$0xf] %v6187_v0 }
 0x187   : > { %2284 = vst [vmem:[#allocation2 + $0xc] sm:$0xf] %v6187_v0  ;;  %2285 = vst [vmem:[#allocation2 + $0x10] sm:$0xf] %v6187_v0 }
 0x188   : > { %5414 = vmatpush3.bf16.msra.mxu0 %v5938_v23  ;;  %2286 = vst [vmem:[#allocation2 + $0x14] sm:$0xf] %v6187_v0  ;;  %2287 = vst [vmem:[#allocation2 + $0x18] sm:$0xf] %v6187_v0 }
 0x189   : > { %5415 = vmatprep.subr.bf16.mxu0 %v5939_v28  ;;  %2288 = vst [vmem:[#allocation2 + $0x1c] sm:$0xf] %v6187_v0  ;;  %2289 = vst [vmem:[#allocation2 + $0x20] sm:$0xf] %v6187_v0 }
 0x18a   : > { %2290 = vst [vmem:[#allocation2 + $0x24] sm:$0xf] %v6187_v0  ;;  %2292 = vst [vmem:[#allocation2 + $0x2c] sm:$0xf] %v6187_v0 }
 0x18b   : > { %2293 = vst [vmem:[#allocation2 + $0x30] sm:$0xf] %v6187_v0  ;;  %2294 = vst [vmem:[#allocation2 + $0x34] sm:$0xf] %v6187_v0 }
 0x18c   : > { %5416 = vmatpush3.bf16.msra.mxu0 %v5939_v28  ;;  %2295 = vst [vmem:[#allocation2 + $0x38] sm:$0xf] %v6187_v0  ;;  %2296 = vst [vmem:[#allocation2 + $0x3c] sm:$0xf] %v6187_v0  ;;  %v2320_v42 = vld [vmem:[#allocation2] sm:$0x8] }
 0x18d   : > { %2297 = vst [vmem:[#allocation2 + $0x40] sm:$0xf] %v6187_v0  ;;  %2298 = vst [vmem:[#allocation2 + $0x44] sm:$0xf] %v6187_v0  ;;  %v2321_v31 = vld [vmem:[#allocation2 + $0x4] sm:$0xf] }
 0x18e   : > { %2299 = vst [vmem:[#allocation2 + $0x48] sm:$0xf] %v6187_v0  ;;  %2300 = vst [vmem:[#allocation2 + $0x4c] sm:$0xf] %v6187_v0  ;;  %v2345_v39 = vshrl.u32 %v2321_v31, 16  ;;  %v2340_v53 = vshrl.u32 %v2320_v42, 16 }
 0x18f   : > { %5418 = vmatmul.mubr.bf16.vlgmr.msra.gmra.mrb[0].mxu0 %v4816_v52  ;;  %2301 = vst [vmem:[#allocation2 + $0x50] sm:$0xf] %v6187_v0  ;;  %2302 = vst [vmem:[#allocation2 + $0x54] sm:$0xf] %v6187_v0  ;;  %v2322_v45 = vld [vmem:[#allocation2 + $0xc] sm:$0x8] }
 0x190   : > { %5421 = vmatprep.mubr.bf16.mxu0 %v4817_v54  ;;  %2303 = vst [vmem:[#allocation2 + $0x58] sm:$0xf] %v6187_v0  ;;  %2304 = vst [vmem:[#allocation2 + $0x5c] sm:$0xf] %v6187_v0  ;;  %v2347_v51 = vrot.slane %v2345_v39, 7  ;;  %v2348_v52 = vshll.u32 %v2321_v31, 16 }
 0x191   : > { %2305 = vst [vmem:[#allocation2 + $0x60] sm:$0xf] %v6187_v0  ;;  %2306 = vst [vmem:[#allocation2 + $0x64] sm:$0xf] %v6187_v0  ;;  %v2353_v57 = vshrl.u32 %v2322_v45, 16  ;;  %v4837_v2 = vrot.slane %v2340_v53, 11 }
 0x192   : > { %2307 = vst [vmem:[#allocation2 + $0x68] sm:$0xf] %v6187_v0  ;;  %2308 = vst [vmem:[#allocation2 + $0x6c] sm:$0xf] %v6187_v0 }
 0x193   : > { %2309 = vst [vmem:[#allocation2 + $0x70] sm:$0xf] %v6187_v0  ;;  %2310 = vst [vmem:[#allocation2 + $0x74] sm:$0xf] %v6187_v0  ;;  %v2350_v0 = vor.u32 %v2348_v52, %v2347_v51  ;;  %v2743_v52 = vld [vmem:[#allocation2 + $0x8] sm:$0x1] }
 0x197   : > { %5422 = vmatmul.mubr.bf16.gmra.mrb[4].mxu0 %v4818_v60 }
 0x262   : > { %v5419_v5 = vpop.f32.mrb[0].mxu0 }
 0x263   : > { %v2220_v7 = vmul.f32 %v5419_v5, %v4827_v4  ;;  %v2172_v8 = vpop.f32.mrb[1].mxu0  ;;  %v6011_v5 = vld [vmem:[#allocation8 + $0x1f0] sm:$0xff]  }
 0x264   : > { %v2218_v9 = vmul.f32 %v4827_v4, %v2172_v8  ;;  %v5420_v10 = vpop.f32.mrb[2].mxu0 }
 0x265   : > { %v2235_v11 = vadd.f32 %v4828_v6, %v2220_v7  ;;  %v2221_v12 = vmul.f32 %v5420_v10, %v4827_v4  ;;  %v2175_v13 = vpop.f32.mrb[3].mxu0  ;;  %v2351_v10 = vsel %vm6573_vm5, %v4837_v2, %v2350_v0 }
 0x266   : > { %v2233_v14 = vadd.f32 %v4828_v6, %v2218_v9  ;;  %v2219_v15 = vmul.f32 %v4827_v4, %v2175_v13 }
 0x267   : > { %v2243_v16 = vmax.f32 %v2235_v11, 0.0  ;;  %v2236_v17 = vadd.f32 %v4828_v6, %v2221_v12 }
 0x268   : > { %v2241_v18 = vmax.f32 %v2233_v14, 0.0  ;;  %v2234_v19 = vadd.f32 %v4828_v6, %v2219_v15  ;;  %v5955_v14 = vld [vmem:[#allocation8 + $0x18] sm:$0xff]  }
 0x269   : > { %v4986_v20 = vpack.c.bf16 %v2243_v16, %v2243_v16  ;;  %v2244_v21 = vmax.f32 %v2236_v17, 0.0  ;;  %v5956_v16 = vld [vmem:[#allocation8 + $0x20] sm:$0xff]   ;;  %v5957_v17 = vld [vmem:[#allocation8 + $0x28] sm:$0xff]  }
 0x26a   : > { %v4984_v22 = vpack.c.bf16 %v2241_v18, %v2241_v18  ;;  %v2242_v23 = vmax.f32 %v2234_v19, 0.0  ;;  %v5423_v24 = vpop.f32.mrb[4].mxu0  ;;  %v2742_v18 = vld [vmem:[#allocation2 + $0x4] sm:$0xf] }
 0x26b   : > { %2314 = vst [vmem:[#allocation2 + $0x28] sm:$0xf] %v4986_v20  ;;  %v4987_v25 = vpack.c.bf16 %v2244_v21, %v2244_v21  ;;  %v2224_v26 = vmul.f32 %v5423_v24, %v4827_v4  ;;  %v2188_v27 = vpop.f32.mrb[5].mxu0  ;;  %v2324_v20 = vld [vmem:[#allocation2 + $0x18] sm:$0x8] }
 0x26c   : > { %2312 = vst [vmem:[#allocation2 + $0x10] sm:$0xf] %v4984_v22  ;;  %v4985_v28 = vpack.c.bf16 %v2242_v23, %v2242_v23  ;;  %v2222_v29 = vmul.f32 %v4827_v4, %v2188_v27  ;;  %v5424_v30 = vpop.f32.mrb[6].mxu0  ;;  %v2330_v22 = vld [vmem:[#allocation2 + $0x3c] sm:$0x8] }
 0x26d   : > { %2315 = vst [vmem:[#allocation2 + $0x34] sm:$0xf] %v4987_v25  ;;  %v2239_v32 = vadd.f32 %v4828_v6, %v2224_v26  ;;  %v2225_v33 = vmul.f32 %v5424_v30, %v4827_v4  ;;  %v2191_v34 = vpop.f32.mrb[7].mxu0  ;;  %v2326_v24 = vld [vmem:[#allocation2 + $0x24] sm:$0x8]  ;;  %v2759_v26 = vshrl.u32 %v2742_v18, 16 }
 0x26e   : > { %2313 = vst [vmem:[#allocation2 + $0x1c] sm:$0xf] %v4985_v28  ;;  %v2237_v35 = vadd.f32 %v4828_v6, %v2222_v29  ;;  %v2223_v36 = vmul.f32 %v4827_v4, %v2191_v34  ;;  %v4838_v4 = vrot.slane %v2353_v57, 11  ;;  %v5958_v28 = vld [vmem:[#allocation8 + $0x30] sm:$0xff]   ;;  %v2366_v29 = vshrl.u32 %v2324_v20, 16 }
 0x26f   : > { %v2247_v37 = vmax.f32 %v2239_v32, 0.0  ;;  %v2240_v38 = vadd.f32 %v4828_v6, %v2225_v33  ;;  %v2328_v30 = vld [vmem:[#allocation2 + $0x30] sm:$0x8]  ;;  %v2405_v33 = vshrl.u32 %v2330_v22, 16 }
 0x270   : > { %v2245_v40 = vmax.f32 %v2237_v35, 0.0  ;;  %v2238_v41 = vadd.f32 %v4828_v6, %v2223_v36  ;;  %v5953_v6 = vld [vmem:[#allocation8 + $0x10] sm:$0xff]   ;;  %v2379_v35 = vshrl.u32 %v2326_v24, 16  ;;  %v4839_v45 = vrot.slane %v2366_v29, 11 }
 0x271   : > { %v4990_v43 = vpack.c.bf16 %v2247_v37, %v2247_v37  ;;  %v2248_v44 = vmax.f32 %v2240_v38, 0.0  ;;  %v4842_v51 = vrot.slane %v2405_v33, 11  ;;  %v5962_v29 = vld [vmem:[#allocation8 + $0x90] sm:$0xff]  }
 0x272   : > { %v4988_v46 = vpack.c.bf16 %v2245_v40, %v2245_v40  ;;  %v2246_v48 = vmax.f32 %v2238_v41, 0.0  ;;  %v6568_v59 = vld [vmem:[#allocation2 + $0x28] sm:$0xf]  ;;  %v2392_v40 = vshrl.u32 %v2328_v30, 16  ;;  %v2761_v41 = vrot.slane %v2759_v26, 4 }
 0x273   : > { %2318 = vst [vmem:[#allocation2 + $0x58] sm:$0xf] %v4990_v43  ;;  %v4991_v49 = vpack.c.bf16 %v2248_v44, %v2248_v44  ;;  %v2323_v50 = vld [vmem:[#allocation2 + $0x10] sm:$0xf]  ;;  %v2384_v23 = vshrl.u32 %v6568_v59, 16 }
 0x274   : > { %2316 = vst [vmem:[#allocation2 + $0x40] sm:$0xf] %v4988_v46  ;;  %v4989_v54 = vpack.c.bf16 %v2246_v48, %v2246_v48  ;;  %v2358_v55 = vshrl.u32 %v2323_v50, 16  ;;  %v4845_v56 = vcombine.low %v2321_v31, %v2323_v50  ;;  %v2361_v61 = vshll.u32 %v2323_v50, 16  ;;  %v6577_v7 = vld [vmem:[#allocation2 + $0x34] sm:$0xf] }
 0x275   : > { %2319 = vst [vmem:[#allocation2 + $0x64] sm:$0xf] %v4991_v49  ;;  %v6566_v58 = vld [vmem:[#allocation2 + $0x1c] sm:$0xf]  ;;  %v2744_v25 = vld [vmem:[#allocation2 + $0x10] sm:$0xf] }
 0x276   : > { %2317 = vst [vmem:[#allocation2 + $0x4c] sm:$0xf] %v4989_v54  ;;  %v2360_v60 = vrot.slane %v2358_v55, 7  ;;  %5441 = vmatprep.mubr.bf16.mxu1 %v4845_v56  ;;  %v4846_v62 = vcombine.low %v6566_v58, %v6568_v59  ;;  %v2371_v19 = vshrl.u32 %v6566_v58, 16  ;;  %v2397_v27 = vshrl.u32 %v6577_v7, 16  ;;  %v5959_v44 = vld [vmem:[#allocation8 + $0x38] sm:$0xff]  }
 0x277   : > { %v2762_v31 = vshll.u32 %v2742_v18, 16  ;;  %v2773_v36 = vshrl.u32 %v2744_v25, 16  ;;  %v2776_v37 = vshll.u32 %v2744_v25, 16  ;;  %v2374_v38 = vshll.u32 %v6566_v58, 16  ;;  %v2332_v55 = vld [vmem:[#allocation2 + $0x48] sm:$0x8] }
 0x278   : > { %v2363_v1 = vor.u32 %v2361_v61, %v2360_v60  ;;  %5442 = vmatmul.mubr.bf16.vlgmr.msra.gmra.mrb[0].mxu1 %v4846_v62  ;;  %v2373_v32 = vrot.slane %v2371_v19, 7  ;;  %v2386_v39 = vrot.slane %v2384_v23, 7  ;;  %v2399_v42 = vrot.slane %v2397_v27, 7  ;;  %v2745_v62 = vld [vmem:[#allocation2 + $0x14] sm:$0x1]  ;;  %v5961_v19 = vld [vmem:[#allocation8 + $0x88] sm:$0xff]  }
 0x279   : > { %5450 = vmatpush3.bf16.msra.mxu1 %v6557_v3  ;;  %v2764_v46 = vrot.slane %v2762_v31, 5  ;;  %v2387_v49 = vshll.u32 %v6568_v59, 16  ;;  %v2400_v53 = vshll.u32 %v6577_v7, 16  ;;  %v2775_v56 = vrot.slane %v2773_v36, 4  ;;  %v2746_v36 = vld [vmem:[#allocation2 + $0x1c] sm:$0xf] }
 0x27a   : > { %5451 = vmatprep.subr.bf16.mxu1 %v5951_v63  ;;  %v2364_v11 = vsel %vm6573_vm5, %v4838_v4, %v2363_v1  ;;  %v6586_v3 = vld [vmem:[#allocation2 + $0x58] sm:$0xf]  ;;  %v2376_v48 = vor.u32 %v2374_v38, %v2373_v32  ;;  %v2778_v57 = vrot.slane %v2776_v37, 5  ;;  %v4840_v61 = vrot.slane %v2379_v35, 11  ;;  %v2334_v1 = vld [vmem:[#allocation2 + $0x54] sm:$0x8] }
 0x27b   : > { %v2331_v8 = vld [vmem:[#allocation2 + $0x40] sm:$0xf]  ;;  %v4857_v15 = vcombine.low %v2351_v10, %v2364_v11  ;;  %v2389_v58 = vor.u32 %v2387_v49, %v2386_v39  ;;  %v2436_v60 = vshrl.u32 %v6586_v3, 16  ;;  %v4841_v0 = vrot.slane %v2392_v40, 11  ;;  %v5964_v38 = vld [vmem:[#allocation8 + $0xa0] sm:$0xff]  }
 0x27c   : > { %v4847_v9 = vcombine.low %v6577_v7, %v2331_v8  ;;  %v2410_v21 = vshrl.u32 %v2331_v8, 16  ;;  %v2413_v43 = vshll.u32 %v2331_v8, 16  ;;  %v2402_v59 = vor.u32 %v2400_v53, %v2399_v42  ;;  %v2752_v37 = vld [vmem:[#allocation2 + $0x40] sm:$0xf]  ;;  %v2748_v39 = vld [vmem:[#allocation2 + $0x28] sm:$0xf] }
 0x27d   : > { %5452 = vmatpush3.bf16.msra.mxu1 %v5951_v63  ;;  %v6584_v12 = vld [vmem:[#allocation2 + $0x4c] sm:$0xf]  ;;  %v5960_v63 = vld [vmem:[#allocation8 + $0x80] sm:$0xff]   ;;  %v2377_v4 = vsel %vm6573_vm5, %v4839_v45, %v2376_v48  ;;  %v2768_v7 = vshll.u32 %v2743_v52, 16  ;;  %v2779_v10 = vor.u32 %v2778_v57, %v2775_v56  ;;  %v2782_v11 = vshll.u32 %v2745_v62, 16  ;;  %v5965_v48 = vld [vmem:[#allocation8 + $0xa8] sm:$0xff]  }
 0x27e   : > { %5445 = vmatprep.mubr.bf16.mxu1 %v4847_v9  ;;  %5453 = vmatprep.subr.bf16.mxu1 %v5953_v6  ;;  %v4848_v13 = vcombine.low %v6584_v12, %v6586_v3  ;;  %v2412_v34 = vrot.slane %v2410_v21, 7  ;;  %v2423_v50 = vshrl.u32 %v6584_v12, 16  ;;  %v2765_v9 = vor.u32 %v2764_v46, %v2761_v41  ;;  %v2750_v42 = vld [vmem:[#allocation2 + $0x34] sm:$0xf]  ;;  %v2747_v53 = vld [vmem:[#allocation2 + $0x20] sm:$0x1] }
 0x27f   : > { %v2403_v18 = vsel %vm6573_vm5, %v4841_v0, %v2402_v59  ;;  %v2439_v20 = vshll.u32 %v6586_v3, 16  ;;  %v2780_v25 = vrot.slane %v2779_v10, 4  ;;  %v2784_v26 = vrot.slane %v2782_v11, 5  ;;  %v2754_v56 = vld [vmem:[#allocation2 + $0x4c] sm:$0xf] }
 0x280   : > { %5446 = vmatmul.mubr.bf16.gmra.mrb[4].mxu1 %v4848_v13  ;;  %v2415_v54 = vor.u32 %v2413_v43, %v2412_v34  ;;  %v2425_v2 = vrot.slane %v2423_v50, 7  ;;  %v2426_v13 = vshll.u32 %v6584_v12, 16  ;;  %v2766_v24 = vrot.slane %v2765_v9, 4  ;;  %v5963_v34 = vld [vmem:[#allocation8 + $0x98] sm:$0xff]   ;;  %v2749_v57 = vld [vmem:[#allocation2 + $0x2c] sm:$0x1] }
 0x281   : > { %5454 = vmatpush3.bf16.msra.mxu1 %v5953_v6  ;;  %5465 = vmatprep.mubr.bf16.mxu1 %v4857_v15  ;;  %v2418_v6 = vshrl.u32 %v2332_v55, 16  ;;  %v2390_v15 = vsel %vm6573_vm5, %v4840_v61, %v2389_v58  ;;  %v2770_v12 = vrot.slane %v2768_v7, 5  ;;  %v2785_v31 = vsel %vm6446_vm2, %v2780_v25, %v2784_v26  ;;  %v2753_v61 = vld [vmem:[#allocation2 + $0x44] sm:$0x1]  ;;  %v5966_v62 = vld [vmem:[#allocation8 + $0xb0] sm:$0xff]  }
 0x282   : > { %5455 = vmatprep.subr.bf16.mxu1 %v5955_v14  ;;  %v2416_v8 = vsel %vm6573_vm5, %v4842_v51, %v2415_v54  ;;  %v2428_v23 = vor.u32 %v2426_v13, %v2425_v2  ;;  %v2787_v40 = vshrl.u32 %v2746_v36, 16  ;;  %v2790_v41 = vshll.u32 %v2746_v36, 16  ;;  %v2756_v59 = vld [vmem:[#allocation2 + $0x58] sm:$0xf]  ;;  %v2755_v25 = vld [vmem:[#allocation2 + $0x50] sm:$0x1] }
 0x283   : > { %v4859_v21 = vcombine.low %v2403_v18, %v2416_v8  ;;  %v4843_v22 = vrot.slane %v2418_v6, 11  ;;  %v2771_v3 = vsel %vm6446_vm2, %v2766_v24, %v2770_v12  ;;  %v2829_v43 = vshrl.u32 %v2752_v37, 16  ;;  %v3024_v26 = vld [vmem:[#allocation2 + $0xc] sm:$0x8] }
 0x284   : > { %v4869_v35 = vcombine.low %v2771_v3, %v2785_v31  ;;  %v2801_v45 = vshrl.u32 %v2748_v39, 16  ;;  %v2804_v46 = vshll.u32 %v2748_v39, 16  ;;  %v2815_v49 = vshrl.u32 %v2750_v42, 16  ;;  %v3026_v31 = vld [vmem:[#allocation2 + $0x18] sm:$0x8] }
 0x285   : > { %5456 = vmatpush3.bf16.msra.mxu1 %v5955_v14  ;;  %v2438_v14 = vrot.slane %v2436_v60, 7  ;;  %v2429_v30 = vsel %vm6573_vm5, %v4843_v22, %v2428_v23  ;;  %v2818_v50 = vshll.u32 %v2750_v42, 16  ;;  %v2789_v51 = vrot.slane %v2787_v40, 4  ;;  %v6618_v23 = vld [vmem:[#allocation2 + $0x10] sm:$0xf] }
 0x286   : > { %5457 = vmatprep.subr.bf16.mxu1 %v5956_v16  ;;  %v2792_v52 = vrot.slane %v2790_v41, 5  ;;  %v2831_v54 = vrot.slane %v2829_v43, 4  ;;  %v2803_v58 = vrot.slane %v2801_v45, 4  ;;  %v2806_v60 = vrot.slane %v2804_v46, 5 }
 0x287   : > { %v2820_v0 = vrot.slane %v2818_v50, 5  ;;  %v2796_v2 = vshll.u32 %v2747_v53, 16  ;;  %v2843_v6 = vshrl.u32 %v2754_v56, 16  ;;  %v2846_v7 = vshll.u32 %v2754_v56, 16  ;;  %v5969_v50 = vld [vmem:[#allocation8 + $0xc8] sm:$0xff]  }
 0x288   : > { %v2838_v9 = vshll.u32 %v2753_v61, 16  ;;  %v2807_v10 = vor.u32 %v2806_v60, %v2803_v58  ;;  %v2810_v11 = vshll.u32 %v2749_v57, 16  ;;  %v2857_v13 = vshrl.u32 %v2756_v59, 16 }
 0x289   : > { %5458 = vmatpush3.bf16.msra.mxu1 %v5956_v16  ;;  %v2431_v16 = vshrl.u32 %v2334_v1, 16  ;;  %v2793_v1 = vor.u32 %v2792_v52, %v2789_v51  ;;  %v2848_v22 = vrot.slane %v2846_v7, 5  ;;  %v3046_v36 = vshrl.u32 %v6618_v23, 16  ;;  %v5971_v7 = vld [vmem:[#allocation8 + $0xd8] sm:$0xff]  }
 0x28a   : > { %5459 = vmatprep.subr.bf16.mxu1 %v5957_v17  ;;  %v2840_v12 = vrot.slane %v2838_v9, 5  ;;  %v2852_v39 = vshll.u32 %v2755_v25, 16  ;;  %v3054_v41 = vshrl.u32 %v3026_v31, 16  ;;  %v3041_v46 = vshrl.u32 %v3024_v26, 16  ;;  %v5972_v9 = vld [vmem:[#allocation8 + $0xe0] sm:$0xff]  }
 0x28b   : > { %v4844_v27 = vrot.slane %v2431_v16, 11  ;;  %v5967_v16 = vld [vmem:[#allocation8 + $0xb8] sm:$0xff]   ;;  %v3048_v51 = vrot.slane %v3046_v36, 7  ;;  %v3049_v56 = vshll.u32 %v6618_v23, 16 }
 0x28c   : > { %v4882_v57 = vrot.slane %v3054_v41, 11 }
 0x28d   : > { %5460 = vmatpush3.bf16.msra.mxu1 %v5957_v17  ;;  %v4858_v17 = vcombine.low %v2377_v4, %v2390_v15  ;;  %v2751_v4 = vld [vmem:[#allocation2 + $0x38] sm:$0x1]  ;;  %v6616_v15 = vld [vmem:[#allocation2 + $0x1c] sm:$0xf] }
 0x28e   : > { %5461 = vmatprep.subr.bf16.mxu1 %v5958_v28  ;;  %v2824_v18 = vshll.u32 %v2751_v4, 16  ;;  %v3062_v52 = vshll.u32 %v6616_v15, 16 }
 0x291   : > { %5462 = vmatpush3.bf16.msra.mxu1 %v5958_v28  ;;  %v2441_v28 = vor.u32 %v2439_v20, %v2438_v14  ;;  %v2860_v14 = vshll.u32 %v2756_v59, 16  ;;  %v2798_v20 = vrot.slane %v2796_v2, 5 }
 0x292   : > { %5463 = vmatprep.subr.bf16.mxu1 %v5959_v44 }
 0x293   : > { %v2442_v32 = vsel %vm6573_vm5, %v4844_v27, %v2441_v28  ;;  %v3059_v27 = vshrl.u32 %v6616_v15, 16  ;;  %v2808_v28 = vrot.slane %v2807_v10, 4  ;;  %v2862_v3 = vrot.slane %v2860_v14, 5  ;;  %v6640_v10 = vld [vmem:[#allocation2 + $0x34] sm:$0xf] }
 0x294   : > { %v4860_v33 = vcombine.low %v2429_v30, %v2442_v32  ;;  %v2859_v30 = vrot.slane %v2857_v13, 4  ;;  %v5968_v32 = vld [vmem:[#allocation8 + $0xc0] sm:$0xff]   ;;  %v5973_v13 = vld [vmem:[#allocation8 + $0xe8] sm:$0xff]   ;;  %v6644_v14 = vld [vmem:[#allocation2 + $0x28] sm:$0xf] }
 0x295   : > { %5464 = vmatpush3.bf16.msra.mxu1 %v5959_v44  ;;  %v2832_v44 = vshll.u32 %v2752_v37, 16  ;;  %v3061_v42 = vrot.slane %v3059_v27, 7  ;;  %v3032_v27 = vld [vmem:[#allocation2 + $0x3c] sm:$0x8] }
 0x296   : > { %5473 = vmatprep.subr.bf16.mxu1 %v5960_v63 }
 0x297   : > { %v2834_v55 = vrot.slane %v2832_v44, 5  ;;  %v2863_v44 = vor.u32 %v2862_v3, %v2859_v30  ;;  %v3064_v58 = vor.u32 %v3062_v52, %v3061_v42  ;;  %v6652_v30 = vld [vmem:[#allocation2 + $0x64] sm:$0xf] }
 0x298   : > { %5466 = vmatmul.mubr.bf16.vlgmr.msra.gmra.mrb[0].mxu1 %v4858_v17  ;;  %v3137_v41 = vshrl.u32 %v6652_v30, 16 }
 0x299   : > { %5469 = vmatprep.mubr.bf16.mxu1 %v4859_v21  ;;  %5474 = vmatpush3.bf16.msra.mxu1 %v5960_v63  ;;  %v2817_v63 = vrot.slane %v2815_v49, 4  ;;  %v2835_v8 = vor.u32 %v2834_v55, %v2831_v54  ;;  %v2845_v21 = vrot.slane %v2843_v6, 4  ;;  %v2854_v55 = vrot.slane %v2852_v39, 5 }
 0x29a   : > { %5475 = vmatprep.subr.bf16.mxu1 %v5961_v19  ;;  %v2864_v60 = vrot.slane %v2863_v44, 4 }
 0x29b   : > { %v2821_v17 = vor.u32 %v2820_v0, %v2817_v63  ;;  %v2836_v24 = vrot.slane %v2835_v8, 4  ;;  %v4881_v63 = vrot.slane %v3041_v46, 11  ;;  %v3051_v0 = vor.u32 %v3049_v56, %v3048_v51 }
 0x29c   : > { %v3139_v56 = vrot.slane %v3137_v41, 7 }
 0x29d   : > { %5476 = vmatpush3.bf16.msra.mxu1 %v5961_v19  ;;  %v2794_v19 = vrot.slane %v2793_v1, 4  ;;  %v2841_v40 = vsel %vm6446_vm2, %v2836_v24, %v2840_v12  ;;  %v3065_v1 = vsel %vm6573_vm5, %v4882_v57, %v3064_v58  ;;  %v3052_v6 = vsel %vm6573_vm5, %v4881_v63, %v3051_v0  ;;  %v3028_v24 = vld [vmem:[#allocation2 + $0x24] sm:$0x8] }
 0x29e   : > { %5477 = vmatprep.subr.bf16.mxu1 %v5962_v29  ;;  %v4889_v8 = vcombine.low %v3052_v6, %v3065_v1  ;;  %v3067_v3 = vshrl.u32 %v3028_v24, 16  ;;  %v3462_v24 = vld [vmem:[#allocation2 + $0x1c] sm:$0xf] }
 0x29f   : > { %v2799_v37 = vsel %vm6446_vm2, %v2794_v19, %v2798_v20  ;;  %v3072_v20 = vshrl.u32 %v6644_v14, 16 }
 0x2a0   : > { %5470 = vmatmul.mubr.bf16.gmra.mrb[4].mxu1 %v4860_v33  ;;  %v2822_v33 = vrot.slane %v2821_v17, 4  ;;  %v6647_v17 = vld [vmem:[#allocation2 + $0x40] sm:$0xf]  ;;  %v4883_v46 = vrot.slane %v3067_v3, 11 }
 0x2a1   : > { %5478 = vmatpush3.bf16.msra.mxu1 %v5962_v29  ;;  %5489 = vmatprep.mubr.bf16.mxu1 %v4869_v35  ;;  %v2812_v29 = vrot.slane %v2810_v11, 5  ;;  %v2757_v35 = vld [vmem:[#allocation2 + $0x5c] sm:$0x1]  ;;  %v6642_v11 = vld [vmem:[#allocation2 + $0x4c] sm:$0xf]  ;;  %v3098_v12 = vshrl.u32 %v6647_v17, 16 }
 0x2a2   : > { %5479 = vmatprep.subr.bf16.mxu1 %v5963_v34  ;;  %v2866_v45 = vshll.u32 %v2757_v35, 16  ;;  %v3111_v19 = vshrl.u32 %v6642_v11, 16  ;;  %v3074_v31 = vrot.slane %v3072_v20, 7  ;;  %v3114_v36 = vshll.u32 %v6642_v11, 16 }
 0x2a3   : > { %v2813_v43 = vsel %vm6446_vm2, %v2808_v28, %v2812_v29  ;;  %v3100_v35 = vrot.slane %v3098_v12, 7  ;;  %v3101_v42 = vshll.u32 %v6647_v17, 16  ;;  %v4901_v20 = vcombine.low %v6618_v23, %v6616_v15  ;;  %v5983_v12 = vld [vmem:[#allocation8 + $0x130] sm:$0xff]  }
 0x2a4   : > { %v2868_v61 = vrot.slane %v2866_v45, 5  ;;  %v3113_v29 = vrot.slane %v3111_v19, 7  ;;  %v3038_v45 = vld [vmem:[#allocation2 + $0x60] sm:$0x8]  ;;  %v5980_v19 = vld [vmem:[#allocation8 + $0x118] sm:$0xff]  }
 0x2a5   : > { %5480 = vmatpush3.bf16.msra.mxu1 %v5963_v34  ;;  %v2826_v34 = vrot.slane %v2824_v18, 5  ;;  %v3030_v18 = vld [vmem:[#allocation2 + $0x30] sm:$0x8]  ;;  %v3103_v52 = vor.u32 %v3101_v42, %v3100_v35  ;;  %v3461_v35 = vld [vmem:[#allocation2 + $0x14] sm:$0x1] }
 0x2a6   : > { %5481 = vmatprep.subr.bf16.mxu1 %v5964_v38  ;;  %v2869_v2 = vsel %vm6446_vm2, %v2864_v60, %v2868_v61  ;;  %v3080_v25 = vshrl.u32 %v3030_v18, 16  ;;  %v3116_v44 = vor.u32 %v3114_v36, %v3113_v29  ;;  %v3486_v42 = vshll.u32 %v3461_v35, 16 }
 0x2a7   : > { %v2827_v49 = vsel %vm6446_vm2, %v2822_v33, %v2826_v34  ;;  %v5975_v33 = vld [vmem:[#allocation8 + $0xf8] sm:$0xff]   ;;  %v3093_v34 = vshrl.u32 %v3032_v27, 16  ;;  %v3494_v27 = vshll.u32 %v3462_v24, 16 }
 0x2a8   : > { %v4871_v53 = vcombine.low %v2827_v49, %v2841_v40  ;;  %v4884_v39 = vrot.slane %v3080_v25, 11  ;;  %v3460_v25 = vld [vmem:[#allocation2 + $0x10] sm:$0xf] }
 0x2a9   : > { %5482 = vmatpush3.bf16.msra.mxu1 %v5964_v38  ;;  %v2849_v38 = vor.u32 %v2848_v22, %v2845_v21  ;;  %v3034_v21 = vld [vmem:[#allocation2 + $0x48] sm:$0x8]  ;;  %v4885_v51 = vrot.slane %v3093_v34, 11  ;;  %v3477_v29 = vshrl.u32 %v3460_v25, 16  ;;  %v3480_v15 = vshll.u32 %v3460_v25, 16 }
 0x2aa   : > { %5483 = vmatprep.subr.bf16.mxu1 %v5965_v48  ;;  %v5974_v22 = vld [vmem:[#allocation8 + $0xf0] sm:$0xff]   ;;  %v3106_v28 = vshrl.u32 %v3034_v21, 16  ;;  %v5981_v21 = vld [vmem:[#allocation8 + $0x120] sm:$0xff]   ;;  %v3496_v3 = vrot.slane %v3494_v27, 5 }
 0x2ab   : > { %v2850_v54 = vrot.slane %v2849_v38, 4  ;;  %v3075_v38 = vshll.u32 %v6644_v14, 16  ;;  %v3104_v0 = vsel %vm6573_vm5, %v4885_v51, %v3103_v52  ;;  %v3482_v34 = vrot.slane %v3480_v15, 5  ;;  %v3466_v51 = vld [vmem:[#allocation2 + $0x34] sm:$0xf] }
 0x2ac   : > { %v3470_v52 = vld [vmem:[#allocation2 + $0x4c] sm:$0xf] }
 0x2ad   : > { %5484 = vmatpush3.bf16.msra.mxu1 %v5965_v48  ;;  %v4870_v48 = vcombine.low %v2799_v37, %v2813_v43  ;;  %v2855_v59 = vsel %vm6446_vm2, %v2850_v54, %v2854_v55  ;;  %v6656_v37 = vld [vmem:[#allocation2 + $0x58] sm:$0xf]  ;;  %v4886_v43 = vrot.slane %v3106_v28, 11  ;;  %v3132_v55 = vshrl.u32 %v3038_v45, 16  ;;  %v5984_v28 = vld [vmem:[#allocation8 + $0x138] sm:$0xff]  }
 0x2ae   : > { %5485 = vmatprep.subr.bf16.mxu1 %v5966_v62  ;;  %v4872_v4 = vcombine.low %v2855_v59, %v2869_v2  ;;  %v3124_v49 = vshrl.u32 %v6656_v37, 16  ;;  %v5977_v59 = vld [vmem:[#allocation8 + $0x108] sm:$0xff]   ;;  %v3127_v2 = vshll.u32 %v6656_v37, 16 }
 0x2af   : > { %v3117_v57 = vsel %vm6573_vm5, %v4886_v43, %v3116_v44  ;;  %v4903_v43 = vcombine.low %v6647_v17, %v6642_v11 }
 0x2b0   : > { %v3126_v61 = vrot.slane %v3124_v49, 7  ;;  %v4891_v1 = vcombine.low %v3104_v0, %v3117_v57  ;;  %v3488_v49 = vrot.slane %v3486_v42, 5  ;;  %v3468_v57 = vld [vmem:[#allocation2 + $0x40] sm:$0xf]  ;;  %v3475_v42 = vld [vmem:[#allocation2 + $0x68] sm:$0x1] }
 0x2b1   : > { %5486 = vmatpush3.bf16.msra.mxu1 %v5966_v62  ;;  %v5970_v62 = vld [vmem:[#allocation8 + $0xd0] sm:$0xff]  }
 0x2b2   : > { %5487 = vmatprep.subr.bf16.mxu1 %v5967_v16 }
 0x2b5   : > { %5488 = vmatpush3.bf16.msra.mxu1 %v5967_v16  ;;  %v3085_v16 = vshrl.u32 %v6640_v10, 16 }
 0x2b6   : > { %5497 = vmatprep.subr.bf16.mxu1 %v5968_v32 }
 0x2b7   : > { %v3087_v26 = vrot.slane %v3085_v16, 7 }
 0x2b8   : > { %5490 = vmatmul.mubr.bf16.vlgmr.msra.gmra.mrb[0].mxu1 %v4870_v48  ;;  %v3077_v48 = vor.u32 %v3075_v38, %v3074_v31  ;;  %v3463_v31 = vld [vmem:[#allocation2 + $0x20] sm:$0x1] }
 0x2b9   : > { %5493 = vmatprep.mubr.bf16.mxu1 %v4871_v53  ;;  %5498 = vmatpush3.bf16.msra.mxu1 %v5968_v32  ;;  %v3088_v32 = vshll.u32 %v6640_v10, 16  ;;  %v3036_v53 = vld [vmem:[#allocation2 + $0x54] sm:$0x8]  ;;  %v3500_v38 = vshll.u32 %v3463_v31, 16 }
 0x2ba   : > { %5499 = vmatprep.subr.bf16.mxu1 %v5969_v50  ;;  %v3078_v58 = vsel %vm6573_vm5, %v4883_v46, %v3077_v48  ;;  %v3119_v60 = vshrl.u32 %v3036_v53, 16  ;;  %v5990_v46 = vld [vmem:[#allocation8 + $0x150] sm:$0xff]   ;;  %v5992_v53 = vld [vmem:[#allocation8 + $0x160] sm:$0xff]   ;;  %v5995_v31 = vld [vmem:[#allocation8 + $0x178] sm:$0xff]  }
 0x2bb   : > { %v3090_v40 = vor.u32 %v3088_v32, %v3087_v26  ;;  %v3491_v26 = vshrl.u32 %v3462_v24, 16  ;;  %v5986_v32 = vld [vmem:[#allocation8 + $0x140] sm:$0xff]   ;;  %v3502_v45 = vrot.slane %v3500_v38, 5  ;;  %v3469_v24 = vld [vmem:[#allocation2 + $0x44] sm:$0x1] }
 0x2bd   : > { %5500 = vmatpush3.bf16.msra.mxu1 %v5969_v50  ;;  %v5976_v50 = vld [vmem:[#allocation8 + $0x100] sm:$0xff]   ;;  %v3091_v54 = vsel %vm6573_vm5, %v4884_v39, %v3090_v40  ;;  %v3493_v23 = vrot.slane %v3491_v26, 4  ;;  %v4902_v39 = vcombine.low %v6644_v14, %v6640_v10  ;;  %v5988_v40 = vld [vmem:[#allocation8 + $0x148] sm:$0xff]   ;;  %v4904_v10 = vcombine.low %v6656_v37, %v6652_v30  ;;  %v5991_v14 = vld [vmem:[#allocation8 + $0x158] sm:$0xff]  }
 0x2be   : > { %5501 = vmatprep.subr.bf16.mxu1 %v5970_v62  ;;  %v4890_v63 = vcombine.low %v3078_v58, %v3091_v54  ;;  %v3464_v54 = vld [vmem:[#allocation2 + $0x28] sm:$0xf]  ;;  %v3547_v58 = vshrl.u32 %v3470_v52, 16 }
 0x2bf   : > { %v3497_v36 = vor.u32 %v3496_v3, %v3493_v23  ;;  %v3508_v37 = vshll.u32 %v3464_v54, 16  ;;  %v6688_v3 = vld [vmem:[#allocation2 + $0x1c] sm:$0xf] }
 0x2c0   : > { %5494 = vmatmul.mubr.bf16.gmra.mrb[4].mxu1 %v4872_v4  ;;  %v4888_v4 = vrot.slane %v3132_v55, 11  ;;  %v3519_v55 = vshrl.u32 %v3466_v51, 16 }
 0x2c1   : > { %5502 = vmatpush3.bf16.msra.mxu1 %v5970_v62  ;;  %5513 = vmatprep.mubr.bf16.mxu1 %v4889_v8  ;;  %v3140_v62 = vshll.u32 %v6652_v30, 16  ;;  %v3129_v8 = vor.u32 %v3127_v2, %v3126_v61  ;;  %v3498_v44 = vrot.slane %v3497_v36, 4  ;;  %v3505_v30 = vshrl.u32 %v3464_v54, 16  ;;  %v5993_v61 = vld [vmem:[#allocation8 + $0x168] sm:$0xff]  }
 0x2c2   : > { %5503 = vmatprep.subr.bf16.mxu1 %v5971_v7  ;;  %v3521_v0 = vrot.slane %v3519_v55, 4  ;;  %v3549_v2 = vrot.slane %v3547_v58, 4  ;;  %v3584_v54 = vshll.u32 %v3475_v42, 16 }
 0x2c3   : > { %v3142_v6 = vor.u32 %v3140_v62, %v3139_v56  ;;  %v3522_v56 = vshll.u32 %v3466_v51, 16  ;;  %v3533_v62 = vshrl.u32 %v3468_v57, 16 }
 0x2c5   : > { %5504 = vmatpush3.bf16.msra.mxu1 %v5971_v7  ;;  %v4887_v7 = vrot.slane %v3119_v60, 11  ;;  %v3550_v60 = vshll.u32 %v3470_v52, 16 }
 0x2c6   : > { %5505 = vmatprep.subr.bf16.mxu1 %v5972_v9 }
 0x2c7   : > { %v3130_v16 = vsel %vm6573_vm5, %v4887_v7, %v3129_v8  ;;  %v3465_v7 = vld [vmem:[#allocation2 + $0x2c] sm:$0x1]  ;;  %v3507_v8 = vrot.slane %v3505_v30, 4 }
 0x2c9   : > { %5506 = vmatpush3.bf16.msra.mxu1 %v5972_v9  ;;  %v5978_v9 = vld [vmem:[#allocation8 + $0x110] sm:$0xff]  }
 0x2ca   : > { %5507 = vmatprep.subr.bf16.mxu1 %v5973_v13 }
 0x2cd   : > { %5508 = vmatpush3.bf16.msra.mxu1 %v5973_v13  ;;  %v3143_v13 = vsel %vm6573_vm5, %v4888_v4, %v3142_v6  ;;  %v3552_v4 = vrot.slane %v3550_v60, 5  ;;  %v3474_v6 = vld [vmem:[#allocation2 + $0x64] sm:$0xf] }
 0x2ce   : > { %5509 = vmatprep.subr.bf16.mxu1 %v5974_v22  ;;  %v4892_v18 = vcombine.low %v3130_v16, %v3143_v13  ;;  %v3471_v13 = vld [vmem:[#allocation2 + $0x50] sm:$0x1]  ;;  %v5994_v16 = vld [vmem:[#allocation8 + $0x170] sm:$0xff]   ;;  %v3578_v25 = vshll.u32 %v3474_v6, 16 }
 0x2cf   : > { %v3553_v26 = vor.u32 %v3552_v4, %v3549_v2  ;;  %v3556_v27 = vshll.u32 %v3471_v13, 16  ;;  %v3586_v4 = vrot.slane %v3584_v54, 5 }
 0x2d0   : > { %v3580_v38 = vrot.slane %v3578_v25, 5  ;;  %v5999_v25 = vld [vmem:[#allocation8 + $0x198] sm:$0xff]  }
 0x2d1   : > { %5510 = vmatpush3.bf16.msra.mxu1 %v5974_v22  ;;  %v5982_v22 = vld [vmem:[#allocation8 + $0x128] sm:$0xff]  }
 0x2d2   : > { %5511 = vmatprep.subr.bf16.mxu1 %v5975_v33 }
 0x2d5   : > { %5512 = vmatpush3.bf16.msra.mxu1 %v5975_v33  ;;  %v3479_v33 = vrot.slane %v3477_v29, 4  ;;  %v3514_v29 = vshll.u32 %v3465_v7, 16 }
 0x2d6   : > { %5521 = vmatprep.subr.bf16.mxu1 %v5976_v50 }
 0x2d7   : > { %v3483_v41 = vor.u32 %v3482_v34, %v3479_v33  ;;  %v3542_v33 = vshll.u32 %v3469_v24, 16 }
 0x2d8   : > { %5514 = vmatmul.mubr.bf16.vlgmr.msra.gmra.mrb[0].mxu1 %v4890_v63  ;;  %v3536_v63 = vshll.u32 %v3468_v57, 16 }
 0x2d9   : > { %5517 = vmatprep.mubr.bf16.mxu1 %v4891_v1  ;;  %5522 = vmatpush3.bf16.msra.mxu1 %v5976_v50  ;;  %v3484_v48 = vrot.slane %v3483_v41, 4  ;;  %v3503_v50 = vsel %vm6446_vm2, %v3498_v44, %v3502_v45  ;;  %v3467_v1 = vld [vmem:[#allocation2 + $0x38] sm:$0x1]  ;;  %v3558_v41 = vrot.slane %v3556_v27, 5  ;;  %v3765_v44 = vshrl.u32 %v6688_v3, 16 }
 0x2da   : > { %5523 = vmatprep.subr.bf16.mxu1 %v5977_v59  ;;  %v6000_v27 = vld [vmem:[#allocation8 + $0x1a0] sm:$0xff]  }
 0x2db   : > { %v3489_v11 = vsel %vm6446_vm2, %v3484_v48, %v3488_v49  ;;  %v3767_v57 = vrot.slane %v3765_v44, 7 }
 0x2dc   : > { %v4913_v17 = vcombine.low %v3489_v11, %v3503_v50  ;;  %v3743_v50 = vld [vmem:[#allocation2 + $0x18] sm:$0x8] }
 0x2dd   : > { %5524 = vmatpush3.bf16.msra.mxu1 %v5977_v59  ;;  %v3524_v59 = vrot.slane %v3522_v56, 5  ;;  %v3760_v56 = vshrl.u32 %v3743_v50, 16 }
 0x2de   : > { %5525 = vmatprep.subr.bf16.mxu1 %v5978_v9 }
 0x2e0   : > { %5518 = vmatmul.mubr.bf16.gmra.mrb[4].mxu1 %v4892_v18  ;;  %v3535_v18 = vrot.slane %v3533_v62, 4 }
 0x2e1   : > { %5526 = vmatpush3.bf16.msra.mxu1 %v5978_v9  ;;  %5537 = vmatprep.mubr.bf16.mxu1 %v4901_v20  ;;  %v3510_v9 = vrot.slane %v3508_v37, 5  ;;  %v3472_v20 = vld [vmem:[#allocation2 + $0x58] sm:$0xf] }
 0x2e2   : > { %5527 = vmatprep.subr.bf16.mxu1 %v5980_v19  ;;  %v3561_v15 = vshrl.u32 %v3472_v20, 16  ;;  %v3564_v23 = vshll.u32 %v3472_v20, 16 }
 0x2e4   : > { %v3563_v48 = vrot.slane %v3561_v15, 4  ;;  %v3566_v49 = vrot.slane %v3564_v23, 5  ;;  %v6001_v15 = vld [vmem:[#allocation8 + $0x1a8] sm:$0xff]   ;;  %v6716_v23 = vld [vmem:[#allocation2 + $0x34] sm:$0xf] }
 0x2e5   : > { %5528 = vmatpush3.bf16.msra.mxu1 %v5980_v19  ;;  %v3538_v19 = vrot.slane %v3536_v63, 5  ;;  %v5997_v63 = vld [vmem:[#allocation8 + $0x188] sm:$0xff]  }
 0x2e6   : > { %5529 = vmatprep.subr.bf16.mxu1 %v5981_v21  ;;  %v3567_v60 = vor.u32 %v3566_v49, %v3563_v48  ;;  %v6726_v49 = vld [vmem:[#allocation2 + $0x64] sm:$0xf] }
 0x2e9   : > { %5530 = vmatpush3.bf16.msra.mxu1 %v5981_v21  ;;  %v3525_v21 = vor.u32 %v3524_v59, %v3521_v0  ;;  %v3768_v0 = vshll.u32 %v6688_v3, 16 }
 0x2ea   : > { %5531 = vmatprep.subr.bf16.mxu1 %v5982_v22 }
 0x2eb   : > { %v3526_v34 = vrot.slane %v3525_v21, 4  ;;  %v3770_v7 = vor.u32 %v3768_v0, %v3767_v57  ;;  %v6004_v0 = vld [vmem:[#allocation8 + $0x1c0] sm:$0xff]  }
 0x2ed   : > { %5532 = vmatpush3.bf16.msra.mxu1 %v5982_v22  ;;  %v3528_v22 = vshll.u32 %v3467_v1, 16 }
 0x2ee   : > { %5533 = vmatprep.subr.bf16.mxu1 %v5983_v12 }
 0x2ef   : > { %v3530_v35 = vrot.slane %v3528_v22, 5 }
 0x2f1   : > { %5534 = vmatpush3.bf16.msra.mxu1 %v5983_v12  ;;  %v3575_v12 = vshrl.u32 %v3474_v6, 16  ;;  %v3531_v52 = vsel %vm6446_vm2, %v3526_v34, %v3530_v35  ;;  %v4925_v6 = vrot.slane %v3760_v56, 11  ;;  %v3791_v35 = vshrl.u32 %v6716_v23, 16 }
 0x2f2   : > { %5535 = vmatprep.subr.bf16.mxu1 %v5984_v28 }
 0x2f3   : > { %v3577_v36 = vrot.slane %v3575_v12, 4  ;;  %v3771_v21 = vsel %vm6573_vm5, %v4925_v6, %v3770_v7 }
 0x2f5   : > { %5536 = vmatpush3.bf16.msra.mxu1 %v5984_v28  ;;  %v3511_v28 = vor.u32 %v3510_v9, %v3507_v8  ;;  %v3568_v9 = vrot.slane %v3567_v60, 4  ;;  %v3843_v60 = vshrl.u32 %v6726_v49, 16 }
 0x2f6   : > { %5545 = vmatprep.subr.bf16.mxu1 %v5986_v32 }
 0x2f7   : > { %v3512_v45 = vrot.slane %v3511_v28, 4  ;;  %v6712_v28 = vld [vmem:[#allocation2 + $0x40] sm:$0xf]  ;;  %v3845_v7 = vrot.slane %v3843_v60, 7 }
 0x2f8   : > { %5538 = vmatmul.mubr.bf16.vlgmr.msra.gmra.mrb[0].mxu1 %v4902_v39  ;;  %v6690_v39 = vld [vmem:[#allocation2 + $0x28] sm:$0xf] }
 0x2f9   : > { %5541 = vmatprep.mubr.bf16.mxu1 %v4903_v43  ;;  %5546 = vmatpush3.bf16.msra.mxu1 %v5986_v32  ;;  %v3539_v32 = vor.u32 %v3538_v19, %v3535_v18  ;;  %v3745_v43 = vld [vmem:[#allocation2 + $0x24] sm:$0x8]  ;;  %v3778_v51 = vshrl.u32 %v6690_v39, 16  ;;  %v3781_v8 = vshll.u32 %v6690_v39, 16 }
 0x2fa   : > { %5547 = vmatprep.subr.bf16.mxu1 %v5988_v40  ;;  %v3773_v37 = vshrl.u32 %v3745_v43, 16 }
 0x2fb   : > { %v3540_v11 = vrot.slane %v3539_v32, 4  ;;  %v3780_v59 = vrot.slane %v3778_v51, 7  ;;  %v6719_v32 = vld [vmem:[#allocation2 + $0x58] sm:$0xf] }
 0x2fc   : > { %v4926_v18 = vrot.slane %v3773_v37, 11  ;;  %v3830_v42 = vshrl.u32 %v6719_v32, 16 }
 0x2fd   : > { %5548 = vmatpush3.bf16.msra.mxu1 %v5988_v40  ;;  %v3554_v40 = vrot.slane %v3553_v26, 4  ;;  %v3783_v19 = vor.u32 %v3781_v8, %v3780_v59 }
 0x2fe   : > { %5549 = vmatprep.subr.bf16.mxu1 %v5990_v46 }
 0x2ff   : > { %v3559_v55 = vsel %vm6446_vm2, %v3554_v40, %v3558_v41  ;;  %v3784_v12 = vsel %vm6573_vm5, %v4926_v18, %v3783_v19  ;;  %v3747_v40 = vld [vmem:[#allocation2 + $0x30] sm:$0x8]  ;;  %v3753_v41 = vld [vmem:[#allocation2 + $0x54] sm:$0x8]  ;;  %v3846_v18 = vshll.u32 %v6726_v49, 16 }
 0x300   : > { %5542 = vmatmul.mubr.bf16.gmra.mrb[4].mxu1 %v4904_v10  ;;  %v5996_v10 = vld [vmem:[#allocation8 + $0x180] sm:$0xff]   ;;  %v4933_v26 = vcombine.low %v3771_v21, %v3784_v12  ;;  %v3786_v50 = vshrl.u32 %v3747_v40, 16  ;;  %v6005_v21 = vld [vmem:[#allocation8 + $0x1c8] sm:$0xff]  }
 0x301   : > { %5550 = vmatpush3.bf16.msra.mxu1 %v5990_v46  ;;  %5561 = vmatprep.mubr.bf16.mxu1 %v4913_v17  ;;  %v3516_v46 = vrot.slane %v3514_v29, 5  ;;  %v3473_v17 = vld [vmem:[#allocation2 + $0x5c] sm:$0x1]  ;;  %v6714_v29 = vld [vmem:[#allocation2 + $0x4c] sm:$0xf]  ;;  %v3848_v12 = vor.u32 %v3846_v18, %v3845_v7 }
 0x302   : > { %5551 = vmatprep.subr.bf16.mxu1 %v5991_v14  ;;  %v3570_v30 = vshll.u32 %v3473_v17, 16  ;;  %v3817_v34 = vshrl.u32 %v6714_v29, 16  ;;  %v6003_v17 = vld [vmem:[#allocation8 + $0x1b8] sm:$0xff]   ;;  %v3820_v51 = vshll.u32 %v6714_v29, 16  ;;  %v4179_v40 = vld [vmem:[#allocation2 + $0x1c] sm:$0xf] }
 0x303   : > { %v3517_v58 = vsel %vm6446_vm2, %v3512_v45, %v3516_v46  ;;  %v6724_v45 = vld [vmem:[#allocation2 + $0x70] sm:$0xf] }
 0x304   : > { %v3572_v13 = vrot.slane %v3570_v30, 5  ;;  %v3819_v48 = vrot.slane %v3817_v34, 7  ;;  %v3856_v54 = vshrl.u32 %v6724_v45, 16  ;;  %v6008_v34 = vld [vmem:[#allocation8 + $0x1d8] sm:$0xff]  }
 0x305   : > { %5552 = vmatpush3.bf16.msra.mxu1 %v5991_v14  ;;  %v3544_v14 = vrot.slane %v3542_v33, 5  ;;  %v3749_v33 = vld [vmem:[#allocation2 + $0x3c] sm:$0x8] }
 0x306   : > { %5553 = vmatprep.subr.bf16.mxu1 %v5992_v53  ;;  %v3573_v22 = vsel %vm6446_vm2, %v3568_v9, %v3572_v13  ;;  %v3799_v43 = vshrl.u32 %v3749_v33, 16  ;;  %v3822_v37 = vor.u32 %v3820_v51, %v3819_v48  ;;  %v3858_v8 = vrot.slane %v3856_v54, 7  ;;  %v6016_v54 = vld [vmem:[#allocation8 + $0x208] sm:$0xff]  }
 0x307   : > { %v3545_v62 = vsel %vm6446_vm2, %v3540_v11, %v3544_v14  ;;  %v3807_v11 = vshll.u32 %v6712_v28, 16  ;;  %v3825_v14 = vshrl.u32 %v3753_v41, 16  ;;  %v3859_v9 = vshll.u32 %v6724_v45, 16  ;;  %v4181_v41 = vld [vmem:[#allocation2 + $0x28] sm:$0xf] }
 0x308   : > { %v4915_v1 = vcombine.low %v3545_v62, %v3559_v55  ;;  %v3794_v55 = vshll.u32 %v6716_v23, 16  ;;  %v4928_v56 = vrot.slane %v3799_v43, 11  ;;  %v4927_v62 = vrot.slane %v3786_v50, 11  ;;  %v4180_v50 = vld [vmem:[#allocation2 + $0x20] sm:$0x1] }
 0x309   : > { %5554 = vmatpush3.bf16.msra.mxu1 %v5992_v53  ;;  %v3581_v53 = vor.u32 %v3580_v38, %v3577_v36  ;;  %v3751_v36 = vld [vmem:[#allocation2 + $0x48] sm:$0x8]  ;;  %v4930_v59 = vrot.slane %v3825_v14, 11  ;;  %v4199_v43 = vshll.u32 %v4179_v40, 16 }
 0x30a   : > { %5555 = vmatprep.subr.bf16.mxu1 %v5993_v61  ;;  %v6002_v38 = vld [vmem:[#allocation8 + $0x1b0] sm:$0xff]   ;;  %v3812_v46 = vshrl.u32 %v3751_v36, 16  ;;  %v6009_v36 = vld [vmem:[#allocation8 + $0x1e0] sm:$0xff]  }
 0x30b   : > { %v3582_v2 = vrot.slane %v3581_v53, 4  ;;  %v3755_v53 = vld [vmem:[#allocation2 + $0x60] sm:$0x8]  ;;  %v4201_v48 = vrot.slane %v4199_v43, 5 }
 0x30c   : > { %v4929_v30 = vrot.slane %v3812_v46, 11  ;;  %v4210_v46 = vshrl.u32 %v4181_v41, 16 }
 0x30d   : > { %5556 = vmatpush3.bf16.msra.mxu1 %v5993_v61  ;;  %v4914_v61 = vcombine.low %v3517_v58, %v3531_v52  ;;  %v3587_v20 = vsel %vm6446_vm2, %v3582_v2, %v3586_v4  ;;  %v3832_v52 = vrot.slane %v3830_v42, 7  ;;  %v3757_v58 = vld [vmem:[#allocation2 + $0x6c] sm:$0x8]  ;;  %v3838_v2 = vshrl.u32 %v3755_v53, 16 }
 0x30e   : > { %5557 = vmatprep.subr.bf16.mxu1 %v5994_v16  ;;  %v4916_v24 = vcombine.low %v3573_v22, %v3587_v20  ;;  %v3851_v4 = vshrl.u32 %v3757_v58, 16  ;;  %v3823_v13 = vsel %vm6573_vm5, %v4929_v30, %v3822_v37  ;;  %v4196_v42 = vshrl.u32 %v4179_v40, 16  ;;  %v6018_v30 = vld [vmem:[#allocation8 + $0x210] sm:$0xff]  }
 0x30f   : > { %v4931_v22 = vrot.slane %v3838_v2, 11  ;;  %v4946_v53 = vcombine.low %v6716_v23, %v6712_v28  ;;  %v6019_v23 = vld [vmem:[#allocation8 + $0x218] sm:$0xff]  }
 0x311   : > { %5558 = vmatpush3.bf16.msra.mxu1 %v5994_v16  ;;  %v5998_v16 = vld [vmem:[#allocation8 + $0x190] sm:$0xff]  }
 0x312   : > { %5559 = vmatprep.subr.bf16.mxu1 %v5995_v31 }
 0x315   : > { %5560 = vmatpush3.bf16.msra.mxu1 %v5995_v31  ;;  %v3804_v31 = vshrl.u32 %v6712_v28, 16  ;;  %v4948_v28 = vcombine.low %v6726_v49, %v6724_v45 }
 0x316   : > { %5569 = vmatprep.subr.bf16.mxu1 %v5996_v10 }
 0x317   : > { %v3806_v44 = vrot.slane %v3804_v31, 7 }
 0x318   : > { %5562 = vmatmul.mubr.bf16.vlgmr.msra.gmra.mrb[0].mxu1 %v4914_v61  ;;  %v3833_v61 = vshll.u32 %v6719_v32, 16 }
 0x319   : > { %5565 = vmatprep.mubr.bf16.mxu1 %v4915_v1  ;;  %5570 = vmatpush3.bf16.msra.mxu1 %v5996_v10  ;;  %v3793_v10 = vrot.slane %v3791_v35, 7  ;;  %v3809_v57 = vor.u32 %v3807_v11, %v3806_v44  ;;  %v4945_v35 = vcombine.low %v6688_v3, %v6690_v39  ;;  %v6012_v44 = vld [vmem:[#allocation8 + $0x1f8] sm:$0xff]   ;;  %v4213_v3 = vshll.u32 %v4181_v41, 16 }
 0x31a   : > { %5571 = vmatprep.subr.bf16.mxu1 %v5997_v63  ;;  %v3835_v1 = vor.u32 %v3833_v61, %v3832_v52  ;;  %v4198_v39 = vrot.slane %v4196_v42, 4  ;;  %v4212_v11 = vrot.slane %v4210_v46, 4  ;;  %v4205_v52 = vshll.u32 %v4180_v50, 16 }
 0x31b   : > { %v3810_v6 = vsel %vm6573_vm5, %v4928_v56, %v3809_v57  ;;  %v4215_v14 = vrot.slane %v4213_v3, 5  ;;  %v4947_v57 = vcombine.low %v6714_v29, %v6719_v32 }
 0x31c   : > { %v3836_v20 = vsel %vm6573_vm5, %v4930_v59, %v3835_v1  ;;  %v4202_v51 = vor.u32 %v4201_v48, %v4198_v39  ;;  %v4207_v60 = vrot.slane %v4205_v52, 5  ;;  %v6020_v59 = vld [vmem:[#allocation8 + $0x220] sm:$0xff]   ;;  %v4183_v1 = vld [vmem:[#allocation2 + $0x34] sm:$0xf] }
 0x31d   : > { %5572 = vmatpush3.bf16.msra.mxu1 %v5997_v63  ;;  %v3796_v63 = vor.u32 %v3794_v55, %v3793_v10  ;;  %v6014_v10 = vld [vmem:[#allocation8 + $0x200] sm:$0xff]   ;;  %v4216_v55 = vor.u32 %v4215_v14, %v4212_v11  ;;  %v4224_v45 = vshrl.u32 %v4183_v1, 16  ;;  %v4227_v49 = vshll.u32 %v4183_v1, 16  ;;  %v6023_v39 = vld [vmem:[#allocation8 + $0x238] sm:$0xff]  }
 0x31e   : > { %5573 = vmatprep.subr.bf16.mxu1 %v5998_v16  ;;  %v4203_v58 = vrot.slane %v4202_v51, 4  ;;  %v4192_v51 = vld [vmem:[#allocation2 + $0x68] sm:$0x1] }
 0x31f   : > { %v4217_v37 = vrot.slane %v4216_v55, 4 }
 0x320   : > { %5566 = vmatmul.mubr.bf16.gmra.mrb[4].mxu1 %v4916_v24  ;;  %v4935_v24 = vcombine.low %v3823_v13, %v3836_v20  ;;  %v4193_v20 = vld [vmem:[#allocation2 + $0x70] sm:$0xf] }
 0x321   : > { %5574 = vmatpush3.bf16.msra.mxu1 %v5998_v16  ;;  %5585 = vmatprep.mubr.bf16.mxu1 %v4933_v26  ;;  %v3797_v16 = vsel %vm6573_vm5, %v4927_v62, %v3796_v63  ;;  %v3861_v26 = vor.u32 %v3859_v9, %v3858_v8  ;;  %v4208_v62 = vsel %vm6446_vm2, %v4203_v58, %v4207_v60  ;;  %v4185_v63 = vld [vmem:[#allocation2 + $0x40] sm:$0xf] }
 0x322   : > { %5575 = vmatprep.subr.bf16.mxu1 %v5999_v25  ;;  %v4934_v19 = vcombine.low %v3797_v16, %v3810_v6  ;;  %v4238_v2 = vshrl.u32 %v4185_v63, 16  ;;  %v4189_v6 = vld [vmem:[#allocation2 + $0x58] sm:$0xf]  ;;  %v6021_v9 = vld [vmem:[#allocation8 + $0x228] sm:$0xff]  }
 0x323   : > { %v4266_v13 = vshrl.u32 %v4189_v6, 16  ;;  %v4269_v16 = vshll.u32 %v4189_v6, 16 }
 0x324   : > { %v4240_v18 = vrot.slane %v4238_v2, 4 }
 0x325   : > { %5576 = vmatpush3.bf16.msra.mxu1 %v5999_v25  ;;  %v4932_v25 = vrot.slane %v3851_v4, 11  ;;  %v4241_v4 = vshll.u32 %v4185_v63, 16 }
 0x326   : > { %5577 = vmatprep.subr.bf16.mxu1 %v6000_v27 }
 0x327   : > { %v3862_v31 = vsel %vm6573_vm5, %v4932_v25, %v3861_v26  ;;  %v4184_v25 = vld [vmem:[#allocation2 + $0x38] sm:$0x1]  ;;  %v4226_v26 = vrot.slane %v4224_v45, 4 }
 0x328   : > { %v4233_v3 = vshll.u32 %v4184_v25, 16 }
 0x329   : > { %5578 = vmatpush3.bf16.msra.mxu1 %v6000_v27  ;;  %v6006_v27 = vld [vmem:[#allocation8 + $0x1d0] sm:$0xff]  }
 0x32a   : > { %5579 = vmatprep.subr.bf16.mxu1 %v6001_v15  ;;  %v4235_v58 = vrot.slane %v4233_v3, 5 }
 0x32d   : > { %5580 = vmatpush3.bf16.msra.mxu1 %v6001_v15  ;;  %v3849_v15 = vsel %vm6573_vm5, %v4931_v22, %v3848_v12  ;;  %v4191_v12 = vld [vmem:[#allocation2 + $0x64] sm:$0xf] }
 0x32e   : > { %5581 = vmatprep.subr.bf16.mxu1 %v6002_v38  ;;  %v4936_v33 = vcombine.low %v3849_v15, %v3862_v31  ;;  %v4188_v15 = vld [vmem:[#allocation2 + $0x50] sm:$0x1]  ;;  %v6022_v31 = vld [vmem:[#allocation8 + $0x230] sm:$0xff]   ;;  %v4280_v41 = vshrl.u32 %v4191_v12, 16  ;;  %v4283_v42 = vshll.u32 %v4191_v12, 16 }
 0x330   : > { %v4282_v52 = vrot.slane %v4280_v41, 4 }
 0x331   : > { %5582 = vmatpush3.bf16.msra.mxu1 %v6002_v38  ;;  %v6010_v38 = vld [vmem:[#allocation8 + $0x1e8] sm:$0xff]  }
 0x332   : > { %5583 = vmatprep.subr.bf16.mxu1 %v6003_v17 }
 0x335   : > { %5584 = vmatpush3.bf16.msra.mxu1 %v6003_v17  ;;  %v4182_v17 = vld [vmem:[#allocation2 + $0x2c] sm:$0x1] }
 0x336   : > { %5593 = vmatprep.subr.bf16.mxu1 %v6004_v0  ;;  %v4219_v56 = vshll.u32 %v4182_v17, 16 }
 0x338   : > { %5586 = vmatmul.mubr.bf16.vlgmr.msra.gmra.mrb[0].mxu1 %v4934_v19  ;;  %v4221_v61 = vrot.slane %v4219_v56, 5  ;;  %v4243_v19 = vrot.slane %v4241_v4, 5  ;;  %v4194_v56 = vld [vmem:[#allocation2 + $0x74] sm:$0x1] }
 0x339   : > { %5589 = vmatprep.mubr.bf16.mxu1 %v4935_v24  ;;  %5594 = vmatpush3.bf16.msra.mxu1 %v6004_v0  ;;  %v4187_v0 = vld [vmem:[#allocation2 + $0x4c] sm:$0xf] }
 0x33a   : > { %5595 = vmatprep.subr.bf16.mxu1 %v6005_v21  ;;  %v4222_v29 = vsel %vm6446_vm2, %v4217_v37, %v4221_v61  ;;  %v4252_v7 = vshrl.u32 %v4187_v0, 16  ;;  %v4255_v8 = vshll.u32 %v4187_v0, 16  ;;  %v4289_v37 = vshll.u32 %v4192_v51, 16 }
 0x33b   : > { %v4957_v32 = vcombine.low %v4208_v62, %v4222_v29  ;;  %v4303_v29 = vshll.u32 %v4194_v56, 16 }
 0x33c   : > { %v4254_v22 = vrot.slane %v4252_v7, 4  ;;  %v4257_v24 = vrot.slane %v4255_v8, 5 }
 0x33d   : > { %5596 = vmatpush3.bf16.msra.mxu1 %v6005_v21  ;;  %v4186_v21 = vld [vmem:[#allocation2 + $0x44] sm:$0x1]  ;;  %v4305_v6 = vrot.slane %v4303_v29, 5 }
 0x33e   : > { %5597 = vmatprep.subr.bf16.mxu1 %v6006_v27  ;;  %v4247_v40 = vshll.u32 %v4186_v21, 16  ;;  %v4258_v43 = vor.u32 %v4257_v24, %v4254_v22 }
 0x340   : > { %5590 = vmatmul.mubr.bf16.gmra.mrb[4].mxu1 %v4936_v33  ;;  %v4268_v33 = vrot.slane %v4266_v13, 4  ;;  %v4249_v17 = vrot.slane %v4247_v40, 5  ;;  %v4977_v40 = vld [vmem:[%s6421_s21 + $0xf8] ss:$16 sps:$4 sm:$0xff]  }
 0x341   : > { %5598 = vmatpush3.bf16.msra.mxu1 %v6006_v27  ;;  %5609 = vmatprep.mubr.bf16.mxu1 %v4945_v35  ;;  %v4229_v27 = vrot.slane %v4227_v49, 5  ;;  %v4294_v35 = vshrl.u32 %v4193_v20, 16  ;;  %v4969_v49 = vld [vmem:[%s6849_s5] ss:$0 sm:$0xff] }
 0x342   : > { %5599 = vmatprep.subr.bf16.mxu1 %v6008_v34 }
 0x343   : > { %v4230_v46 = vor.u32 %v4229_v27, %v4226_v26 }
 0x345   : > { %5600 = vmatpush3.bf16.msra.mxu1 %v6008_v34  ;;  %v4271_v34 = vrot.slane %v4269_v16, 5  ;;  %v4970_v16 = vld [vmem:[%s6850_s6] ss:$0 sm:$0xff] }
 0x346   : > { %5601 = vmatprep.subr.bf16.mxu1 %v6009_v36 }
 0x347   : > { %v4272_v48 = vor.u32 %v4271_v34, %v4268_v33 }
 0x349   : > { %5602 = vmatpush3.bf16.msra.mxu1 %v6009_v36  ;;  %v4297_v36 = vshll.u32 %v4193_v20, 16  ;;  %v4273_v60 = vrot.slane %v4272_v48, 4  ;;  %v4505_v48 = vunpack.c.h.bf16 %v4977_v40 }
 0x34a   : > { %5603 = vmatprep.subr.bf16.mxu1 %v6010_v38 }
 0x34b   : > { %v4299_v11 = vrot.slane %v4297_v36, 5 }
 0x34d   : > { %5604 = vmatpush3.bf16.msra.mxu1 %v6010_v38  ;;  %v4244_v38 = vor.u32 %v4243_v19, %v4240_v18  ;;  %v4974_v18 = vld [vmem:[%s6421_s21 + $0xe0] ss:$16 sps:$4 sm:$0xff]  }
 0x34e   : > { %5605 = vmatprep.subr.bf16.mxu1 %v6011_v5  ;;  %v4502_v26 = vunpack.c.h.bf16 %v4974_v18  ;;  %v4500_v33 = vunpack.c.l.bf16 %v4974_v18 }
 0x34f   : > { %v4245_v14 = vrot.slane %v4244_v38, 4 }
 0x351   : > { %5606 = vmatpush3.bf16.msra.mxu1 %v6011_v5  ;;  %v4190_v5 = vld [vmem:[#allocation2 + $0x5c] sm:$0x1]  ;;  %v4250_v61 = vsel %vm6446_vm2, %v4245_v14, %v4249_v17  ;;  %v4503_v14 = vunpack.c.l.bf16 %v4977_v40 }
 0x352   : > { %5607 = vmatprep.subr.bf16.mxu1 %v6012_v44  ;;  %v4275_v50 = vshll.u32 %v4190_v5, 16 }
 0x355   : > { %5608 = vmatpush3.bf16.msra.mxu1 %v6012_v44  ;;  %v4261_v44 = vshll.u32 %v4188_v15, 16 }
 0x356   : > { %5617 = vmatprep.subr.bf16.mxu1 %v6014_v10 }
 0x357   : > { %v4263_v55 = vrot.slane %v4261_v44, 5 }
 0x358   : > { %5610 = vmatmul.mubr.bf16.vlgmr.msra.gmra.mrb[0].mxu1 %v4946_v53  ;;  %v4285_v53 = vrot.slane %v4283_v42, 5 }
 0x359   : > { %5613 = vmatprep.mubr.bf16.mxu1 %v4947_v57  ;;  %5618 = vmatpush3.bf16.msra.mxu1 %v6014_v10  ;;  %v4296_v10 = vrot.slane %v4294_v35, 4  ;;  %v4231_v57 = vrot.slane %v4230_v46, 4  ;;  %v4978_v46 = vld [vmem:[%s6421_s21 + $0x100] ss:$16 sps:$4 sm:$0xff]  }
 0x35a   : > { %5619 = vmatprep.subr.bf16.mxu1 %v6016_v54  ;;  %v4286_v62 = vor.u32 %v4285_v53, %v4282_v52  ;;  %v4506_v53 = vunpack.c.h.bf16 %v4978_v46 }
 0x35c   : > { %v4287_v2 = vrot.slane %v4286_v62, 4 }
 0x35d   : > { %5620 = vmatpush3.bf16.msra.mxu1 %v6016_v54  ;;  %v4259_v54 = vrot.slane %v4258_v43, 4 }
 0x35e   : > { %5621 = vmatprep.subr.bf16.mxu1 %v6018_v30 }
 0x360   : > { %5614 = vmatmul.mubr.bf16.gmra.mrb[4].mxu1 %v4948_v28  ;;  %v4300_v28 = vor.u32 %v4299_v11, %v4296_v10 }
 0x361   : > { %5622 = vmatpush3.bf16.msra.mxu1 %v6018_v30  ;;  %5633 = vmatprep.mubr.bf16.mxu1 %v4957_v32  ;;  %v4277_v30 = vrot.slane %v4275_v50, 5  ;;  %v4236_v32 = vsel %vm6446_vm2, %v4231_v57, %v4235_v58  ;;  %v4504_v57 = vunpack.c.l.bf16 %v4978_v46 }
 0x362   : > { %5623 = vmatprep.subr.bf16.mxu1 %v6019_v23  ;;  %v4958_v63 = vcombine.low %v4236_v32, %v4250_v61  ;;  %v4301_v4 = vrot.slane %v4300_v28, 4 }
 0x363   : > { %v4278_v0 = vsel %vm6446_vm2, %v4273_v60, %v4277_v30 }
 0x364   : > { %v4306_v8 = vsel %vm6446_vm2, %v4301_v4, %v4305_v6 }
 0x365   : > { %5624 = vmatpush3.bf16.msra.mxu1 %v6019_v23  ;;  %v4264_v23 = vsel %vm6446_vm2, %v4259_v54, %v4263_v55 }
 0x366   : > { %5625 = vmatprep.subr.bf16.mxu1 %v6020_v59  ;;  %v4959_v1 = vcombine.low %v4264_v23, %v4278_v0 }
 0x369   : > { %5626 = vmatpush3.bf16.msra.mxu1 %v6020_v59  ;;  %v4291_v59 = vrot.slane %v4289_v37, 5 }
 0x36a   : > { %5627 = vmatprep.subr.bf16.mxu1 %v6021_v9 }
 0x36b   : > { %v4292_v7 = vsel %vm6446_vm2, %v4287_v2, %v4291_v59 }
 0x36c   : > { %v4960_v45 = vcombine.low %v4292_v7, %v4306_v8 }
 0x36d   : > { %5628 = vmatpush3.bf16.msra.mxu1 %v6021_v9  ;;  %v4973_v9 = vld [vmem:[%s6421_s21 + $0xd8] ss:$16 sps:$4 sm:$0xff]  }
 0x36e   : > { %5629 = vmatprep.subr.bf16.mxu1 %v6022_v31  ;;  %v4501_v20 = vunpack.c.h.bf16 %v4973_v9  ;;  %v4499_v47 = vunpack.c.l.bf16 %v4973_v9 }
 0x371   : > { %5630 = vmatpush3.bf16.msra.mxu1 %v6022_v31 }
 0x372   : > { %5631 = vmatprep.subr.bf16.mxu1 %v6023_v39 }
 0x375   : > { %5632 = vmatpush3.bf16.msra.mxu1 %v6023_v39 }
 0x378   : > { %5634 = vmatmul.mubr.bf16.vlgmr.msra.gmra.mrb[0].mxu1 %v4958_v63 }
 0x379   : > { %5637 = vmatprep.mubr.bf16.mxu1 %v4959_v1 }
 0x380   : > { %5638 = vmatmul.mubr.bf16.gmra.mrb[4].mxu1 %v4960_v45 }
 0x44b   : > { %v5635_v13 = vpop.f32.mrb[0].mxu1 }
 0x44c   : > { %v4470_v19 = vmul.f32 %v5635_v13, %v4969_v49  ;;  %v4422_v21 = vpop.f32.mrb[1].mxu1 }
 0x44d   : > { %v4468_v22 = vmul.f32 %v4969_v49, %v4422_v21  ;;  %v5636_v24 = vpop.f32.mrb[2].mxu1 }
 0x44e   : > { %v4485_v12 = vadd.f32 %v4970_v16, %v4470_v19  ;;  %v4471_v25 = vmul.f32 %v5636_v24, %v4969_v49  ;;  %v4425_v27 = vpop.f32.mrb[3].mxu1 }
 0x44f   : > { %v4483_v15 = vadd.f32 %v4970_v16, %v4468_v22  ;;  %v4469_v31 = vmul.f32 %v4969_v49, %v4425_v27 }
 0x450   : > { %v4509_v34 = vadd.f32 %v4501_v20, %v4485_v12  ;;  %v4486_v35 = vadd.f32 %v4970_v16, %v4471_v25 }
 0x451   : > { %v4507_v36 = vadd.f32 %v4499_v47, %v4483_v15  ;;  %v4484_v38 = vadd.f32 %v4970_v16, %v4469_v31 }
 0x452   : > { %v4517_v5 = vmax.f32 %v4509_v34, 0.0  ;;  %v4510_v41 = vadd.f32 %v4502_v26, %v4486_v35 }
 0x453   : > { %v4515_v42 = vmax.f32 %v4507_v36, 0.0  ;;  %v4508_v43 = vadd.f32 %v4500_v33, %v4484_v38  ;;  %v5639_v44 = vpop.f32.mrb[4].mxu1 }
 0x454   : > { %4525 = vst [vmem:[%s6783_s26 + $0x10] sm:$0xff] %v4517_v5  ;;  %v4518_v3 = vmax.f32 %v4510_v41, 0.0  ;;  %v4474_v39 = vmul.f32 %v5639_v44, %v4969_v49  ;;  %v4438_v50 = vpop.f32.mrb[5].mxu1 }
 0x455   : > { %4523 = vst [vmem:[%s6783_s26] sm:$0xff] %v4515_v42  ;;  %v4516_v10 = vmax.f32 %v4508_v43, 0.0  ;;  %v4472_v11 = vmul.f32 %v4969_v49, %v4438_v50  ;;  %v5640_v17 = vpop.f32.mrb[6].mxu1 }
 0x456   : > { %4526 = vst [vmem:[%s6783_s26 + $0x18] sm:$0xff] %v4518_v3  ;;  %v4489_v51 = vadd.f32 %v4970_v16, %v4474_v39  ;;  %v4475_v52 = vmul.f32 %v5640_v17, %v4969_v49  ;;  %v4441_v54 = vpop.f32.mrb[7].mxu1 }
 0x457   : > { %4524 = vst [vmem:[%s6783_s26 + $0x8] sm:$0xff] %v4516_v10  ;;  %v4487_v55 = vadd.f32 %v4970_v16, %v4472_v11  ;;  %v4473_v56 = vmul.f32 %v4969_v49, %v4441_v54 }
 0x458   : > { %v4513_v58 = vadd.f32 %v4505_v48, %v4489_v51  ;;  %v4490_v60 = vadd.f32 %v4970_v16, %v4475_v52 }
 0x459   : > { %v4511_v30 = vadd.f32 %v4503_v14, %v4487_v55  ;;  %v4488_v37 = vadd.f32 %v4970_v16, %v4473_v56 }
 0x45a   : > { %v4521_v61 = vmax.f32 %v4513_v58, 0.0  ;;  %v4514_v62 = vadd.f32 %v4506_v53, %v4490_v60 }
 0x45b   : > { %v4519_v28 = vmax.f32 %v4511_v30, 0.0  ;;  %v4512_v29 = vadd.f32 %v4504_v57, %v4488_v37 }
 0x45c   : > { %4529 = vst [vmem:[%s6783_s26 + $0x30] sm:$0xff] %v4521_v61  ;;  %v4522_v23 = vmax.f32 %v4514_v62, 0.0 }
 0x45d   : > { %4527 = vst [vmem:[%s6783_s26 + $0x20] sm:$0xff] %v4519_v28  ;;  %v4520_v32 = vmax.f32 %v4512_v29, 0.0 }
 0x45e   : > { %4530 = vst [vmem:[%s6783_s26 + $0x38] sm:$0xff] %v4522_v23 }
 0x45f   : > { %4528 = vst [vmem:[%s6783_s26 + $0x28] sm:$0xff] %v4520_v32 }
 0x460   : > { %6123 = shalt.err (!%p6120_p1)
}
 0x461   : > { %s6124_s18 = scalar_lea.hbm %s6795_s10, 1024  ;;  %s6128_s1 = scalar_lea.hbm %s6852_s8, 2048 }
 0x462   : > { %p6125_p13 = scmp.ne.s32.totalorder %s6795_s10, %s6124_s18  ;;  %p6129_p4 = scmp.lt.u32.totalorder %s6795_s10, %s6852_s8 }
 0x463   : > { %p6130_p5 = scmp.lt.u32.totalorder %s6128_s1, %s6124_s18  ;;  %p6132_p11 = scmp.lt.u32.totalorder %s6124_s18, %s6795_s10 }
 0x464   : > { %p6126_p6 = pnand %p6125_p13, %p6876_p0 }
 0x465   : > { %p6131_p8 = por %p6130_p5, %p6129_p4 }
 0x466   : > { %p6127_p10 = pneg %p6126_p6 }
 0x467   : > { %p6133_p2 = por %p6132_p11, %p6131_p8 }
 0x469   : > { %p6134_p3 = pnand %p6133_p2, %p6127_p10 }
 0x46b   : > { %6137 = shalt.err (!%p6134_p3)
}
 0x46c   : > { %s6189_s14 = smov 128   ;;  %s6190_s21 = smov 8  }
 0x46d   : > { %5782 = dma.vmem_to_hbm [thread:$0]  (%p6876_p0), %s6797_s24, 1024, %s6795_s10, %s4532_s7, %s6189_s14, %s6189_s14, %s6190_s21  }
 0x46e PF: > { %s4560_s12 = sand.u32 1, %s6168_s27   ;;  %p6877_p7 = scmp.ne.s32.totalorder %s6860_s11, 0 }
 0x46f   : > { %p6878_p9 = scmp.ge.s32.totalorder %s6180_s30, 2  ;;  %s4561_s23 = scalar_lea.sflag [#allocation5], %s4560_s12 }
 0x471   : > { %p5796_p12 = pnand %p6878_p9, %p6877_p7 }
 0x473   : > { %6163 = dma.done.wait (!%p5796_p12), %s4561_s23, 1024  }
 0x474   : > { %6165 = vsyncadd (!%p5796_p12), %s4561_s23, 4294966272  ;;  %p22_p1 = scmp.ge.s32.totalorder %s6352_s15, 4   ;;  %s6879_s27 = smov %s6172_s28 }
 0x475   : > { %s6880_s28 = smov %s6176_s29  ;;  %s6881_s29 = smov %s6368_s20 }
 0x476   : > { %s6882_s30 = smov %s6352_s15  ;;  %24 = sbr.rel (!%p22_p1) target bundleno = 8 (0x8), region = 128 }
 0x47d   :  { %4566 = vsyncpa [#allocation4], 1 }
 0x47e   :  { %4568 = vsyncpa [#allocation4 + $0x1], 1 }
 0x47f   :  { %4569 = vsyncpa [#allocation7], 1 }
 0x480   :  { %4570 = vsyncpa [#allocation5], 1 }
 0x481   :  { %4572 = vsyncpa [#allocation5 + $0x1], 1 }

</bundles_post_ra>
